<compile_context>
chip_gen: v6e
topology: v6e:2x2x1
jax: 0.10.0
libtpu: 0.0.40
codegen_flags: <defaults>
</compile_context>

<pallas_src>
import functools

import numpy as np
import jax
import jax.numpy as jnp
from jax.experimental import pallas as pl
from jax.experimental.pallas import tpu as pltpu

# --- module configuration (small, consistent shapes) -------------------------
BATCH = 2
CHANNELS = 64                      # Conv1d in/out channels are hard-coded to 64
BAND_SIZE = 256                    # time == band_size  -> avg_pool branch taken
NOISE_FRAMES = 8                   # explicit noise_frames arg
NOISE_SAMPLES = BAND_SIZE // NOISE_FRAMES   # 32
NOISE_COEFFS = NOISE_SAMPLES + 1            # 33
WIN = (NOISE_COEFFS - 1) * 2                # 64  (noise_bank2 window size)
HOP = WIN // 2                              # 32
NFRAMES = NOISE_FRAMES                      # frames entering noise_bank2 (8)
CONSTRAIN = True


def ddsp_kernel(x_ref, wn_ref, wf_ref, bias_ref, spans_ref, cumb_ref,
                apool_t_ref, la_t_ref, npool_ref, rr_ref, ri_ref, cri_ref,
                harm_ref, noise_ref):
    f32 = jnp.float32
    bf16 = jnp.bfloat16

    xb = x_ref[0]                                                    # (C, T) bf16

    # fused 1x1 convs (amp | freq | noise) + clamp(0, 1): one bf16 MXU matmul
    conv = jnp.dot(wf_ref[...], xb, preferred_element_type=f32) + bias_ref[...]
    conv = jnp.clip(conv, 0.0, 1.0)                                  # (161, T) f32
    amp = conv[:CHANNELS]                                            # (64, T)
    frq = conv[CHANNELS:2 * CHANNELS]                                # (64, T)
    nmg = conv[2 * CHANNELS:2 * CHANNELS + NOISE_COEFFS]             # (33, T)

    # avg_pool1d(64, 1, 32)[..., :-1] over time == banded matmul (bf16 in, f32 acc)
    amp_p = jnp.dot(amp.astype(bf16), apool_t_ref[...],
                    preferred_element_type=f32)                      # (64, T)

    # constrain + pool + cumsum folded into ONE f32 matmul:
    #   cum[c, t] = (t+1)*bands[c] + sum_t' (freq*spans)[c, t'] * (ltri@apool)[t, t']
    frq_s = frq * spans_ref[...]                                     # (64, T) f32
    cum = cumb_ref[...] + jnp.dot(frq_s, la_t_ref[...],
                                  preferred_element_type=f32)        # (64, T) f32

    # harmonic output: mean over channels (sublanes) -> lane-dense (1, T) store
    harm_ref[0] = jnp.mean(jnp.sin(cum) * amp_p, axis=0, keepdims=True)

    # --- noise bank -----------------------------------------------------------
    # per-frame magnitudes in (F, K) layout: npool (F,T) contracted against nmg (K,T)
    mag = jnp.dot(npool_ref[...], nmg.T, preferred_element_type=f32)  # (F, K)
    wn = wn_ref[0]                                                    # (F, W) hann-windowed noise
    sr = jnp.dot(wn, rr_ref[...], preferred_element_type=f32)         # rfft real (F, K)
    si = jnp.dot(wn, ri_ref[...], preferred_element_type=f32)         # rfft imag (F, K)
    # filtered spectrum -> irfft, fused into a single matmul; the hann synthesis
    # window and noise_factor are already folded into cri.
    ft = jnp.concatenate([mag * sr, mag * si], axis=-1)               # (F, 2K)
    aw = jnp.dot(ft, cri_ref[...], preferred_element_type=f32)        # (F, W)

    # overlap-add (hop = W/2), trimmed to F*HOP samples:
    #   out[f*HOP + r] = aw[f, r] + aw[f-1, r + HOP]
    first = aw[:, :HOP]                                               # (F, HOP)
    prev_tail = jnp.concatenate(                                      # off-MXU sublane shift
        [jnp.zeros((1, HOP), f32), aw[:NFRAMES - 1, HOP:]], axis=0)   # (F, HOP)
    noise_ref[0] = first + prev_tail


@functools.lru_cache(maxsize=None)
def _constants():
    """Built once; kept on device and constant-folded into the jitted forward."""
    T, C, K, F, W = BAND_SIZE, CHANNELS, NOISE_COEFFS, NFRAMES, WIN
    t = np.arange(T)
    # avg_pool1d(64, 1, 32)[..., :-1]: out[t] = mean(x[t-32:t+32]) (zeros outside, /64)
    apool = ((t[None, :] >= t[:, None] - 32) &
             (t[None, :] <= t[:, None] + 31)).astype(np.float32) / 64.0      # (T, T)
    # inclusive cumsum over time
    ltri = (t[None, :] <= t[:, None]).astype(np.float32)                     # (T, T)
    # fold cumsum o pooling into a single matrix
    la = (ltri @ apool).astype(np.float32)                                   # (T, T)
    # non-overlapping avg pool (k=s=32), frames on rows
    f = np.arange(F)
    npool = ((t[None, :] >= f[:, None] * NOISE_SAMPLES) &
             (t[None, :] < (f[:, None] + 1) * NOISE_SAMPLES)
             ).astype(np.float32) / NOISE_SAMPLES                            # (F, T)
    # DFT matrices (ortho-normalized rfft / irfft) for the 64-sample noise frames
    n = np.arange(W)
    k = np.arange(K)
    ang = 2.0 * np.pi * np.outer(n, k) / W                                   # (W, K)
    rr = (np.cos(ang) / np.sqrt(W)).astype(np.float32)                       # rfft real
    ri = (-np.sin(ang) / np.sqrt(W)).astype(np.float32)                      # rfft imag
    scale = np.full((K,), 2.0)
    scale[0] = 1.0
    scale[-1] = 1.0
    cr = (scale[:, None] * np.cos(ang.T) / np.sqrt(W)).astype(np.float32)    # (K, W)
    ci = (-scale[:, None] * np.sin(ang.T) / np.sqrt(W)).astype(np.float32)   # (K, W)
    # periodic hann window (torch.hann_window default)
    hann = (0.5 - 0.5 * np.cos(2.0 * np.pi * n / W)).astype(np.float32)
    # constrain constants
    bands = (np.geomspace(0.01, 1.0, C) * np.pi).astype(np.float32)
    spans = np.diff(np.concatenate([[0.0], bands])).astype(np.float32)
    cum_bands = ((t[None, :] + 1.0) * bands[:, None]).astype(np.float32)     # (C, T)
    frame_idx = np.arange(F)[:, None] * HOP + np.arange(W)[None, :]          # (F, W)
    return dict(
        apool_t=jnp.asarray(apool.T, jnp.bfloat16),   # bf16 MXU weight side (exact: 1/64)
        la_t=jnp.asarray(la.T, jnp.float32),          # f32: cumulative-phase path
        npool=jnp.asarray(npool),
        rr=jnp.asarray(rr), ri=jnp.asarray(ri),
        cr=jnp.asarray(cr), ci=jnp.asarray(ci),
        hann=jnp.asarray(hann),
        spans=jnp.asarray(spans.reshape(C, 1)),
        cum_bands=jnp.asarray(cum_bands),
        frame_idx=frame_idx,                          # numpy: static gather indices
    )


def init_params(key):
    ks = jax.random.split(key, 6)
    scale = 1.0 / np.sqrt(CHANNELS)          # ~ PyTorch Conv1d default init range
    u = lambda k, shape: jax.random.uniform(k, shape, jnp.float32, -scale, scale)
    return dict(
        w_amp=u(ks[0], (CHANNELS, CHANNELS)),        # Conv1d(64, 64, 1) weight (kernel squeezed)
        b_amp=u(ks[1], (CHANNELS,)),
        w_freq=u(ks[2], (CHANNELS, CHANNELS)),
        b_freq=u(ks[3], (CHANNELS,)),
        w_noise=u(ks[4], (NOISE_COEFFS, CHANNELS)),  # Conv1d(64, noise_coeffs, 1)
        b_noise=u(ks[5], (NOISE_COEFFS,)),
        noise_factor=jnp.ones((), jnp.float32),
    )


def prepare_params(params):
    """One-time fusing / casting of the Conv1d weights for the kernel."""
    w_fused = jnp.concatenate(
        [params['w_amp'], params['w_freq'], params['w_noise']], axis=0)       # (161, 64)
    b_fused = jnp.concatenate(
        [params['b_amp'], params['b_freq'], params['b_noise']])[:, None]      # (161, 1)
    return dict(w_fused=w_fused.astype(jnp.bfloat16),
                b_fused=b_fused.astype(jnp.float32),
                noise_factor=params['noise_factor'])


@jax.jit
def ddsp_forward(x, prepped, noise_key):
    B, C, T = x.shape
    assert C == CHANNELS and T == BAND_SIZE
    c = _constants()

    # glue: random noise bank frames (uniform noise -> hop-strided frames * hann)
    total = HOP * NFRAMES
    noise = jax.random.uniform(noise_key, (B, total), jnp.float32, -1.0, 1.0)
    noise = jnp.pad(noise, ((0, 0), (0, HOP)))
    frames = noise[:, c['frame_idx']] * c['hann'][None, None, :]              # (B, F, W)

    # fold synthesis hann window + noise_factor into the stacked inverse-DFT matrix
    nf = prepped['noise_factor']
    cri = jnp.concatenate([c['cr'] * c['hann'][None, :],
                           c['ci'] * c['hann'][None, :]], axis=0) * nf        # (2K, W)

    args = (x.astype(jnp.bfloat16), frames,
            prepped['w_fused'], prepped['b_fused'],
            c['spans'], c['cum_bands'], c['apool_t'], c['la_t'],
            c['npool'], c['rr'], c['ri'], cri)

    in_specs = [
        pl.BlockSpec((1, CHANNELS, T), lambda b: (b, 0, 0)),
        pl.BlockSpec((1, NFRAMES, WIN), lambda b: (b, 0, 0)),
    ] + [pl.BlockSpec(a.shape, lambda b: (0, 0)) for a in args[2:]]

    out_shape = (jax.ShapeDtypeStruct((B, 1, T), jnp.float32),
                 jax.ShapeDtypeStruct((B, NFRAMES, HOP), jnp.float32))
    out_specs = (pl.BlockSpec((1, 1, T), lambda b: (b, 0, 0)),
                 pl.BlockSpec((1, NFRAMES, HOP), lambda b: (b, 0, 0)))

    harm, noise_fh = pl.pallas_call(
        ddsp_kernel,
        out_shape=out_shape,
        grid_spec=pltpu.PrefetchScalarGridSpec(
            num_scalar_prefetch=0,
            grid=(B,),
            in_specs=in_specs,
            out_specs=out_specs,
        ),
        compiler_params=pltpu.CompilerParams(
            dimension_semantics=("parallel",)),
    )(*args)

    # glue: combine components; (F, HOP) row-major flatten is exactly the time axis
    return harm + noise_fh.reshape(B, 1, T)


if __name__ == "__main__":
    key = jax.random.PRNGKey(0)
    pkey, xkey, nkey = jax.random.split(key, 3)
    params = init_params(pkey)
    prepped = prepare_params(params)
    x = jax.random.normal(xkey, (BATCH, CHANNELS, BAND_SIZE), jnp.float32)
    out = ddsp_forward(x, prepped, nkey)
    out = jax.block_until_ready(out)
    assert out.shape == (BATCH, 1, BAND_SIZE), out.shape
    assert bool(jnp.all(jnp.isfinite(out)))
    print("KERNEL_OK")
</pallas_src>

<mosaic_0001>
module attributes {stable_mosaic.version = 11 : i64} {
  func.func @ddsp_kernel(%arg0: i32, %arg1: memref<1x64x256xbf16, #tpu.memory_space<vmem>>, %arg2: memref<1x8x64xf32, #tpu.memory_space<vmem>>, %arg3: memref<161x64xbf16, #tpu.memory_space<vmem>>, %arg4: memref<161x1xf32, #tpu.memory_space<vmem>>, %arg5: memref<64x1xf32, #tpu.memory_space<vmem>>, %arg6: memref<64x256xf32, #tpu.memory_space<vmem>>, %arg7: memref<256x256xbf16, #tpu.memory_space<vmem>>, %arg8: memref<256x256xf32, #tpu.memory_space<vmem>>, %arg9: memref<8x256xf32, #tpu.memory_space<vmem>>, %arg10: memref<64x33xf32, #tpu.memory_space<vmem>>, %arg11: memref<64x33xf32, #tpu.memory_space<vmem>>, %arg12: memref<66x64xf32, #tpu.memory_space<vmem>>, %arg13: memref<1x1x256xf32, #tpu.memory_space<vmem>>, %arg14: memref<1x8x32xf32, #tpu.memory_space<vmem>>) attributes {dimension_semantics = [#tpu.dimension_semantics<parallel>], iteration_bounds = array<i64: 2>, scalar_prefetch = 0 : i64, scratch_operands = 0 : i64, tpu.core_type = #tpu.core_type<tc>, window_params = [{transform_indices = @transform_0, window_bounds = array<i64: 1, 64, 256>}, {transform_indices = @transform_1, window_bounds = array<i64: 1, 8, 64>}, {pipeline_mode = #tpu.pipeline_mode<synchronous>, transform_indices = @transform_2, window_bounds = array<i64: 161, 64>}, {pipeline_mode = #tpu.pipeline_mode<synchronous>, transform_indices = @transform_3, window_bounds = array<i64: 161, 1>}, {pipeline_mode = #tpu.pipeline_mode<synchronous>, transform_indices = @transform_4, window_bounds = array<i64: 64, 1>}, {pipeline_mode = #tpu.pipeline_mode<synchronous>, transform_indices = @transform_5, window_bounds = array<i64: 64, 256>}, {pipeline_mode = #tpu.pipeline_mode<synchronous>, transform_indices = @transform_6, window_bounds = array<i64: 256, 256>}, {pipeline_mode = #tpu.pipeline_mode<synchronous>, transform_indices = @transform_7, window_bounds = array<i64: 256, 256>}, {pipeline_mode = #tpu.pipeline_mode<synchronous>, transform_indices = @transform_8, window_bounds = array<i64: 8, 256>}, {pipeline_mode = #tpu.pipeline_mode<synchronous>, transform_indices = @transform_9, window_bounds = array<i64: 64, 33>}, {pipeline_mode = #tpu.pipeline_mode<synchronous>, transform_indices = @transform_10, window_bounds = array<i64: 64, 33>}, {pipeline_mode = #tpu.pipeline_mode<synchronous>, transform_indices = @transform_11, window_bounds = array<i64: 66, 64>}, {transform_indices = @transform_12, window_bounds = array<i64: 1, 1, 256>}, {transform_indices = @transform_13, window_bounds = array<i64: 1, 8, 32>}]} {
    %c0 = arith.constant 0 : index
    %c0_0 = arith.constant 0 : index
    %c0_1 = arith.constant 0 : index
    %0 = vector.load %arg1[%c0, %c0_0, %c0_1] : memref<1x64x256xbf16, #tpu.memory_space<vmem>>, vector<1x64x256xbf16>
    %1 = vector.shape_cast %0 : vector<1x64x256xbf16> to vector<64x256xbf16>
    %c0_2 = arith.constant 0 : index
    %c0_3 = arith.constant 0 : index
    %2 = vector.load %arg3[%c0_2, %c0_3] : memref<161x64xbf16, #tpu.memory_space<vmem>>, vector<161x64xbf16>
    %cst = arith.constant dense<0.000000e+00> : vector<161x256xf32>
    %3 = tpu.matmul %2, %1, %cst {dimension_numbers = #tpu.dot_dimension_numbers<[1], [0], [0], [1], [0, 0, 1, 1], [], []>} : vector<161x64xbf16>, vector<64x256xbf16>, vector<161x256xf32> -> vector<161x256xf32>
    %c0_4 = arith.constant 0 : index
    %c0_5 = arith.constant 0 : index
    %4 = vector.load %arg4[%c0_4, %c0_5] : memref<161x1xf32, #tpu.memory_space<vmem>>, vector<161x1xf32>
    %5 = vector.broadcast %4 : vector<161x1xf32> to vector<161x256xf32>
    %6 = arith.addf %3, %5 : vector<161x256xf32>
    %cst_6 = arith.constant 0.000000e+00 : f32
    %cst_7 = arith.constant 1.000000e+00 : f32
    %7 = vector.broadcast %cst_6 : f32 to vector<161x256xf32>
    %8 = arith.maximumf %7, %6 : vector<161x256xf32>
    %9 = vector.broadcast %cst_7 : f32 to vector<161x256xf32>
    %10 = arith.minimumf %9, %8 : vector<161x256xf32>
    %11 = vector.extract_strided_slice %10 {offsets = [0, 0], sizes = [64, 256], strides = [1, 1]} : vector<161x256xf32> to vector<64x256xf32>
    %12 = vector.extract_strided_slice %10 {offsets = [64, 0], sizes = [64, 256], strides = [1, 1]} : vector<161x256xf32> to vector<64x256xf32>
    %13 = vector.extract_strided_slice %10 {offsets = [128, 0], sizes = [33, 256], strides = [1, 1]} : vector<161x256xf32> to vector<33x256xf32>
    %14 = arith.truncf %11 : vector<64x256xf32> to vector<64x256xbf16>
    %c0_8 = arith.constant 0 : index
    %c0_9 = arith.constant 0 : index
    %15 = vector.load %arg7[%c0_8, %c0_9] : memref<256x256xbf16, #tpu.memory_space<vmem>>, vector<256x256xbf16>
    %cst_10 = arith.constant dense<0.000000e+00> : vector<64x256xf32>
    %16 = tpu.matmul %14, %15, %cst_10 {dimension_numbers = #tpu.dot_dimension_numbers<[1], [0], [0], [1], [0, 0, 1, 1], [], []>} : vector<64x256xbf16>, vector<256x256xbf16>, vector<64x256xf32> -> vector<64x256xf32>
    %c0_11 = arith.constant 0 : index
    %c0_12 = arith.constant 0 : index
    %17 = vector.load %arg5[%c0_11, %c0_12] : memref<64x1xf32, #tpu.memory_space<vmem>>, vector<64x1xf32>
    %18 = vector.broadcast %17 : vector<64x1xf32> to vector<64x256xf32>
    %19 = arith.mulf %12, %18 : vector<64x256xf32>
    %c0_13 = arith.constant 0 : index
    %c0_14 = arith.constant 0 : index
    %20 = vector.load %arg6[%c0_13, %c0_14] : memref<64x256xf32, #tpu.memory_space<vmem>>, vector<64x256xf32>
    %c0_15 = arith.constant 0 : index
    %c0_16 = arith.constant 0 : index
    %21 = vector.load %arg8[%c0_15, %c0_16] : memref<256x256xf32, #tpu.memory_space<vmem>>, vector<256x256xf32>
    %cst_17 = arith.constant dense<0.000000e+00> : vector<64x256xf32>
    %22 = tpu.matmul %19, %21, %cst_17 {dimension_numbers = #tpu.dot_dimension_numbers<[1], [0], [0], [1], [0, 0, 1, 1], [], []>} : vector<64x256xf32>, vector<256x256xf32>, vector<64x256xf32> -> vector<64x256xf32>
    %23 = arith.addf %20, %22 : vector<64x256xf32>
    %24 = math.sin %23 : vector<64x256xf32>
    %25 = arith.mulf %24, %16 : vector<64x256xf32>
    %cst_18 = arith.constant dense<0.000000e+00> : vector<256xf32>
    %26 = vector.multi_reduction <add>, %25, %cst_18 [0] : vector<64x256xf32> to vector<256xf32>
    %27 = vector.shape_cast %26 : vector<256xf32> to vector<1x256xf32>
    %cst_19 = arith.constant 6.400000e+01 : f32
    %28 = vector.broadcast %cst_19 : f32 to vector<1x256xf32>
    %29 = arith.divf %27, %28 : vector<1x256xf32>
    %c0_20 = arith.constant 0 : index
    %c0_21 = arith.constant 0 : index
    %c0_22 = arith.constant 0 : index
    %30 = vector.load %arg13[%c0_20, %c0_21, %c0_22] : memref<1x1x256xf32, #tpu.memory_space<vmem>>, vector<1x1x256xf32>
    %31 = vector.shape_cast %30 : vector<1x1x256xf32> to vector<1x256xf32>
    %32 = vector.shape_cast %29 : vector<1x256xf32> to vector<1x1x256xf32>
    tpu.vector_store %arg13[%c0_20, %c0_21, %c0_22], %32 {strides = array<i32>} : memref<1x1x256xf32, #tpu.memory_space<vmem>>, vector<1x1x256xf32>,
    %c0_23 = arith.constant 0 : index
    %c0_24 = arith.constant 0 : index
    %33 = vector.load %arg9[%c0_23, %c0_24] : memref<8x256xf32, #tpu.memory_space<vmem>>, vector<8x256xf32>
    %34 = tpu.transpose %13, [1, 0] : vector<33x256xf32> -> vector<256x33xf32>
    %cst_25 = arith.constant dense<0.000000e+00> : vector<8x33xf32>
    %35 = tpu.matmul %33, %34, %cst_25 {dimension_numbers = #tpu.dot_dimension_numbers<[1], [0], [0], [1], [0, 0, 1, 1], [], []>} : vector<8x256xf32>, vector<256x33xf32>, vector<8x33xf32> -> vector<8x33xf32>
    %c0_26 = arith.constant 0 : index
    %c0_27 = arith.constant 0 : index
    %c0_28 = arith.constant 0 : index
    %36 = vector.load %arg2[%c0_26, %c0_27, %c0_28] : memref<1x8x64xf32, #tpu.memory_space<vmem>>, vector<1x8x64xf32>
    %37 = vector.shape_cast %36 : vector<1x8x64xf32> to vector<8x64xf32>
    %c0_29 = arith.constant 0 : index
    %c0_30 = arith.constant 0 : index
    %38 = vector.load %arg10[%c0_29, %c0_30] : memref<64x33xf32, #tpu.memory_space<vmem>>, vector<64x33xf32>
    %cst_31 = arith.constant dense<0.000000e+00> : vector<8x33xf32>
    %39 = tpu.matmul %37, %38, %cst_31 {dimension_numbers = #tpu.dot_dimension_numbers<[1], [0], [0], [1], [0, 0, 1, 1], [], []>} : vector<8x64xf32>, vector<64x33xf32>, vector<8x33xf32> -> vector<8x33xf32>
    %c0_32 = arith.constant 0 : index
    %c0_33 = arith.constant 0 : index
    %40 = vector.load %arg11[%c0_32, %c0_33] : memref<64x33xf32, #tpu.memory_space<vmem>>, vector<64x33xf32>
    %cst_34 = arith.constant dense<0.000000e+00> : vector<8x33xf32>
    %41 = tpu.matmul %37, %40, %cst_34 {dimension_numbers = #tpu.dot_dimension_numbers<[1], [0], [0], [1], [0, 0, 1, 1], [], []>} : vector<8x64xf32>, vector<64x33xf32>, vector<8x33xf32> -> vector<8x33xf32>
    %42 = arith.mulf %35, %39 : vector<8x33xf32>
    %43 = arith.mulf %35, %41 : vector<8x33xf32>
    %44 = tpu.concatenate %42, %43 in 1 : vector<8x33xf32>, vector<8x33xf32> -> vector<8x66xf32>
    %c0_35 = arith.constant 0 : index
    %c0_36 = arith.constant 0 : index
    %45 = vector.load %arg12[%c0_35, %c0_36] : memref<66x64xf32, #tpu.memory_space<vmem>>, vector<66x64xf32>
    %cst_37 = arith.constant dense<0.000000e+00> : vector<8x64xf32>
    %46 = tpu.matmul %44, %45, %cst_37 {dimension_numbers = #tpu.dot_dimension_numbers<[1], [0], [0], [1], [0, 0, 1, 1], [], []>} : vector<8x66xf32>, vector<66x64xf32>, vector<8x64xf32> -> vector<8x64xf32>
    %47 = vector.extract_strided_slice %46 {offsets = [0, 0], sizes = [8, 32], strides = [1, 1]} : vector<8x64xf32> to vector<8x32xf32>
    %cst_38 = arith.constant 0.000000e+00 : f32
    %48 = vector.broadcast %cst_38 : f32 to vector<1x32xf32>
    %49 = vector.extract_strided_slice %46 {offsets = [0, 32], sizes = [7, 32], strides = [1, 1]} : vector<8x64xf32> to vector<7x32xf32>
    %50 = tpu.concatenate %48, %49 in 0 : vector<1x32xf32>, vector<7x32xf32> -> vector<8x32xf32>
    %51 = arith.addf %47, %50 : vector<8x32xf32>
    %c0_39 = arith.constant 0 : index
    %c0_40 = arith.constant 0 : index
    %c0_41 = arith.constant 0 : index
    %52 = vector.load %arg14[%c0_39, %c0_40, %c0_41] : memref<1x8x32xf32, #tpu.memory_space<vmem>>, vector<1x8x32xf32>
    %53 = vector.shape_cast %52 : vector<1x8x32xf32> to vector<8x32xf32>
    %54 = vector.shape_cast %51 : vector<8x32xf32> to vector<1x8x32xf32>
    tpu.vector_store %arg14[%c0_39, %c0_40, %c0_41], %54 {strides = array<i32>} : memref<1x8x32xf32, #tpu.memory_space<vmem>>, vector<1x8x32xf32>,
    return
  }
  func.func @transform_0(%arg0: i32) -> (i32, i32, i32) {
    %c0_i32 = arith.constant 0 : i32
    %c0_i32_0 = arith.constant 0 : i32
    %c0_i32_1 = arith.constant 0 : i32
    return %arg0, %c0_i32, %c0_i32_0 : i32, i32, i32
  }
  func.func @transform_1(%arg0: i32) -> (i32, i32, i32) {
    %c0_i32 = arith.constant 0 : i32
    %c0_i32_0 = arith.constant 0 : i32
    %c0_i32_1 = arith.constant 0 : i32
    return %arg0, %c0_i32, %c0_i32_0 : i32, i32, i32
  }
  func.func @transform_2(%arg0: i32) -> (i32, i32) {
    %c0_i32 = arith.constant 0 : i32
    %c0_i32_0 = arith.constant 0 : i32
    %c0_i32_1 = arith.constant 0 : i32
    return %c0_i32, %c0_i32_0 : i32, i32
  }
  func.func @transform_3(%arg0: i32) -> (i32, i32) {
    %c0_i32 = arith.constant 0 : i32
    %c0_i32_0 = arith.constant 0 : i32
    %c0_i32_1 = arith.constant 0 : i32
    return %c0_i32, %c0_i32_0 : i32, i32
  }
  func.func @transform_4(%arg0: i32) -> (i32, i32) {
    %c0_i32 = arith.constant 0 : i32
    %c0_i32_0 = arith.constant 0 : i32
    %c0_i32_1 = arith.constant 0 : i32
    return %c0_i32, %c0_i32_0 : i32, i32
  }
  func.func @transform_5(%arg0: i32) -> (i32, i32) {
    %c0_i32 = arith.constant 0 : i32
    %c0_i32_0 = arith.constant 0 : i32
    %c0_i32_1 = arith.constant 0 : i32
    return %c0_i32, %c0_i32_0 : i32, i32
  }
  func.func @transform_6(%arg0: i32) -> (i32, i32) {
    %c0_i32 = arith.constant 0 : i32
    %c0_i32_0 = arith.constant 0 : i32
    %c0_i32_1 = arith.constant 0 : i32
    return %c0_i32, %c0_i32_0 : i32, i32
  }
  func.func @transform_7(%arg0: i32) -> (i32, i32) {
    %c0_i32 = arith.constant 0 : i32
    %c0_i32_0 = arith.constant 0 : i32
    %c0_i32_1 = arith.constant 0 : i32
    return %c0_i32, %c0_i32_0 : i32, i32
  }
  func.func @transform_8(%arg0: i32) -> (i32, i32) {
    %c0_i32 = arith.constant 0 : i32
    %c0_i32_0 = arith.constant 0 : i32
    %c0_i32_1 = arith.constant 0 : i32
    return %c0_i32, %c0_i32_0 : i32, i32
  }
  func.func @transform_9(%arg0: i32) -> (i32, i32) {
    %c0_i32 = arith.constant 0 : i32
    %c0_i32_0 = arith.constant 0 : i32
    %c0_i32_1 = arith.constant 0 : i32
    return %c0_i32, %c0_i32_0 : i32, i32
  }
  func.func @transform_10(%arg0: i32) -> (i32, i32) {
    %c0_i32 = arith.constant 0 : i32
    %c0_i32_0 = arith.constant 0 : i32
    %c0_i32_1 = arith.constant 0 : i32
    return %c0_i32, %c0_i32_0 : i32, i32
  }
  func.func @transform_11(%arg0: i32) -> (i32, i32) {
    %c0_i32 = arith.constant 0 : i32
    %c0_i32_0 = arith.constant 0 : i32
    %c0_i32_1 = arith.constant 0 : i32
    return %c0_i32, %c0_i32_0 : i32, i32
  }
  func.func @transform_12(%arg0: i32) -> (i32, i32, i32) {
    %c0_i32 = arith.constant 0 : i32
    %c0_i32_0 = arith.constant 0 : i32
    %c0_i32_1 = arith.constant 0 : i32
    return %arg0, %c0_i32, %c0_i32_0 : i32, i32, i32
  }
  func.func @transform_13(%arg0: i32) -> (i32, i32, i32) {
    %c0_i32 = arith.constant 0 : i32
    %c0_i32_0 = arith.constant 0 : i32
    %c0_i32_1 = arith.constant 0 : i32
    return %arg0, %c0_i32, %c0_i32_0 : i32, i32, i32
  }
}

</mosaic_0001>

<bundles_post_ra>
// kernel: ddsp_forward.1
= control target key start
LH: loop header
LB: loop body
LE: loop exit
PB: predicated region body
PF: predicated region fallthrough
CT: control target
= control target key end

     0   :  { %s4227_s25 = smov 0   ;;  %s6838_s0 = inlined_call_operand.vmem [shape: bf16[2,64,256], index: 0, kind: input, shape index: {}]   ;;  %s6839_s1 = inlined_call_operand.vmem [shape: f32[2,8,64], index: 1, kind: input, shape index: {}]   ;;  %s6840_s2 = inlined_call_operand.vmem [shape: bf16[161,64], index: 2, kind: input, shape index: {}]   ;;  %s6841_s3 = inlined_call_operand.vmem [shape: f32[161,1], index: 3, kind: input, shape index: {}]   ;;  %s6842_s4 = inlined_call_operand.vmem [shape: f32[64,1], index: 4, kind: input, shape index: {}]   ;;  %s6843_s5 = inlined_call_operand.vmem [shape: f32[64,256], index: 5, kind: input, shape index: {}]   ;;  %s6844_s6 = inlined_call_operand.vmem [shape: bf16[256,256], index: 6, kind: input, shape index: {}]   ;;  %s6845_s7 = inlined_call_operand.vmem [shape: f32[256,256], index: 7, kind: input, shape index: {}]   ;;  %s6846_s8 = inlined_call_operand.vmem [shape: f32[8,256], index: 8, kind: input, shape index: {}]   ;;  %s6847_s9 = inlined_call_operand.vmem [shape: f32[64,33], index: 9, kind: input, shape index: {}]   ;;  %s6848_s10 = inlined_call_operand.vmem [shape: f32[64,33], index: 10, kind: input, shape index: {}]   ;;  %s6849_s11 = inlined_call_operand.vmem [shape: f32[66,64], index: 11, kind: input, shape index: {}]   ;;  %s6850_s12 = inlined_call_operand.vmem [shape: f32[2,1,256], index: 12, kind: output, shape index: {0}]   ;;  %s6851_s13 = inlined_call_operand.vmem [shape: f32[2,8,32], index: 13, kind: output, shape index: {1}]  }
   0x1 LB: > { %s3686_s26 = sadd.s32 4294967295, %s4143_s25   ;;  %p3690_p0 = scmp.ge.s32.totalorder %s4143_s25, 1  ;;  %s4143_s25 = sphi %s4227_s25, %s24_s25  }
   0x2   : > { %p399_p1 = scmp.lt.s32.totalorder %s4143_s25, 3 }
   0x4   : > { %p400_p2 = pnand %p3690_p0, %p399_p1 }
   0x6   : > { %403 = sbr.rel (%p400_p2) target bundleno = 1226 (0x4ca), region = 68 }
   0xb   : > { %p450_p3 = scmp.lt.s32.totalorder %s3686_s26, 1  ;;  %v4145_v0 = vmov 0   ;;  %v497_v8 = vld [vmem:[%s6841_s3] sm:$0xff]  ;;  %v498_v9 = vld [vmem:[%s6841_s3 + $0x8] sm:$0xff]  ;;  %v499_v10 = vld [vmem:[%s6841_s3 + $0x10] sm:$0xff]  ;;  %vm716_vm0 = vcmask 523264  }
   0xc   : > { %782 = vmatprep.mubr.bf16.mxu0 %v4145_v0  ;;  %4000 = vset.pattern.permute.xlu0 %v4145_v0  ;;  %v500_v12 = vld [vmem:[%s6841_s3 + $0x18] sm:$0xff]  ;;  %v4014_v13 = vld [vmem:[%s6840_s2] sm:$0xff]   ;;  %v502_v16 = vld [vmem:[%s6841_s3 + $0x28] sm:$0xff]  ;;  %vm4147_vm1 = vmmov 0   ;;  %s4154_s17 = smov 33   ;;  %s4156_s28 = smov 96  }
   0xd   : > { %s7008_s26 = smov (!%p450_p3, %s3686_s26), 1  ;;  %4001 = vset.pattern.permute.xlu1 %v4145_v0  ;;  %520 = vperm.xlu0 %4000, %v497_v8   ;;  %v517_v14 = vld [vmem:[%s6841_s3 + $0xa0] sm:$0x1]  ;;  %v516_v17 = vld [vmem:[%s6841_s3 + $0x98] sm:$0xff]  ;;  %v4015_v18 = vld [vmem:[%s6840_s2 + $0x8] sm:$0xff]  }
   0xe   : > { %s3828_s27 = sshll.u32 %s7008_s26, 6  ;;  %530 = vperm.xlu1 %4001, %v499_v10   ;;  %v501_v15 = vld [vmem:[%s6841_s3 + $0x20] sm:$0xff]  ;;  %v4025_v19 = vld [vmem:[%s6844_s6 + $0x74] ss:$8 sps:$4 sm:$0xff]   ;;  %v4027_v20 = vld [vmem:[%s6844_s6 + $0x70] ss:$8 sps:$4 sm:$0xff]  }
   0xf   : > { %s454_s30 = scalar_lea.vmem %s6838_s0, %s3828_s27  ;;  %v515_v21 = vld [vmem:[%s6841_s3 + $0x90] sm:$0xff]  ;;  %1175 = vmatprep.subr.bf16.mxu1 %v4025_v19  ;;  %v4028_v22 = vld [vmem:[%s6844_s6 + $0x64] ss:$8 sps:$4 sm:$0xff]   ;;  %v4030_v24 = vld [vmem:[%s6844_s6 + $0x60] ss:$8 sps:$4 sm:$0xff]   ;;  %s3693_s15 = sshll.u32 %s7008_s26, 3 }
  0x10   : > { %v4002_v1 = vld [vmem:[%s454_s30 + $0x34] ss:$8 sps:$4 sm:$0xff]   ;;  %v4004_v2 = vld [vmem:[%s454_s30 + $0x30] ss:$8 sps:$4 sm:$0xff]   ;;  %v4005_v3 = vld [vmem:[%s454_s30 + $0x24] ss:$8 sps:$4 sm:$0xff]   ;;  %1176 = vmatpush1.bf16.msra.mxu1 %v4027_v20  ;;  %s458_s22 = scalar_lea.vmem %s6839_s1, %s3693_s15  ;;  %s466_s14 = scalar_lea.vmem %s6851_s13, %s3693_s15 }
  0x11   : > { %758 = vmatprep.subr.bf16.mxu0 %v4002_v1  ;;  %v4007_v4 = vld [vmem:[%s454_s30 + $0x20] ss:$8 sps:$4 sm:$0xff]   ;;  %v4008_v5 = vld [vmem:[%s454_s30 + $0x14] ss:$8 sps:$4 sm:$0xff]   ;;  %v4010_v6 = vld [vmem:[%s454_s30 + $0x10] ss:$8 sps:$4 sm:$0xff]   ;;  %525 = vperm.xlu0 %4000, %v498_v9  }
  0x12   : > { %759 = vmatpush1.bf16.msra.mxu0 %v4004_v2  ;;  %v4011_v7 = vld [vmem:[%s454_s30 + $0x4] ss:$8 sps:$4 sm:$0xff]   ;;  %v4013_v11 = vld [vmem:[%s454_s30] ss:$8 sps:$4 sm:$0xff]   ;;  %535 = vperm.xlu1 %4001, %v500_v12   ;;  %v503_v23 = vld [vmem:[%s6841_s3 + $0x30] sm:$0xff] }
  0x13   : > { %760 = vmatprep.subr.bf16.mxu0 %v4005_v3  ;;  %1177 = vmatprep.subr.bf16.mxu1 %v4028_v22  ;;  %v4031_v25 = vld [vmem:[%s6844_s6 + $0x54] ss:$8 sps:$4 sm:$0xff]   ;;  %v514_v27 = vld [vmem:[%s6841_s3 + $0x88] sm:$0xff]  ;;  %v4033_v28 = vld [vmem:[%s6844_s6 + $0x50] ss:$8 sps:$4 sm:$0xff]  }
  0x14   : > { %v504_v26 = vld [vmem:[%s6841_s3 + $0x38] sm:$0xff]  ;;  %1178 = vmatpush1.bf16.msra.mxu1 %v4030_v24  ;;  %v4034_v29 = vld [vmem:[%s6844_s6 + $0x44] ss:$8 sps:$4 sm:$0xff]   ;;  %v4016_v30 = vld [vmem:[%s6840_s2 + $0x10] sm:$0xff]  }
  0x15   : > { %620 = vperm.xlu0 %4000, %v517_v14   ;;  %1179 = vmatprep.subr.bf16.mxu1 %v4031_v25  ;;  %v513_v31 = vld [vmem:[%s6841_s3 + $0x80] sm:$0xff]  ;;  %v1359_v32 = vld [vmem:[%s6845_s7 + $0xf8] sm:$0xff]  ;;  %v1358_v34 = vld [vmem:[%s6845_s7 + $0xf0] sm:$0xff] }
  0x16   : > { %761 = vmatpush1.bf16.msra.mxu0 %v4007_v4  ;;  %540 = vperm.xlu1 %4001, %v501_v15   ;;  %v505_v33 = vld [vmem:[%s6841_s3 + $0x40] sm:$0xff]  ;;  %v1357_v35 = vld [vmem:[%s6845_s7 + $0xe8] sm:$0xff]  ;;  %v4037_v37 = vld [vmem:[%s6844_s6 + $0x34] ss:$8 sps:$4 sm:$0xff]  }
  0x17   : > { %762 = vmatprep.subr.bf16.mxu0 %v4008_v5  ;;  %v4036_v36 = vld [vmem:[%s6844_s6 + $0x40] ss:$8 sps:$4 sm:$0xff]   ;;  %v1355_v41 = vld [vmem:[%s6845_s7 + $0xd8] sm:$0xff]  ;;  %v4040_v43 = vld [vmem:[%s6844_s6 + $0x24] ss:$8 sps:$4 sm:$0xff]  }
  0x18   : > { %1180 = vmatpush1.bf16.msra.mxu1 %v4033_v28  ;;  %v1356_v38 = vld [vmem:[%s6845_s7 + $0xe0] sm:$0xff]  ;;  %v506_v39 = vld [vmem:[%s6841_s3 + $0x48] sm:$0xff]  ;;  %v4039_v42 = vld [vmem:[%s6844_s6 + $0x30] ss:$8 sps:$4 sm:$0xff]  }
  0x19   : > { %545 = vperm.xlu0 %4000, %v502_v16   ;;  %1181 = vmatprep.subr.bf16.mxu1 %v4034_v29  ;;  %v1248_v40 = vld [vmem:[%s6842_s4] sm:$0xff]  ;;  %v1354_v44 = vld [vmem:[%s6845_s7 + $0xd0] sm:$0xff]  ;;  %v1353_v45 = vld [vmem:[%s6845_s7 + $0xc8] sm:$0xff] }
  0x1a   : > { %763 = vmatpush1.bf16.msra.mxu0 %v4010_v6  ;;  %615 = vperm.xlu1 %4001, %v516_v17   ;;  %v4017_v46 = vld [vmem:[%s6840_s2 + $0x18] sm:$0xff]   ;;  %v507_v47 = vld [vmem:[%s6841_s3 + $0x50] sm:$0xff]  ;;  %v1249_v48 = vld [vmem:[%s6842_s4 + $0x8] sm:$0xff] }
  0x1b   : > { %764 = vmatprep.subr.bf16.mxu0 %v4011_v7  ;;  %v4042_v49 = vld [vmem:[%s6844_s6 + $0x20] ss:$8 sps:$4 sm:$0xff]   ;;  %v508_v50 = vld [vmem:[%s6841_s3 + $0x58] sm:$0xff]  ;;  %v1250_v53 = vld [vmem:[%s6842_s4 + $0x10] sm:$0xff] }
  0x1c   : > { %1182 = vmatpush1.bf16.msra.mxu1 %v4036_v36  ;;  %v4043_v51 = vld [vmem:[%s6844_s6 + $0x14] ss:$8 sps:$4 sm:$0xff]   ;;  %v1352_v52 = vld [vmem:[%s6845_s7 + $0xc0] sm:$0xff]  ;;  %v4045_v54 = vld [vmem:[%s6844_s6 + $0x10] ss:$8 sps:$4 sm:$0xff]  }
  0x1d   : > { %610 = vperm.xlu0 %4000, %v515_v21   ;;  %1183 = vmatprep.subr.bf16.mxu1 %v4037_v37  ;;  %v1351_v55 = vld [vmem:[%s6845_s7 + $0xb8] sm:$0xff]  ;;  %v4046_v56 = vld [vmem:[%s6844_s6 + $0x4] ss:$8 sps:$4 sm:$0xff]   ;;  %v1350_v57 = vld [vmem:[%s6845_s7 + $0xb0] sm:$0xff] }
  0x1e   : > { %765 = vmatpush1.bf16.msra.mxu0 %v4013_v11  ;;  %550 = vperm.xlu1 %4001, %v503_v23   ;;  %v1349_v58 = vld [vmem:[%s6845_s7 + $0xa8] sm:$0xff]  ;;  %v4018_v59 = vld [vmem:[%s6840_s2 + $0x20] sm:$0xff]   ;;  %v1251_v61 = vld [vmem:[%s6842_s4 + $0x18] sm:$0xff] }
  0x1f   : > { %1392 = vmatprep.subr.mxu0 %v1359_v32  ;;  %v509_v60 = vld [vmem:[%s6841_s3 + $0x60] sm:$0xff]  ;;  %v4049_v63 = vld [vmem:[%s6844_s6 + $0xf4] ss:$8 sps:$4 sm:$0xff]   ;;  %v510_v2 = vld [vmem:[%s6841_s3 + $0x68] sm:$0xff] }
  0x20   : > { %1184 = vmatpush1.bf16.msra.mxu1 %v4039_v42  ;;  %v4048_v62 = vld [vmem:[%s6844_s6] ss:$8 sps:$4 sm:$0xff]   ;;  %v1347_v3 = vld [vmem:[%s6845_s7 + $0x98] sm:$0xff]  ;;  %v1346_v6 = vld [vmem:[%s6845_s7 + $0x90] sm:$0xff] }
  0x21   : > { %3715 = vmatmul.mubr.msk.bf16.vlgmr.msra.gmra.mxu0 %vm716_vm0, %v4014_v13  ;;  %555 = vperm.xlu0 %4000, %v504_v26   ;;  %v1348_v1 = vld [vmem:[%s6845_s7 + $0xa0] sm:$0xff]  ;;  %v4051_v5 = vld [vmem:[%s6844_s6 + $0xf0] ss:$8 sps:$4 sm:$0xff]   ;;  %v1345_v8 = vld [vmem:[%s6845_s7 + $0x88] sm:$0xff] }
  0x22   : > { %792 = vmatprep.mubr.bf16.mxu0 %v4145_v0  ;;  %605 = vperm.xlu1 %4001, %v514_v27   ;;  %v1252_v4 = vld [vmem:[%s6842_s4 + $0x20] sm:$0xff]  ;;  %v4019_v9 = vld [vmem:[%s6840_s2 + $0x28] sm:$0xff]   ;;  %v511_v10 = vld [vmem:[%s6841_s3 + $0x70] sm:$0xff] }
  0x23   : > { %1393 = vmatpush1.msra.mxu0 %v1358_v34  ;;  %1185 = vmatprep.subr.bf16.mxu1 %v4040_v43  ;;  %v4052_v7 = vld [vmem:[%s6844_s6 + $0xe4] ss:$8 sps:$4 sm:$0xff]   ;;  %v4054_v12 = vld [vmem:[%s6844_s6 + $0xe0] ss:$8 sps:$4 sm:$0xff]   ;;  %v4055_v13 = vld [vmem:[%s6844_s6 + $0xd4] ss:$8 sps:$4 sm:$0xff]  }
  0x24   : > { %1394 = vmatprep.subr.mxu0 %v1357_v35  ;;  %1186 = vmatpush1.bf16.msra.mxu1 %v4042_v49  ;;  %v1253_v11 = vld [vmem:[%s6842_s4 + $0x28] sm:$0xff]  ;;  %v1344_v14 = vld [vmem:[%s6845_s7 + $0x80] sm:$0xff]  ;;  %v512_v15 = vld [vmem:[%s6841_s3 + $0x78] sm:$0xff] }
  0x25   : > { %600 = vperm.xlu0 %4000, %v513_v31   ;;  %1395 = vmatpush1.msra.mxu0 %v1356_v38  ;;  %v1343_v16 = vld [vmem:[%s6845_s7 + $0x78] sm:$0xff]  ;;  %v1254_v17 = vld [vmem:[%s6842_s4 + $0x30] sm:$0xff]  ;;  %v4058_v20 = vld [vmem:[%s6844_s6 + $0xc4] ss:$8 sps:$4 sm:$0xff]  }
  0x26   : > { %560 = vperm.xlu1 %4001, %v505_v33   ;;  %1396 = vmatprep.subr.mxu0 %v1355_v41  ;;  %v1342_v19 = vld [vmem:[%s6845_s7 + $0x70] sm:$0xff]  ;;  %v1341_v21 = vld [vmem:[%s6845_s7 + $0x68] sm:$0xff]  ;;  %v1255_v23 = vld [vmem:[%s6842_s4 + $0x38] sm:$0xff] }
  0x27   : > { %1397 = vmatpush1.msra.mxu0 %v1354_v44  ;;  %1187 = vmatprep.subr.bf16.mxu1 %v4043_v51  ;;  %v4020_v22 = vld [vmem:[%s6840_s2 + $0x30] sm:$0xff]   ;;  %v4060_v24 = vld [vmem:[%s6844_s6 + $0xc0] ss:$8 sps:$4 sm:$0xff]   ;;  %v4021_v27 = vld [vmem:[%s6840_s2 + $0x38] sm:$0xff]  }
  0x28   : > { %1398 = vmatprep.subr.mxu0 %v1353_v45  ;;  %1188 = vmatpush1.bf16.msra.mxu1 %v4045_v54  ;;  %v1340_v25 = vld [vmem:[%s6845_s7 + $0x60] sm:$0xff]  ;;  %v4061_v26 = vld [vmem:[%s6844_s6 + $0xb4] ss:$8 sps:$4 sm:$0xff]   ;;  %v1337_v32 = vld [vmem:[%s6845_s7 + $0x48] sm:$0xff] }
  0x29   : > { %3716 = vmatmul.mubr.msk.bf16.gmra.mxu0 %vm716_vm0, %v4015_v18  ;;  %565 = vperm.xlu0 %4000, %v506_v39   ;;  %v4057_v18 = vld [vmem:[%s6844_s6 + $0xd0] ss:$8 sps:$4 sm:$0xff]   ;;  %v4022_v28 = vld [vmem:[%s6840_s2 + $0x40] sm:$0xff]   ;;  %v4023_v37 = vld [vmem:[%s6840_s2 + $0x48] sm:$0xff]  }
  0x2a   : > { %802 = vmatprep.mubr.bf16.mxu0 %v4145_v0  ;;  %1258 = vperm.xlu1 %4001, %v1248_v40   ;;  %v1339_v29 = vld [vmem:[%s6845_s7 + $0x58] sm:$0xff]  ;;  %v1338_v31 = vld [vmem:[%s6845_s7 + $0x50] sm:$0xff]  ;;  %v1336_v33 = vld [vmem:[%s6845_s7 + $0x40] sm:$0xff] }
  0x2b   : > { %1399 = vmatpush1.msra.mxu0 %v1352_v52  ;;  %1189 = vmatprep.subr.bf16.mxu1 %v4046_v56  ;;  %v4064_v34 = vld [vmem:[%s6844_s6 + $0xa4] ss:$8 sps:$4 sm:$0xff]   ;;  %v1335_v35 = vld [vmem:[%s6845_s7 + $0x38] sm:$0xff]  ;;  %v4066_v36 = vld [vmem:[%s6844_s6 + $0xa0] ss:$8 sps:$4 sm:$0xff]  }
  0x2c   : > { %1400 = vmatprep.subr.mxu0 %v1351_v55  ;;  %1190 = vmatpush1.bf16.msra.mxu1 %v4048_v62  ;;  %v1334_v38 = vld [vmem:[%s6845_s7 + $0x30] sm:$0xff]  ;;  %v1333_v39 = vld [vmem:[%s6845_s7 + $0x28] sm:$0xff]  ;;  %v1332_v40 = vld [vmem:[%s6845_s7 + $0x20] sm:$0xff] }
  0x2d   : > { %570 = vperm.xlu0 %4000, %v507_v47   ;;  %1401 = vmatpush1.msra.mxu0 %v1350_v57  ;;  %v4067_v41 = vld [vmem:[%s6844_s6 + $0x94] ss:$8 sps:$4 sm:$0xff]   ;;  %v4069_v43 = vld [vmem:[%s6844_s6 + $0x90] ss:$8 sps:$4 sm:$0xff]   ;;  %v1329_v45 = vld [vmem:[%s6845_s7 + $0x8] sm:$0xff] }
  0x2e   : > { %1263 = vperm.xlu1 %4001, %v1249_v48   ;;  %1402 = vmatprep.subr.mxu0 %v1349_v58  ;;  %v1331_v42 = vld [vmem:[%s6845_s7 + $0x18] sm:$0xff]  ;;  %v1330_v44 = vld [vmem:[%s6845_s7 + $0x10] sm:$0xff]  ;;  %v4070_v47 = vld [vmem:[%s6844_s6 + $0x84] ss:$8 sps:$4 sm:$0xff]  }
  0x2f   : > { %1403 = vmatpush1.msra.mxu0 %v1348_v1  ;;  %1191 = vmatprep.subr.bf16.mxu1 %v4049_v63  ;;  %v4072_v48 = vld [vmem:[%s6844_s6 + $0x80] ss:$8 sps:$4 sm:$0xff]   ;;  %v4024_v49 = vld [vmem:[%s6840_s2 + $0x50] ss:$0 sps:$4 sm:$0x11]   ;;  %v1383_v57 = vld [vmem:[%s6845_s7 + $0x1b8] sm:$0xff] }
  0x30   : > { %1404 = vmatprep.subr.mxu0 %v1347_v3  ;;  %1192 = vmatpush2.bf16.msra.mxu1 %v4051_v5  ;;  %v1389_v51 = vld [vmem:[%s6845_s7 + $0x1e8] sm:$0xff]  ;;  %v1388_v52 = vld [vmem:[%s6845_s7 + $0x1e0] sm:$0xff]  ;;  %v1386_v54 = vld [vmem:[%s6845_s7 + $0x1d0] sm:$0xff] }
  0x31   : > { %3717 = vmatmul.mubr.msk.bf16.gmra.mxu0 %vm716_vm0, %v4016_v30  ;;  %575 = vperm.xlu0 %4000, %v508_v50   ;;  %v4063_v30 = vld [vmem:[%s6844_s6 + $0xb0] ss:$8 sps:$4 sm:$0xff]   ;;  %v1385_v55 = vld [vmem:[%s6845_s7 + $0x1c8] sm:$0xff]  ;;  %v1384_v56 = vld [vmem:[%s6845_s7 + $0x1c0] sm:$0xff] }
  0x32   : > { %812 = vmatprep.mubr.bf16.mxu0 %v4145_v0  ;;  %1268 = vperm.xlu1 %4001, %v1250_v53   ;;  %v1390_v50 = vld [vmem:[%s6845_s7 + $0x1f0] sm:$0xff]  ;;  %v1387_v53 = vld [vmem:[%s6845_s7 + $0x1d8] sm:$0xff]  ;;  %v1377_v63 = vld [vmem:[%s6845_s7 + $0x188] sm:$0xff] }
  0x33   : > { %1405 = vmatpush1.msra.mxu0 %v1346_v6  ;;  %1193 = vmatprep.subr.bf16.mxu1 %v4052_v7  ;;  %v1382_v58 = vld [vmem:[%s6845_s7 + $0x1b0] sm:$0xff]  ;;  %v1376_v1 = vld [vmem:[%s6845_s7 + $0x180] sm:$0xff]  ;;  %v1371_v6 = vld [vmem:[%s6845_s7 + $0x158] sm:$0xff] }
  0x34   : > { %1406 = vmatprep.subr.mxu0 %v1345_v8  ;;  %1194 = vmatpush2.bf16.msra.mxu1 %v4054_v12  ;;  %v1378_v62 = vld [vmem:[%s6845_s7 + $0x190] sm:$0xff]  ;;  %v1372_v5 = vld [vmem:[%s6845_s7 + $0x160] sm:$0xff]  ;;  %v1369_v8 = vld [vmem:[%s6845_s7 + $0x148] sm:$0xff] }
  0x35   : > { %580 = vperm.xlu0 %4000, %v509_v60   ;;  %1407 = vmatpush1.msra.mxu0 %v1344_v14  ;;  %v1380_v60 = vld [vmem:[%s6845_s7 + $0x1a0] sm:$0xff]  ;;  %v1374_v3 = vld [vmem:[%s6845_s7 + $0x170] sm:$0xff]  ;;  %v1365_v12 = vld [vmem:[%s6845_s7 + $0x128] sm:$0xff] }
  0x36   : > { %1273 = vperm.xlu1 %4001, %v1251_v61   ;;  %1195 = vmatprep.subr.bf16.mxu1 %v4055_v13  ;;  %v1379_v61 = vld [vmem:[%s6845_s7 + $0x198] sm:$0xff]  ;;  %v1370_v7 = vld [vmem:[%s6845_s7 + $0x150] sm:$0xff]  ;;  %v1364_v13 = vld [vmem:[%s6845_s7 + $0x120] sm:$0xff] }
  0x37   : > { %1408 = vmatprep.subr.mxu0 %v1343_v16  ;;  %v1363_v14 = vld [vmem:[%s6845_s7 + $0x118] sm:$0xff]  ;;  %v1361_v16 = vld [vmem:[%s6845_s7 + $0x108] sm:$0xff] }
  0x38   : > { %1409 = vmatpush1.msra.mxu0 %v1342_v19  ;;  %1196 = vmatpush2.bf16.msra.mxu1 %v4057_v18  ;;  %v6852_v18 = vmov 0.0  }
  0x39   : > { %3718 = vmatmul.mubr.msk.bf16.gmra.mxu0 %vm716_vm0, %v4017_v46  ;;  %585 = vperm.xlu0 %4000, %v510_v2   ;;  %v1328_v46 = vld [vmem:[%s6845_s7] sm:$0xff]  ;;  %v1375_v2 = vld [vmem:[%s6845_s7 + $0x178] sm:$0xff] }
  0x3a   : > { %822 = vmatprep.mubr.bf16.mxu0 %v4145_v0  ;;  %1278 = vperm.xlu1 %4001, %v1252_v4   ;;  %v1373_v4 = vld [vmem:[%s6845_s7 + $0x168] sm:$0xff] }
  0x3b   : > { %1410 = vmatprep.subr.mxu0 %v1341_v21  ;;  %1197 = vmatprep.subr.bf16.mxu1 %v4058_v20 }
  0x3c   : > { %1411 = vmatpush1.msra.mxu0 %v1340_v25  ;;  %1198 = vmatpush2.bf16.msra.mxu1 %v4060_v24 }
  0x3d   : > { %590 = vperm.xlu0 %4000, %v511_v10   ;;  %1199 = vmatprep.subr.bf16.mxu1 %v4061_v26  ;;  %v1367_v10 = vld [vmem:[%s6845_s7 + $0x138] sm:$0xff] }
  0x3e   : > { %1283 = vperm.xlu1 %4001, %v1253_v11   ;;  %1412 = vmatprep.subr.mxu0 %v1339_v29  ;;  %v1366_v11 = vld [vmem:[%s6845_s7 + $0x130] sm:$0xff] }
  0x3f   : > { %1413 = vmatpush1.msra.mxu0 %v1338_v31 }
  0x40   : > { %1200 = vmatpush2.bf16.msra.mxu1 %v4063_v30  ;;  %1414 = vmatprep.subr.mxu0 %v1337_v32 }
  0x41   : > { %3719 = vmatmul.mubr.msk.bf16.gmra.mxu0 %vm716_vm0, %v4018_v59  ;;  %595 = vperm.xlu0 %4000, %v512_v15   ;;  %v1381_v59 = vld [vmem:[%s6845_s7 + $0x1a8] sm:$0xff]  ;;  %v1362_v15 = vld [vmem:[%s6845_s7 + $0x110] sm:$0xff] }
  0x42   : > { %832 = vmatprep.mubr.bf16.mxu0 %v4145_v0  ;;  %1288 = vperm.xlu1 %4001, %v1254_v17   ;;  %v1360_v17 = vld [vmem:[%s6845_s7 + $0x100] sm:$0xff] }
  0x43   : > { %1415 = vmatpush1.msra.mxu0 %v1336_v33  ;;  %1201 = vmatprep.subr.bf16.mxu1 %v4064_v34 }
  0x44   : > { %1416 = vmatprep.subr.mxu0 %v1335_v35  ;;  %1202 = vmatpush2.bf16.msra.mxu1 %v4066_v36 }
  0x45   : > { %1293 = vperm.xlu0 %4000, %v1255_v23   ;;  %1417 = vmatpush1.msra.mxu0 %v1334_v38 }
  0x46   : > { %1418 = vmatprep.subr.mxu0 %v1333_v39  ;;  %1203 = vmatprep.subr.bf16.mxu1 %v4067_v41 }
  0x47   : > { %1419 = vmatpush1.msra.mxu0 %v1332_v40 }
  0x48   : > { %1420 = vmatprep.subr.mxu0 %v1331_v42  ;;  %1204 = vmatpush2.bf16.msra.mxu1 %v4069_v43 }
  0x49   : > { %3720 = vmatmul.mubr.msk.bf16.gmra.mxu0 %vm716_vm0, %v4019_v9  ;;  %1205 = vmatprep.subr.bf16.mxu1 %v4070_v47  ;;  %v1368_v9 = vld [vmem:[%s6845_s7 + $0x140] sm:$0xff] }
  0x4a   : > { %842 = vmatprep.mubr.bf16.mxu0 %v4145_v0  ;;  %1421 = vmatpush1.msra.mxu0 %v1330_v44 }
  0x4b   : > { %1422 = vmatprep.subr.mxu0 %v1329_v45 }
  0x4c   : > { %1423 = vmatpush1.msra.mxu0 %v1328_v46  ;;  %1206 = vmatpush2.bf16.msra.mxu1 %v4072_v48 }
  0x51   : > { %3721 = vmatmul.mubr.msk.bf16.gmra.mxu0 %vm716_vm0, %v4020_v22 }
  0x52   : > { %852 = vmatprep.mubr.bf16.mxu0 %v4145_v0 }
  0x59   : > { %3722 = vmatmul.mubr.msk.bf16.gmra.mxu0 %vm716_vm0, %v4021_v27 }
  0x5a   : > { %862 = vmatprep.mubr.bf16.mxu0 %v4145_v0 }
  0x61   : > { %3723 = vmatmul.mubr.msk.bf16.gmra.mxu0 %vm716_vm0, %v4022_v28 }
  0x62   : > { %872 = vmatprep.mubr.bf16.mxu0 %v4145_v0 }
  0x69   : > { %3724 = vmatmul.mubr.msk.bf16.gmra.mxu0 %vm716_vm0, %v4023_v37 }
  0x6a   : > { %882 = vmatprep.mubr.bf16.mxu0 %v4145_v0  ;;  %v1391_v0 = vld [vmem:[%s6845_s7 + $0x1f8] sm:$0xff] }
  0x6b   : > { %1424 = vmatprep.subr.mxu0 %v1391_v0 }
  0x6c   : > { %1425 = vmatpush2.msra.mxu0 %v1390_v50 }
  0x6d   : > { %1426 = vmatprep.subr.mxu0 %v1389_v51 }
  0x6e   : > { %1427 = vmatpush2.msra.mxu0 %v1388_v52 }
  0x6f   : > { %1428 = vmatprep.subr.mxu0 %v1387_v53 }
  0x70   : > { %1429 = vmatpush2.msra.mxu0 %v1386_v54 }
  0x71   : > { %3725 = vmatmul.mubr.msk.bf16.gmra.mxu0 %vm716_vm0, %v4024_v49  ;;  %1430 = vmatprep.subr.mxu0 %v1385_v55 }
  0x72   : > { %1431 = vmatpush2.msra.mxu0 %v1384_v56 }
  0x73   : > { %1432 = vmatprep.subr.mxu0 %v1383_v57 }
  0x74   : > { %1433 = vmatpush2.msra.mxu0 %v1382_v58 }
  0x75   : > { %1434 = vmatprep.subr.mxu0 %v1381_v59 }
  0x76   : > { %1435 = vmatpush2.msra.mxu0 %v1380_v60 }
  0x77   : > { %1436 = vmatprep.subr.mxu0 %v1379_v61 }
  0x78   : > { %1437 = vmatpush2.msra.mxu0 %v1378_v62 }
  0x79   : > { %1438 = vmatprep.subr.mxu0 %v1377_v63 }
  0x7a   : > { %1439 = vmatpush2.msra.mxu0 %v1376_v1 }
  0x7b   : > { %1440 = vmatprep.subr.mxu0 %v1375_v2 }
  0x7c   : > { %1441 = vmatpush2.msra.mxu0 %v1374_v3 }
  0x7d   : > { %1442 = vmatprep.subr.mxu0 %v1373_v4 }
  0x7e   : > { %1443 = vmatpush2.msra.mxu0 %v1372_v5 }
  0x7f   : > { %1444 = vmatprep.subr.mxu0 %v1371_v6 }
  0x80   : > { %1445 = vmatpush2.msra.mxu0 %v1370_v7 }
  0x81   : > { %1446 = vmatprep.subr.mxu0 %v1369_v8 }
  0x82   : > { %1447 = vmatpush2.msra.mxu0 %v1368_v9 }
  0x83   : > { %1448 = vmatprep.subr.mxu0 %v1367_v10 }
  0x84   : > { %1449 = vmatpush2.msra.mxu0 %v1366_v11 }
  0x85   : > { %1450 = vmatprep.subr.mxu0 %v1365_v12 }
  0x86   : > { %1451 = vmatpush2.msra.mxu0 %v1364_v13 }
  0x87   : > { %1452 = vmatprep.subr.mxu0 %v1363_v14 }
  0x88   : > { %1453 = vmatpush2.msra.mxu0 %v1362_v15  ;;  %v521_v19 = vpop.permute.xlu0 %520 }
  0x89   : > { %1454 = vmatprep.subr.mxu0 %v1361_v16  ;;  %v531_v20 = vpop.permute.xlu1 %530 }
  0x8a   : > { %1455 = vmatpush2.msra.mxu0 %v1360_v17 }
  0x8b   : > { %3895 = vmatprep.subr.mxu0 %v6852_v18 }
  0x8c   : > { %v526_v21 = vpop.permute.xlu0 %525 }
  0x8d   : > { %v536_v23 = vpop.permute.xlu1 %535 }
  0x90   : > { %v4674_v22 = vpop.permute.xlu0 %620 }
  0x91   : > { %v541_v25 = vpop.permute.xlu1 %540 }
  0x94   : > { %v546_v24 = vpop.permute.xlu0 %545 }
  0x95   : > { %v4678_v33 = vpop.permute.xlu1 %615 }
  0x98   : > { %v4676_v31 = vpop.permute.xlu0 %610 }
  0x99   : > { %v551_v47 = vpop.permute.xlu1 %550 }
  0x9c   : > { %v556_v43 = vpop.permute.xlu0 %555 }
  0x9d   : > { %v4682_v61 = vpop.permute.xlu1 %605 }
  0xa0   : > { %v4680_v59 = vpop.permute.xlu0 %600 }
  0xa1   : > { %v561_v15 = vpop.permute.xlu1 %560 }
  0xa4   : > { %v566_v11 = vpop.permute.xlu0 %565 }
  0xe1   : > { %v784_v26 = vpop.f32.mrf.mxu0 }
  0xe2   : > { %v785_v29 = vadd.f32 %v784_v26, %v521_v19 }
  0xe3   : > { %v786_v27 = vpop.f32.mrf.mxu0 }
  0xe4   : > { %v787_v28 = vadd.f32 %v786_v27, %v521_v19  ;;  %v891_v38 = vmax.f32 %v785_v29, 0.0  ;;  %v1259_v27 = vpop.permute.xlu1 %1258 }
  0xe5   : > { %v788_v30 = vpop.f32.mrf.mxu0 }
  0xe6   : > { %v789_v32 = vadd.f32 %v788_v30, %v526_v21  ;;  %v892_v35 = vmax.f32 %v787_v28, 0.0  ;;  %v933_v0 = vmin.f32 %v891_v38, 1.0 }
  0xe7   : > { %v790_v34 = vpop.f32.mrf.mxu0 }
  0xe8   : > { %v893_v36 = vmax.f32 %v789_v32, 0.0  ;;  %v791_v37 = vadd.f32 %v790_v34, %v526_v21  ;;  %v934_v44 = vmin.f32 %v892_v35, 1.0  ;;  %v571_v32 = vpop.permute.xlu0 %570 }
  0xe9   : > { %v794_v39 = vpop.f32.mrf.mxu0 }
  0xea   : > { %v894_v40 = vmax.f32 %v791_v37, 0.0  ;;  %v935_v41 = vmin.f32 %v893_v36, 1.0  ;;  %v795_v48 = vadd.f32 %v794_v39, %v531_v20 }
  0xeb   : > { %v796_v42 = vpop.f32.mrf.mxu0 }
  0xec   : > { %v936_v45 = vmin.f32 %v894_v40, 1.0  ;;  %v797_v46 = vadd.f32 %v796_v42, %v531_v20  ;;  %v975_v52 = vpack.c.bf16 %v935_v41, %v933_v0  ;;  %v895_v57 = vmax.f32 %v795_v48, 0.0  ;;  %v576_v48 = vpop.permute.xlu0 %575 }
  0xed   : > { %v798_v49 = vpop.f32.mrf.mxu0 }
  0xee   : > { %v799_v50 = vadd.f32 %v798_v49, %v536_v23  ;;  %v976_v51 = vpack.c.bf16 %v936_v45, %v934_v44  ;;  %v896_v54 = vmax.f32 %v797_v46, 0.0  ;;  %v937_v4 = vmin.f32 %v895_v57, 1.0  ;;  %v1264_v45 = vpop.permute.xlu1 %1263 }
  0xef   : > { %v800_v53 = vpop.f32.mrf.mxu0 }
  0xf0   : > { %v897_v55 = vmax.f32 %v799_v50, 0.0  ;;  %v801_v56 = vadd.f32 %v800_v53, %v536_v23  ;;  %1207 = vmatprep.mubr.bf16.mxu1 %v976_v51  ;;  %v938_v1 = vmin.f32 %v896_v54, 1.0 }
  0xf1   : > { %v804_v58 = vpop.f32.mrf.mxu0  ;;  %1208 = vmatmul.mubr.bf16.vlgmr.msra.gmra.mxu1 %v975_v52 }
  0xf2   : > { %v898_v60 = vmax.f32 %v801_v56, 0.0  ;;  %v939_v62 = vmin.f32 %v897_v55, 1.0  ;;  %v805_v5 = vadd.f32 %v804_v58, %v541_v25 }
  0xf3   : > { %v806_v63 = vpop.f32.mrf.mxu0 }
  0xf4   : > { %v940_v2 = vmin.f32 %v898_v60, 1.0  ;;  %v807_v3 = vadd.f32 %v806_v63, %v541_v25  ;;  %v977_v9 = vpack.c.bf16 %v939_v62, %v937_v4  ;;  %v899_v16 = vmax.f32 %v805_v5, 0.0  ;;  %v3254_v60 = vld [vmem:[%s6846_s8 + $0x8] sm:$0xff]  ;;  %v581_v4 = vpop.permute.xlu0 %580 }
  0xf5   : > { %v808_v6 = vpop.f32.mrf.mxu0 }
  0xf6   : > { %v978_v7 = vpack.c.bf16 %v940_v2, %v938_v1  ;;  %v809_v8 = vadd.f32 %v808_v6, %v546_v24  ;;  %v900_v12 = vmax.f32 %v807_v3, 0.0  ;;  %v941_v28 = vmin.f32 %v899_v16, 1.0  ;;  %v1269_v2 = vpop.permute.xlu1 %1268 }
  0xf7   : > { %v810_v10 = vpop.f32.mrf.mxu0 }
  0xf8   : > { %v901_v13 = vmax.f32 %v809_v8, 0.0  ;;  %v811_v14 = vadd.f32 %v810_v10, %v546_v24  ;;  %1217 = vmatprep.mubr.bf16.mxu1 %v978_v7  ;;  %v942_v23 = vmin.f32 %v900_v12, 1.0 }
  0xf9   : > { %v814_v17 = vpop.f32.mrf.mxu0  ;;  %1218 = vmatmul.mubr.bf16.gmra.mxu1 %v977_v9 }
  0xfa   : > { %v902_v19 = vmax.f32 %v811_v14, 0.0  ;;  %v943_v20 = vmin.f32 %v901_v13, 1.0  ;;  %v815_v29 = vadd.f32 %v814_v17, %v551_v47 }
  0xfb   : > { %v816_v21 = vpop.f32.mrf.mxu0 }
  0xfc   : > { %v944_v26 = vmin.f32 %v902_v19, 1.0  ;;  %v817_v25 = vadd.f32 %v816_v21, %v551_v47  ;;  %v979_v36 = vpack.c.bf16 %v943_v20, %v941_v28  ;;  %v903_v40 = vmax.f32 %v815_v29, 0.0  ;;  %v1274_v19 = vpop.permute.xlu1 %1273 }
  0xfd   : > { %v818_v30 = vpop.f32.mrf.mxu0 }
  0xfe   : > { %v980_v34 = vpack.c.bf16 %v944_v26, %v942_v23  ;;  %v819_v35 = vadd.f32 %v818_v30, %v556_v43  ;;  %v904_v37 = vmax.f32 %v817_v25, 0.0  ;;  %v945_v52 = vmin.f32 %v903_v40, 1.0  ;;  %v586_v26 = vpop.permute.xlu0 %585 }
  0xff   : > { %v820_v24 = vpop.f32.mrf.mxu0 }
 0x100   : > { %v905_v38 = vmax.f32 %v819_v35, 0.0  ;;  %v821_v39 = vadd.f32 %v820_v24, %v556_v43  ;;  %1227 = vmatprep.mubr.bf16.mxu1 %v980_v34  ;;  %v946_v47 = vmin.f32 %v904_v37, 1.0  ;;  %v1279_v40 = vpop.permute.xlu1 %1278 }
 0x101   : > { %v824_v41 = vpop.f32.mrf.mxu0  ;;  %1228 = vmatmul.mubr.bf16.gmra.mxu1 %v979_v36 }
 0x102   : > { %v906_v42 = vmax.f32 %v821_v39, 0.0  ;;  %v825_v44 = vadd.f32 %v824_v41, %v561_v15  ;;  %v947_v46 = vmin.f32 %v905_v38, 1.0 }
 0x103   : > { %v826_v0 = vpop.f32.mrf.mxu0 }
 0x104   : > { %v948_v49 = vmin.f32 %v906_v42, 1.0  ;;  %v907_v50 = vmax.f32 %v825_v44, 0.0  ;;  %v827_v51 = vadd.f32 %v826_v0, %v561_v15  ;;  %v981_v43 = vpack.c.bf16 %v947_v46, %v945_v52  ;;  %v591_v42 = vpop.permute.xlu0 %590 }
 0x105   : > { %v828_v53 = vpop.f32.mrf.mxu0 }
 0x106   : > { %v982_v54 = vpack.c.bf16 %v948_v49, %v946_v47  ;;  %v908_v55 = vmax.f32 %v827_v51, 0.0  ;;  %v829_v56 = vadd.f32 %v828_v53, %v566_v11  ;;  %v949_v57 = vmin.f32 %v907_v50, 1.0 }
 0x107   : > { %v830_v58 = vpop.f32.mrf.mxu0 }
 0x108   : > { %v950_v62 = vmin.f32 %v908_v55, 1.0  ;;  %v909_v63 = vmax.f32 %v829_v56, 0.0  ;;  %v831_v1 = vadd.f32 %v830_v58, %v566_v11  ;;  %1237 = vmatprep.mubr.bf16.mxu1 %v982_v54  ;;  %v1296_v9 = vmul.f32 %v1259_v27, %v949_v57  ;;  %v1284_v56 = vpop.permute.xlu1 %1283 }
 0x109   : > { %v834_v3 = vpop.f32.mrf.mxu0  ;;  %1238 = vmatmul.mubr.bf16.gmra.mxu1 %v981_v43 }
 0x10a   : > { %v1297_v5 = vmul.f32 %v1259_v27, %v950_v62  ;;  %v910_v6 = vmax.f32 %v831_v1, 0.0  ;;  %v835_v7 = vadd.f32 %v834_v3, %v571_v32  ;;  %3319 = vmatprep.mubr.f32.mxu1 %v3254_v60  ;;  %v951_v8 = vmin.f32 %v909_v63, 1.0  ;;  %v596_v60 = vpop.permute.xlu0 %595 }
 0x10b   : > { %v836_v10 = vpop.f32.mrf.mxu0 }
 0x10c   : > { %v952_v12 = vmin.f32 %v910_v6, 1.0  ;;  %v911_v13 = vmax.f32 %v835_v7, 0.0  ;;  %v837_v14 = vadd.f32 %v836_v10, %v571_v32  ;;  %1456 = vmatprep.mubr.f32.mxu0 %v1297_v5  ;;  %v1298_v21 = vmul.f32 %v1264_v45, %v951_v8 }
 0x10d   : > { %v838_v15 = vpop.f32.mrf.mxu0  ;;  %1457 = vmatmul.mubr.f32.vlgmr.msra.gmra.mxu0 %v1296_v9 }
 0x10e   : > { %v1299_v16 = vmul.f32 %v1264_v45, %v952_v12  ;;  %v912_v11 = vmax.f32 %v837_v14, 0.0  ;;  %v839_v17 = vadd.f32 %v838_v15, %v576_v48  ;;  %v953_v20 = vmin.f32 %v911_v13, 1.0  ;;  %v1289_v12 = vpop.permute.xlu1 %1288 }
 0x10f   : > { %v840_v23 = vpop.f32.mrf.mxu0 }
 0x110   : > { %v954_v25 = vmin.f32 %v912_v11, 1.0  ;;  %v913_v28 = vmax.f32 %v839_v17, 0.0  ;;  %v841_v29 = vadd.f32 %v840_v23, %v576_v48  ;;  %1462 = vmatprep.mubr.f32.mxu0 %v1299_v16  ;;  %v1300_v36 = vmul.f32 %v1269_v2, %v953_v20 }
 0x111   : > { %v844_v27 = vpop.f32.mrf.mxu0  ;;  %1463 = vmatmul.mubr.f32.gmra.mxu0 %v1298_v21  ;;  %v1294_v21 = vpop.permute.xlu0 %1293 }
 0x112   : > { %v1301_v30 = vmul.f32 %v1269_v2, %v954_v25  ;;  %v914_v34 = vmax.f32 %v841_v29, 0.0  ;;  %v845_v32 = vadd.f32 %v844_v27, %v581_v4  ;;  %v955_v35 = vmin.f32 %v913_v28, 1.0 }
 0x113   : > { %v846_v24 = vpop.f32.mrf.mxu0 }
 0x114   : > { %v956_v37 = vmin.f32 %v914_v34, 1.0  ;;  %v915_v38 = vmax.f32 %v845_v32, 0.0  ;;  %v847_v39 = vadd.f32 %v846_v24, %v581_v4  ;;  %1468 = vmatprep.mubr.f32.mxu0 %v1301_v30  ;;  %v1302_v48 = vmul.f32 %v1274_v19, %v955_v35 }
 0x115   : > { %v848_v41 = vpop.f32.mrf.mxu0  ;;  %1469 = vmatmul.mubr.f32.gmra.mxu0 %v1300_v36 }
 0x116   : > { %v1303_v44 = vmul.f32 %v1274_v19, %v956_v37  ;;  %v916_v45 = vmax.f32 %v847_v39, 0.0  ;;  %v849_v46 = vadd.f32 %v848_v41, %v586_v26  ;;  %v957_v0 = vmin.f32 %v915_v38, 1.0 }
 0x117   : > { %v850_v47 = vpop.f32.mrf.mxu0 }
 0x118   : > { %v958_v49 = vmin.f32 %v916_v45, 1.0  ;;  %v917_v50 = vmax.f32 %v849_v46, 0.0  ;;  %v851_v51 = vadd.f32 %v850_v47, %v586_v26  ;;  %1474 = vmatprep.mubr.f32.mxu0 %v1303_v44  ;;  %v1304_v57 = vmul.f32 %v1279_v40, %v957_v0 }
 0x119   : > { %v854_v52 = vpop.f32.mrf.mxu0  ;;  %1475 = vmatmul.mubr.f32.gmra.mxu0 %v1302_v48 }
 0x11a   : > { %v1305_v53 = vmul.f32 %v1279_v40, %v958_v49  ;;  %v918_v54 = vmax.f32 %v851_v51, 0.0  ;;  %v855_v55 = vadd.f32 %v854_v52, %v591_v42  ;;  %v959_v43 = vmin.f32 %v917_v50, 1.0 }
 0x11b   : > { %v856_v58 = vpop.f32.mrf.mxu0 }
 0x11c   : > { %v960_v62 = vmin.f32 %v918_v54, 1.0  ;;  %v919_v63 = vmax.f32 %v855_v55, 0.0  ;;  %v857_v1 = vadd.f32 %v856_v58, %v591_v42  ;;  %1480 = vmatprep.mubr.f32.mxu0 %v1305_v53  ;;  %v1306_v7 = vmul.f32 %v1284_v56, %v959_v43 }
 0x11d   : > { %v858_v2 = vpop.f32.mrf.mxu0  ;;  %1481 = vmatmul.mubr.f32.gmra.mxu0 %v1304_v57 }
 0x11e   : > { %v1307_v3 = vmul.f32 %v1284_v56, %v960_v62  ;;  %v920_v4 = vmax.f32 %v857_v1, 0.0  ;;  %v859_v5 = vadd.f32 %v858_v2, %v596_v60  ;;  %v961_v6 = vmin.f32 %v919_v63, 1.0  ;;  %v3253_v1 = vld [vmem:[%s6846_s8] sm:$0xff]  ;;  %v3332_v2 = vld [vmem:[%s6847_s9 + $0x30] sm:$0xff] }
 0x11f   : > { %v860_v8 = vpop.f32.mrf.mxu0 }
 0x120   : > { %v962_v9 = vmin.f32 %v920_v4, 1.0  ;;  %v921_v10 = vmax.f32 %v859_v5, 0.0  ;;  %v861_v13 = vadd.f32 %v860_v8, %v596_v60  ;;  %1486 = vmatprep.mubr.f32.mxu0 %v1307_v3  ;;  %v1308_v17 = vmul.f32 %v1289_v12, %v961_v6  ;;  %v3331_v3 = vld [vmem:[%s6847_s9 + $0x28] sm:$0xff]  ;;  %v3330_v4 = vld [vmem:[%s6847_s9 + $0x20] sm:$0xff]  ;;  %v3329_v5 = vld [vmem:[%s6847_s9 + $0x18] sm:$0xff] }
 0x121   : > { %v864_v14 = vpop.f32.mrf.mxu0  ;;  %1487 = vmatmul.mubr.f32.gmra.mxu0 %v1306_v7  ;;  %v3328_v6 = vld [vmem:[%s6847_s9 + $0x10] sm:$0xff]  ;;  %v3327_v7 = vld [vmem:[%s6847_s9 + $0x8] sm:$0xff]  ;;  %v3326_v8 = vld [vmem:[%s6847_s9] sm:$0xff] }
 0x122   : > { %v1309_v15 = vmul.f32 %v1289_v12, %v962_v9  ;;  %v922_v16 = vmax.f32 %v861_v13, 0.0  ;;  %v963_v11 = vmin.f32 %v921_v10, 1.0  ;;  %v3325_v9 = vld [vmem:[%s458_s22] sm:$0xff]  ;;  %v3414_v10 = vld [vmem:[%s6848_s10 + $0x38] sm:$0xff]  ;;  %v3413_v12 = vld [vmem:[%s6848_s10 + $0x30] sm:$0xff]  ;;  %s3694_s22 = sshll.u32 %s7008_s26, 1 }
 0x123   : > { %v866_v19 = vpop.f32.mrf.mxu0  ;;  %v3412_v13 = vld [vmem:[%s6848_s10 + $0x28] sm:$0xff]  ;;  %s462_s27 = scalar_lea.vmem %s6850_s12, %s3694_s22 }
 0x124   : > { %v964_v20 = vmin.f32 %v922_v16, 1.0  ;;  %1492 = vmatprep.mubr.f32.mxu0 %v1309_v15  ;;  %v1310_v25 = vmul.f32 %v1294_v21, %v963_v11  ;;  %v867_v53 = vadd.f32 %v866_v19, %v4680_v59  ;;  %v3410_v15 = vld [vmem:[%s6848_s10 + $0x18] sm:$0xff]  ;;  %v3409_v16 = vld [vmem:[%s6848_s10 + $0x10] sm:$0xff]  ;;  %v3408_v11 = vld [vmem:[%s6848_s10 + $0x8] sm:$0xff] }
 0x125   : > { %v868_v23 = vpop.f32.mrf.mxu0  ;;  %1493 = vmatmul.mubr.f32.gmra.mxu0 %v1308_v17  ;;  %v3407_v17 = vld [vmem:[%s6848_s10] sm:$0xff] }
 0x126   : > { %v1311_v26 = vmul.f32 %v1294_v21, %v964_v20  ;;  %v924_v57 = vmax.f32 %v867_v53, 0.0  ;;  %v1312_v19 = vld [vmem:[%s6843_s5] sm:$0xff] }
 0x127   : > { %v870_v28 = vpop.f32.mrf.mxu0 }
 0x128   : > { %1498 = vmatprep.mubr.f32.mxu0 %v1311_v26  ;;  %v871_v49 = vadd.f32 %v870_v28, %v4682_v61  ;;  %v966_v63 = vmin.f32 %v924_v57, 1.0  ;;  %v1313_v28 = vld [vmem:[%s6843_s5 + $0x8] sm:$0xff] }
 0x129   : > { %v874_v29 = vpop.f32.mrf.mxu0  ;;  %1499 = vmatmul.mubr.f32.gmra.mxu0 %v1310_v25 }
 0x12a   : > { %3913 = vmatprep.mubr.msk.f32.mxu0 %vm4147_vm1, %v6852_v18  ;;  %v875_v0 = vadd.f32 %v874_v29, %v4676_v31  ;;  %v926_v54 = vmax.f32 %v871_v49, 0.0 }
 0x12b   : > { %v876_v27 = vpop.f32.mrf.mxu0 }
 0x12c   : > { %v877_v41 = vadd.f32 %v876_v27, %v4676_v31  ;;  %v865_v31 = vadd.f32 %v864_v14, %v4680_v59  ;;  %v968_v58 = vmin.f32 %v926_v54, 1.0  ;;  %v3333_v59 = vld [vmem:[%s6847_s9 + $0x38] sm:$0xff]  ;;  %v3411_v14 = vld [vmem:[%s6848_s10 + $0x20] sm:$0xff] }
 0x12d   : > { %v878_v30 = vpop.f32.mrf.mxu0 }
 0x12e   : > { %v879_v38 = vadd.f32 %v878_v30, %v4678_v33  ;;  %v928_v50 = vmax.f32 %v877_v41, 0.0  ;;  %v923_v60 = vmax.f32 %v865_v31, 0.0 }
 0x12f   : > { %v880_v34 = vpop.f32.mrf.mxu0 }
 0x130   : > { %v881_v35 = vadd.f32 %v880_v34, %v4678_v33  ;;  %v929_v48 = vmax.f32 %v879_v38, 0.0  ;;  %v927_v33 = vmax.f32 %v875_v0, 0.0  ;;  %v970_v55 = vmin.f32 %v928_v50, 1.0 }
 0x131   : > { %v884_v32 = vpop.f32.mrf.mxu0 }
 0x132   : > { %v885_v36 = vadd.f32 %v884_v32, %v4674_v22  ;;  %v930_v42 = vmax.f32 %v881_v35, 0.0  ;;  %v971_v52 = vmin.f32 %v929_v48, 1.0  ;;  %v969_v43 = vmin.f32 %v927_v33, 1.0 }
 0x133   : > { %v886_v24 = vpop.f32.mrf.mxu0  ;;  %v6863_v33 = vmov 2131351028  }
 0x134   : > { %v887_v37 = vadd.f32 %v886_v24, %v4674_v22  ;;  %v931_v39 = vmax.f32 %v885_v36, 0.0  ;;  %v972_v51 = vmin.f32 %v930_v42, 1.0  ;;  %v869_v22 = vadd.f32 %v868_v23, %v4682_v61 }
 0x135   : > { %v888_v40 = vpop.f32.mrf.mxu0  ;;  %v965_v61 = vmin.f32 %v923_v60, 1.0  ;;  %v6865_v42 = vmov 920167782  }
 0x136   : > { %v932_v44 = vmax.f32 %v887_v37, 0.0  ;;  %v973_v47 = vmin.f32 %v931_v39, 1.0  ;;  %v925_v56 = vmax.f32 %v869_v22, 0.0  ;;  %v1314_v37 = vld [vmem:[%s6843_s5 + $0x10] sm:$0xff] }
 0x137   : > { %v889_v45 = vpop.f32.mrf.mxu0 }
 0x138   : > { %v974_v46 = vmin.f32 %v932_v44, 1.0  ;;  %v967_v62 = vmin.f32 %v925_v56, 1.0 }
 0x13a   : > { %3277 = vmatprep.subr.mxu1 %v974_v46  ;;  %v6861_v46 = vmov 1326507024  }
 0x13b   : > { %3278 = vmatpush1.xpose.msra.mxu1 %v973_v47  ;;  %v6857_v47 = vmov 2102212464  }
 0x13c   : > { %3279 = vmatprep.subr.mxu1 %v972_v51  ;;  %v6859_v51 = vmov 2475754826  }
 0x13f   : > { %3280 = vmatpush1.xpose.msra.mxu1 %v971_v52 }
 0x140   : > { %3281 = vmatprep.subr.mxu1 %v970_v55  ;;  %v6871_v55 = vmov 683565275  }
 0x143   : > { %3282 = vmatpush1.xpose.msra.mxu1 %v969_v43 }
 0x144   : > { %3283 = vmatprep.subr.mxu1 %v968_v58 }
 0x147   : > { %3284 = vmatpush1.xpose.msra.mxu1 %v967_v62 }
 0x148   : > { %3285 = vmatprep.subr.mxu1 %v966_v63 }
 0x14b   : > { %3286 = vmatpush1.xpose.msra.mxu1 %v965_v61 }
 0x14c   : > { %3857 = vmatprep.subr.mxu1 %v6852_v18 }
 0x14e   : > { %3320 = vmatmul.mubr.f32.vlgmr.msra.gmra.mxu1 %v3253_v1 }
 0x14f   : > { %3858 = vmatpush3.msra.mxu1 %v3333_v59  ;;  %3873 = vmatprep.mubr.msk.f32.mxu1 %vm4147_vm1, %v6852_v18 }
 0x150   : > { %3859 = vmatprep.subr.mxu1 %v6852_v18 }
 0x151   : > { %3860 = vmatpush3.msra.mxu1 %v3332_v2 }
 0x152   : > { %3861 = vmatprep.subr.mxu1 %v6852_v18 }
 0x153   : > { %3862 = vmatpush3.msra.mxu1 %v3331_v3 }
 0x154   : > { %3863 = vmatprep.subr.mxu1 %v6852_v18 }
 0x155   : > { %3864 = vmatpush3.msra.mxu1 %v3330_v4 }
 0x156   : > { %3865 = vmatprep.subr.mxu1 %v6852_v18 }
 0x157   : > { %3866 = vmatpush3.msra.mxu1 %v3329_v5  ;;  %v1315_v5 = vld [vmem:[%s6843_s5 + $0x18] sm:$0xff] }
 0x158   : > { %3867 = vmatprep.subr.mxu1 %v6852_v18 }
 0x159   : > { %3868 = vmatpush3.msra.mxu1 %v3328_v6 }
 0x15a   : > { %3869 = vmatprep.subr.mxu1 %v6852_v18 }
 0x15b   : > { %3870 = vmatpush3.msra.mxu1 %v3327_v7 }
 0x15c   : > { %3871 = vmatprep.subr.mxu1 %v6852_v18 }
 0x15d   : > { %3872 = vmatpush3.msra.mxu1 %v3326_v8 }
 0x15e   : > { %3874 = vmatmul.mubr.msk.f32.vlgmr.msra.gmra.mxu1 %vm716_vm0, %v3325_v9  ;;  %3876 = vmatprep.subr.mxu1 %v6852_v18 }
 0x15f   : > { %3877 = vmatpush3.msra.mxu1 %v3414_v10  ;;  %3892 = vmatprep.mubr.msk.f32.mxu1 %vm4147_vm1, %v6852_v18 }
 0x160   : > { %3878 = vmatprep.subr.mxu1 %v6852_v18 }
 0x161   : > { %3879 = vmatpush3.msra.mxu1 %v3413_v12 }
 0x162   : > { %3880 = vmatprep.subr.mxu1 %v6852_v18 }
 0x163   : > { %3881 = vmatpush3.msra.mxu1 %v3412_v13 }
 0x164   : > { %3882 = vmatprep.subr.mxu1 %v6852_v18 }
 0x165   : > { %3883 = vmatpush3.msra.mxu1 %v3411_v14 }
 0x166   : > { %3884 = vmatprep.subr.mxu1 %v6852_v18 }
 0x167   : > { %3885 = vmatpush3.msra.mxu1 %v3410_v15 }
 0x168   : > { %3886 = vmatprep.subr.mxu1 %v6852_v18 }
 0x169   : > { %3887 = vmatpush3.msra.mxu1 %v3409_v16 }
 0x16a   : > { %3888 = vmatprep.subr.mxu1 %v6852_v18 }
 0x16b   : > { %3889 = vmatpush3.msra.mxu1 %v3408_v11 }
 0x16c   : > { %3890 = vmatprep.subr.mxu1 %v6852_v18 }
 0x16d   : > { %3891 = vmatpush3.msra.mxu1 %v3407_v17 }
 0x16e   : > { %3893 = vmatmul.mubr.msk.f32.vlgmr.msra.gmra.mxu1 %vm716_vm0, %v3325_v9 }
 0x1cd   : > { %v1458_v20 = vpop.f32.mrf.mxu0 }
 0x1ce   : > { %v4781_v21 = vadd.f32 %v1458_v20, %v1312_v19 }
 0x1cf   : > { %v1460_v29 = vpop.f32.mrf.mxu0 }
 0x1d0   : > { %v1524_v23 = vand.u32 2139095040, %v4781_v21  ;;  %v4787_v30 = vadd.f32 %v1460_v29, %v1313_v28  ;;  %v1521_v45 = vand.u32 2147483647, %v4781_v21 }
 0x1d1   : > { %v1464_v38 = vpop.f32.mrf.mxu0 }
 0x1d2   : > { %v1525_v26 = vshrl.u32 %v1524_v23, 23  ;;  %v1628_v34 = vand.u32 2139095040, %v4787_v30  ;;  %v4795_v41 = vadd.f32 %v1464_v38, %v1314_v37  ;;  %v1528_v62 = vand.u32 8388607, %v1521_v45 }
 0x1d3   : > { %v1466_v6 = vpop.f32.mrf.mxu0  ;;  %v1625_v20 = vand.u32 2147483647, %v4787_v30 }
 0x1d4   : > { %v3758_v25 = vadd.s32 4294967169, %v1525_v26  ;;  %v1629_v35 = vshrl.u32 %v1628_v34, 23  ;;  %v1732_v50 = vand.u32 2139095040, %v4795_v41  ;;  %v1529_v8 = vor.u32 8388608, %v1528_v62 }
 0x1d5   : > { %v4838_v15 = vadd.f32 %v1466_v6, %v1315_v5 }
 0x1d6   : > { %v1531_v27 = vadd.s32 1, %v3758_v25  ;;  %v3762_v24 = vadd.s32 4294967169, %v1629_v35  ;;  %v1733_v63 = vshrl.u32 %v1732_v50, 23  ;;  %v1569_v19 = vshll.u32 %v1529_v8, 8 }
 0x1d7   : > { %v1836_v26 = vand.u32 2139095040, %v4838_v15 }
 0x1d8   : > { %vm1532_vm2 = vcmp.gt.s32.totalorder %v1531_v27, 0  ;;  %v1635_v40 = vadd.s32 1, %v3762_v24  ;;  %v3766_v7 = vadd.s32 4294967169, %v1733_v63 }
 0x1d9   : > { %v1533_v32 = vsel %vm1532_vm2, %v1531_v27, 0 }
 0x1da   : > { %v1535_v36 = vand.u32 31, %v1533_v32  ;;  %v4802_v48 = vshrl.u32 %v1533_v32, 5  ;;  %vm1636_vm3 = vcmp.gt.s32.totalorder %v1635_v40, 0  ;;  %v1739_v11 = vadd.s32 1, %v3766_v7 }
 0x1db   : > { %v1637_v60 = vsel %vm1636_vm3, %v1635_v40, 0  ;;  %v1729_v7 = vand.u32 2147483647, %v4795_v41 }
 0x1dc   : > { %v4793_v39 = vsub.s32 32, %v1535_v36  ;;  %v1547_v49 = vshll.u32 %v6857_v47, %v1535_v36  ;;  %v1550_v54 = vshll.u32 %v6865_v42, %v1535_v36  ;;  %v1538_v31 = vshll.u32 %v6871_v55, %v1535_v36 }
 0x1dd   : > { %v1541_v43 = vshll.u32 %v6859_v51, %v1535_v36  ;;  %v1544_v57 = vshll.u32 %v6863_v33, %v1535_v36  ;;  %vm1556_vm4 = vcmp.lt.s32.totalorder %v4802_v48, 4  ;;  %v1639_v3 = vand.u32 31, %v1637_v60 }
 0x1de   : > { %v1548_v44 = vshrl.u32 %v6865_v42, %v4793_v39  ;;  %v1551_v0 = vshrl.u32 %v6861_v46, %v4793_v39  ;;  %v1539_v22 = vshrl.u32 %v6859_v51, %v4793_v39  ;;  %v1542_v52 = vshrl.u32 %v6863_v33, %v4793_v39 }
 0x1df   : > { %v1545_v53 = vshrl.u32 %v6857_v47, %v4793_v39  ;;  %vm1553_vm5 = vcmp.lt.s32.totalorder %v4802_v48, 1  ;;  %vm1555_vm6 = vcmp.lt.s32.totalorder %v4802_v48, 3  ;;  %v4836_v14 = vsub.s32 32, %v1639_v3 }
 0x1e0   : > { %v1549_v56 = vor.u32 %v1548_v44, %v1547_v49  ;;  %v1552_v58 = vor.u32 %v1551_v0, %v1550_v54  ;;  %v1540_v61 = vor.u32 %v1539_v22, %v1538_v31  ;;  %v1543_v1 = vor.u32 %v1542_v52, %v1541_v43 }
 0x1e1   : > { %v1546_v59 = vor.u32 %v1545_v53, %v1544_v57  ;;  %vm1554_vm7 = vcmp.lt.s32.totalorder %v4802_v48, 2  ;;  %v1652_v23 = vshrl.u32 %v6865_v42, %v4836_v14  ;;  %v4853_v29 = vshrl.u32 %v1637_v60, 5 }
 0x1e2   : > { %v1562_v2 = vsel %vm1556_vm4, %v1549_v56, 920167782  ;;  %v1566_v4 = vsel %vm1556_vm4, %v1552_v58, 1326507024  ;;  %v1561_v9 = vsel %vm1553_vm5, %v1540_v61, %v1543_v1  ;;  %v1655_v27 = vshrl.u32 %v6861_v46, %v4836_v14 }
 0x1e3   : > { %v1563_v10 = vsel %vm1555_vm6, %v1546_v59, %v1562_v2  ;;  %v1565_v12 = vsel %vm1553_vm5, %v1543_v1, %v1546_v59  ;;  %v1567_v13 = vsel %vm1555_vm6, %v1549_v56, %v1566_v4  ;;  %v1651_v35 = vshll.u32 %v6857_v47, %v1639_v3 }
 0x1e4   : > { %v1564_v16 = vsel %vm1554_vm7, %v1561_v9, %v1563_v10  ;;  %v1568_v17 = vsel %vm1554_vm7, %v1565_v12, %v1567_v13  ;;  %vm1740_vm8 = vcmp.gt.s32.totalorder %v1739_v11, 0  ;;  %v1643_v36 = vshrl.u32 %v6859_v51, %v4836_v14  ;;  %v1316_v13 = vld [vmem:[%s6843_s5 + $0x20] sm:$0xff] }
 0x1e5   : > { %v4849_v25 = vmul.u32.u64.low %v1569_v19, %v1564_v16  ;;  %v4850_v28 = vmul.u32.u64.high %v1569_v19, %v1564_v16, %v4849_v25  ;;  %v4857_v34 = vmul.u32.u64.low %v1569_v19, %v1568_v17  ;;  %v4858_v32 = vmul.u32.u64.high %v1569_v19, %v1568_v17, %v4857_v34  ;;  %v1470_v16 = vpop.f32.mrf.mxu0 }
 0x1e6   : > { %v1646_v24 = vshrl.u32 %v6863_v33, %v4836_v14  ;;  %v1649_v37 = vshrl.u32 %v6857_v47, %v4836_v14  ;;  %v1654_v38 = vshll.u32 %v6865_v42, %v1639_v3  ;;  %v1558_v40 = vsel %vm1556_vm4, %v1546_v59, 2102212464 }
 0x1e7   : > { %v1642_v44 = vshll.u32 %v6871_v55, %v1639_v3  ;;  %v1645_v0 = vshll.u32 %v6859_v51, %v1639_v3  ;;  %v1653_v49 = vor.u32 %v1652_v23, %v1651_v35  ;;  %v1648_v50 = vshll.u32 %v6863_v33, %v1639_v3 }
 0x1e8   : > { %v1656_v22 = vor.u32 %v1655_v27, %v1654_v38  ;;  %v1741_v52 = vsel %vm1740_vm8, %v1739_v11, 0  ;;  %v1837_v53 = vshrl.u32 %v1836_v26, 23  ;;  %v1537_v54 = vshrl.u32 %v6871_v55, %v4793_v39 }
 0x1e9   : > { %v1632_v31 = vand.u32 8388607, %v1625_v20  ;;  %v1644_v56 = vor.u32 %v1643_v36, %v1642_v44  ;;  %v1647_v43 = vor.u32 %v1646_v24, %v1645_v0  ;;  %v1650_v57 = vor.u32 %v1649_v37, %v1648_v50 }
 0x1ea   : > { %vm1660_vm9 = vcmp.lt.s32.totalorder %v4853_v29, 4  ;;  %v1557_v58 = vsel %vm1553_vm5, %v1537_v54, %v1540_v61  ;;  %v1559_v60 = vsel %vm1555_vm6, %v1543_v1, %v1558_v40  ;;  %v1743_v63 = vand.u32 31, %v1741_v52 }
 0x1eb   : > { %v1666_v62 = vsel %vm1660_vm9, %v1653_v49, 920167782  ;;  %v1579_v39 = vadd.s32 1, %v4850_v28  ;;  %v1670_v59 = vsel %vm1660_vm9, %v1656_v22, 1326507024  ;;  %v3770_v2 = vadd.s32 4294967169, %v1837_v53 }
 0x1ec   : > { %vm1578_vm10 = vc.u32 %v4858_v32, %v4849_v25  ;;  %vm1657_vm11 = vcmp.lt.s32.totalorder %v4853_v29, 1  ;;  %vm1659_vm12 = vcmp.lt.s32.totalorder %v4853_v29, 3  ;;  %v1560_v61 = vsel %vm1554_vm7, %v1557_v58, %v1559_v60 }
 0x1ed   : > { %v1633_v1 = vor.u32 8388608, %v1632_v31  ;;  %v1665_v3 = vsel %vm1657_vm11, %v1644_v56, %v1647_v43  ;;  %v1667_v4 = vsel %vm1659_vm12, %v1650_v57, %v1666_v62  ;;  %v1669_v5 = vsel %vm1657_vm11, %v1647_v43, %v1650_v57 }
 0x1ee   : > { %v1671_v6 = vsel %vm1659_vm12, %v1653_v49, %v1670_v59  ;;  %v4902_v8 = vsub.s32 32, %v1743_v63  ;;  %v1580_v48 = vsel %vm1578_vm10, %v1579_v39, %v4850_v28  ;;  %vm1658_vm13 = vcmp.lt.s32.totalorder %v4853_v29, 2 }
 0x1ef   : > { %v1843_v9 = vadd.s32 1, %v3770_v2  ;;  %v1576_v10 = vmul.u32 %v1569_v19, %v1560_v61  ;;  %v1668_v12 = vsel %vm1658_vm13, %v1665_v3, %v1667_v4  ;;  %v1672_v11 = vsel %vm1658_vm13, %v1669_v5, %v1671_v6 }
 0x1f0   : > { %v1673_v17 = vshll.u32 %v1633_v1, 8  ;;  %v1736_v26 = vand.u32 8388607, %v1729_v7  ;;  %v1759_v28 = vshrl.u32 %v6861_v46, %v4902_v8  ;;  %v4921_v34 = vadd.f32 %v1470_v16, %v1316_v13 }
 0x1f1   : > { %v1581_v23 = vadd.s32 %v1580_v48, %v1576_v10  ;;  %vm1844_vm14 = vcmp.gt.s32.totalorder %v1843_v9, 0  ;;  %v1756_v24 = vshrl.u32 %v6865_v42, %v4902_v8  ;;  %v1758_v37 = vshll.u32 %v6865_v42, %v1743_v63 }
 0x1f2   : > { %v4917_v19 = vmul.u32.u64.low %v1673_v17, %v1668_v12  ;;  %v4918_v27 = vmul.u32.u64.high %v1673_v17, %v1668_v12, %v4917_v19  ;;  %v4923_v35 = vmul.u32.u64.low %v1673_v17, %v1672_v11  ;;  %v4924_v36 = vmul.u32.u64.high %v1673_v17, %v1672_v11, %v4923_v35 }
 0x1f3   : > { %v1641_v38 = vshrl.u32 %v6871_v55, %v4836_v14  ;;  %v4931_v40 = vshrl.u32 %v1741_v52, 5  ;;  %v1750_v44 = vshrl.u32 %v6863_v33, %v4902_v8  ;;  %v1753_v0 = vshrl.u32 %v6857_v47, %v4902_v8 }
 0x1f4   : > { %v1582_v49 = vadd.s32 536870912, %v1581_v23  ;;  %v1755_v50 = vshll.u32 %v6857_v47, %v1743_v63  ;;  %v1760_v22 = vor.u32 %v1759_v28, %v1758_v37  ;;  %v1845_v53 = vsel %vm1844_vm14, %v1843_v9, 0 }
 0x1f5   : > { %v1662_v54 = vsel %vm1660_vm9, %v1650_v57, 2102212464  ;;  %v1747_v31 = vshrl.u32 %v6859_v51, %v4902_v8  ;;  %v1749_v14 = vshll.u32 %v6859_v51, %v1743_v63  ;;  %v1752_v52 = vshll.u32 %v6863_v33, %v1743_v63 }
 0x1f6   : > { %v1661_v58 = vsel %vm1657_vm11, %v1641_v38, %v1644_v56  ;;  %v1746_v60 = vshll.u32 %v6871_v55, %v1743_v63  ;;  %v1757_v62 = vor.u32 %v1756_v24, %v1755_v50  ;;  %vm1764_vm15 = vcmp.lt.s32.totalorder %v4931_v40, 4 }
 0x1f7   : > { %v4947_v39 = vor.u32 %v1750_v44, %v1749_v14  ;;  %v1754_v59 = vor.u32 %v1753_v0, %v1752_v52  ;;  %v1847_v2 = vand.u32 31, %v1845_v53  ;;  %v4950_v57 = vshrl.u32 %v1582_v49, 30 }
 0x1f8   : > { %v1663_v61 = vsel %vm1659_vm12, %v1647_v43, %v1662_v54  ;;  %v1774_v1 = vsel %vm1764_vm15, %v1760_v22, 1326507024  ;;  %v1940_v3 = vand.u32 2139095040, %v4921_v34  ;;  %v1683_v56 = vadd.s32 1, %v4918_v27 }
 0x1f9   : > { %v1737_v63 = vor.u32 8388608, %v1736_v26  ;;  %v1748_v4 = vor.u32 %v1747_v31, %v1746_v60  ;;  %vm1682_vm0 = vc.u32 %v4924_v36, %v4917_v19  ;;  %vm1761_vm1 = vcmp.lt.s32.totalorder %v4931_v40, 1 }
 0x1fa   : > { %vm1763_vm2 = vcmp.lt.s32.totalorder %v4931_v40, 3  ;;  %v1770_v5 = vsel %vm1764_vm15, %v1757_v62, 920167782  ;;  %v1664_v43 = vsel %vm1658_vm13, %v1661_v58, %v1663_v61  ;;  %v1773_v6 = vsel %vm1761_vm1, %v4947_v39, %v1754_v59 }
 0x1fb   : > { %v1775_v48 = vsel %vm1763_vm2, %v1757_v62, %v1774_v1  ;;  %v4971_v9 = vsub.s32 32, %v1847_v2  ;;  %v1584_v10 = vshll.u32 %v4950_v57, 30  ;;  %v1941_v12 = vshrl.u32 %v1940_v3, 23 }
 0x1fc   : > { %v1684_v13 = vsel %vm1682_vm0, %v1683_v56, %v4918_v27  ;;  %vm1762_vm3 = vcmp.lt.s32.totalorder %v4931_v40, 2  ;;  %v1769_v29 = vsel %vm1761_vm1, %v1748_v4, %v4947_v39  ;;  %v1771_v16 = vsel %vm1763_vm2, %v1754_v59, %v1770_v5 }
 0x1fd   : > { %v1680_v11 = vmul.u32 %v1673_v17, %v1664_v43  ;;  %v1776_v26 = vsel %vm1762_vm3, %v1773_v6, %v1775_v48  ;;  %v4983_v28 = vshll.u32 %v1737_v63, 8  ;;  %v6856_v35 = vand.u32 2147483647, %v4838_v15 }
 0x1fe   : > { %v1860_v27 = vshrl.u32 %v6865_v42, %v4971_v9  ;;  %v1863_v24 = vshrl.u32 %v6861_v46, %v4971_v9  ;;  %v4990_v37 = vsub.s32 %v1581_v23, %v1584_v10  ;;  %v1772_v17 = vsel %vm1762_vm3, %v1769_v29, %v1771_v16 }
 0x1ff   : > { %v4992_v38 = vadd.s32 %v1684_v13, %v1680_v11  ;;  %v3774_v44 = vadd.s32 4294967169, %v1941_v12  ;;  %v4997_v0 = vmul.u32.u64.low %v4983_v28, %v1776_v26  ;;  %v4998_v49 = vmul.u32.u64.high %v4983_v28, %v1776_v26, %v4997_v0 }
 0x200   : > { %v1859_v50 = vshll.u32 %v6857_v47, %v1847_v2  ;;  %v1862_v22 = vshll.u32 %v6865_v42, %v1847_v2  ;;  %v5002_v54 = vshrl.u32 %v1845_v53, 5  ;;  %v1851_v23 = vshrl.u32 %v6859_v51, %v4971_v9 }
 0x201   : > { %v1854_v31 = vshrl.u32 %v6863_v33, %v4971_v9  ;;  %v1857_v14 = vshrl.u32 %v6857_v47, %v4971_v9  ;;  %v5011_v52 = vmul.u32.u64.low %v4983_v28, %v1772_v17  ;;  %v5012_v58 = vmul.u32.u64.high %v4983_v28, %v1772_v17, %v5011_v52 }
 0x202   : > { %v1861_v60 = vor.u32 %v1860_v27, %v1859_v50  ;;  %v1864_v62 = vor.u32 %v1863_v24, %v1862_v22  ;;  %v1850_v61 = vshll.u32 %v6871_v55, %v1847_v2  ;;  %v1853_v53 = vshll.u32 %v6859_v51, %v1847_v2 }
 0x203   : > { %v1856_v1 = vshll.u32 %v6863_v33, %v1847_v2  ;;  %v1947_v3 = vadd.s32 1, %v3774_v44  ;;  %v1745_v56 = vshrl.u32 %v6871_v55, %v4902_v8  ;;  %v1766_v63 = vsel %vm1764_vm15, %v1754_v59, 2102212464 }
 0x204   : > { %v1840_v5 = vand.u32 8388607, %v6856_v35  ;;  %v1852_v43 = vor.u32 %v1851_v23, %v1850_v61  ;;  %v1855_v6 = vor.u32 %v1854_v31, %v1853_v53  ;;  %vm1868_vm4 = vcmp.lt.s32.totalorder %v5002_v54, 4 }
 0x205   : > { %v1858_v48 = vor.u32 %v1857_v14, %v1856_v1  ;;  %v1587_v10 = vsub.s32 0, %v4990_v37  ;;  %v1874_v2 = vsel %vm1868_vm4, %v1861_v60, 920167782  ;;  %v1878_v12 = vsel %vm1868_vm4, %v1864_v62, 1326507024  ;;  %v1472_v62 = vpop.f32.mrf.mxu0 }
 0x206   : > { %v1686_v8 = vadd.s32 536870912, %v4992_v38  ;;  %v1765_v59 = vsel %vm1761_vm1, %v1745_v56, %v1748_v4  ;;  %vm1948_vm5 = vcmp.gt.s32.totalorder %v1947_v3, 0  ;;  %v1767_v13 = vsel %vm1763_vm2, %v4947_v39, %v1766_v63 }
 0x207   : > { %v1841_v29 = vor.u32 8388608, %v1840_v5  ;;  %vm1865_vm6 = vcmp.lt.s32.totalorder %v5002_v54, 1  ;;  %vm1867_vm7 = vcmp.lt.s32.totalorder %v5002_v54, 3  ;;  %v3759_v27 = vmin.u32 %v1587_v10, %v4990_v37 }
 0x208   : > { %v1873_v16 = vsel %vm1865_vm6, %v1852_v43, %v1855_v6  ;;  %v1875_v11 = vsel %vm1867_vm7, %v1858_v48, %v1874_v2  ;;  %v1877_v26 = vsel %vm1865_vm6, %v1855_v6, %v1858_v48  ;;  %v1879_v4 = vsel %vm1867_vm7, %v1861_v60, %v1878_v12  ;;  %v1317_v60 = vld [vmem:[%s6843_s5 + $0x28] sm:$0xff] }
 0x209   : > { %v1787_v39 = vadd.s32 1, %v5012_v58  ;;  %v1949_v24 = vsel %vm1948_vm5, %v1947_v3, 0  ;;  %v1768_v17 = vsel %vm1762_vm3, %v1765_v59, %v1767_v13  ;;  %vm1786_vm8 = vc.u32 %v4998_v49, %v5011_v52 }
 0x20a   : > { %vm1866_vm9 = vcmp.lt.s32.totalorder %v5002_v54, 2  ;;  %v5053_v44 = vshrl.u32 %v1686_v8, 30  ;;  %v1881_v22 = vshll.u32 %v1841_v29, 8  ;;  %v1951_v23 = vand.u32 31, %v1949_v24 }
 0x20b   : > { %v1876_v0 = vsel %vm1866_vm9, %v1873_v16, %v1875_v11  ;;  %v1880_v50 = vsel %vm1866_vm9, %v1877_v26, %v1879_v4  ;;  %v1589_v31 = vclz %v3759_v27  ;;  %v1784_v14 = vmul.u32 %v4983_v28, %v1768_v17 }
 0x20c   : > { %v1788_v40 = vsel %vm1786_vm8, %v1787_v39, %v5012_v58  ;;  %v5064_v61 = vmul.u32.u64.low %v1881_v22, %v1880_v50  ;;  %v5065_v53 = vmul.u32.u64.high %v1881_v22, %v1880_v50, %v5064_v61  ;;  %v1688_v56 = vshll.u32 %v5053_v44, 30 }
 0x20d   : > { %v5067_v1 = vmul.u32.u64.low %v1881_v22, %v1876_v0  ;;  %v5068_v3 = vmul.u32.u64.high %v1881_v22, %v1876_v0, %v5067_v1  ;;  %v1870_v63 = vsel %vm1868_vm4, %v1858_v48, 2102212464  ;;  %v1789_v28 = vadd.s32 %v1788_v40, %v1784_v14 }
 0x20e   : > { %v1849_v58 = vshrl.u32 %v6871_v55, %v4971_v9  ;;  %v5076_v5 = vsub.s32 32, %v1951_v23  ;;  %v5078_v10 = vadd.f32 %v1472_v62, %v1317_v60  ;;  %v3760_v2 = vadd.s32 4294967294, %v1589_v31 }
 0x20f   : > { %v1871_v8 = vsel %vm1867_vm7, %v1855_v6, %v1870_v63  ;;  %v5085_v59 = vsub.s32 %v4992_v38, %v1688_v56  ;;  %v1790_v13 = vadd.s32 536870912, %v1789_v28  ;;  %v6855_v16 = vand.u32 2147483647, %v4921_v34 }
 0x210   : > { %v1869_v12 = vsel %vm1865_vm6, %v1849_v58, %v1852_v43  ;;  %v1964_v48 = vshrl.u32 %v6865_v42, %v5076_v5  ;;  %v2044_v9 = vand.u32 2139095040, %v5078_v10  ;;  %vm3761_vm10 = vcmp.lt.s32.totalorder %v3760_v2, 0 }
 0x211   : > { %v1872_v29 = vsel %vm1866_vm9, %v1869_v12, %v1871_v8  ;;  %v1967_v43 = vshrl.u32 %v6861_v46, %v5076_v5  ;;  %vm1890_vm11 = vc.u32 %v5065_v53, %v5067_v1  ;;  %v1891_v38 = vadd.s32 1, %v5068_v3 }
 0x212   : > { %v5098_v6 = vshrl.u32 %v1949_v24, 5  ;;  %v1963_v11 = vshll.u32 %v6857_v47, %v1951_v23  ;;  %v1955_v26 = vshrl.u32 %v6859_v51, %v5076_v5  ;;  %v1958_v54 = vshrl.u32 %v6863_v33, %v5076_v5 }
 0x213   : > { %v1961_v4 = vshrl.u32 %v6857_v47, %v5076_v5  ;;  %v1966_v27 = vshll.u32 %v6865_v42, %v1951_v23  ;;  %v1691_v39 = vsub.s32 0, %v5085_v59  ;;  %v5109_v17 = vshrl.u32 %v1790_v13, 30 }
 0x214   : > { %v1965_v0 = vor.u32 %v1964_v48, %v1963_v11  ;;  %v2045_v24 = vshrl.u32 %v2044_v9, 23  ;;  %v1954_v50 = vshll.u32 %v6871_v55, %v1951_v23  ;;  %v1957_v31 = vshll.u32 %v6859_v51, %v1951_v23  ;;  %v1476_v11 = vpop.f32.mrf.mxu0 }
 0x215   : > { %v1960_v14 = vshll.u32 %v6863_v33, %v1951_v23  ;;  %v1968_v40 = vor.u32 %v1967_v43, %v1966_v27  ;;  %v1888_v60 = vmul.u32 %v1881_v22, %v1872_v29  ;;  %v1892_v62 = vsel %vm1890_vm11, %v1891_v38, %v5068_v3 }
 0x216   : > { %v1944_v61 = vand.u32 8388607, %v6855_v16  ;;  %v3778_v56 = vadd.s32 4294967169, %v2045_v24  ;;  %v1956_v63 = vor.u32 %v1955_v26, %v1954_v50  ;;  %v1959_v58 = vor.u32 %v1958_v54, %v1957_v31 }
 0x217   : > { %v1962_v12 = vor.u32 %v1961_v4, %v1960_v14  ;;  %vm1972_vm12 = vcmp.lt.s32.totalorder %v5098_v6, 4  ;;  %v1792_v8 = vshll.u32 %v5109_v17, 30  ;;  %v1592_v22 = vsel %vm3761_vm10, 0, %v3760_v2  ;;  %v1318_v2 = vld [vmem:[%s6843_s5 + $0x30] sm:$0xff] }
 0x218   : > { %v1978_v23 = vsel %vm1972_vm12, %v1965_v0, 920167782  ;;  %v1893_v13 = vadd.s32 %v1892_v62, %v1888_v60  ;;  %v1982_v3 = vsel %vm1972_vm12, %v1968_v40, 1326507024  ;;  %v3763_v48 = vmin.u32 %v1691_v39, %v5085_v59 }
 0x219   : > { %vm1969_vm13 = vcmp.lt.s32.totalorder %v5098_v6, 1  ;;  %vm1971_vm14 = vcmp.lt.s32.totalorder %v5098_v6, 3  ;;  %v2051_v9 = vadd.s32 1, %v3778_v56  ;;  %v1945_v29 = vor.u32 8388608, %v1944_v61 }
 0x21a   : > { %v1977_v43 = vsel %vm1969_vm13, %v1956_v63, %v1959_v58  ;;  %v1979_v38 = vsel %vm1971_vm14, %v1962_v12, %v1978_v23  ;;  %v1597_v26 = vsub.s32 4294967266, %v1592_v22  ;;  %v5137_v54 = vsub.s32 %v1789_v28, %v1792_v8 }
 0x21b   : > { %v1981_v4 = vsel %vm1969_vm13, %v1959_v58, %v1962_v12  ;;  %v1983_v27 = vsel %vm1971_vm14, %v1965_v0, %v1982_v3  ;;  %v1894_v39 = vadd.s32 536870912, %v1893_v13  ;;  %vm1970_vm15 = vcmp.lt.s32.totalorder %v5098_v6, 2 }
 0x21c   : > { %v1693_v24 = vclz %v3763_v48  ;;  %v1980_v50 = vsel %vm1970_vm15, %v1977_v43, %v1979_v38  ;;  %vm2052_vm0 = vcmp.gt.s32.totalorder %v2051_v9, 0  ;;  %v5146_v31 = vadd.f32 %v1476_v11, %v1318_v2 }
 0x21d   : > { %v1593_v14 = vsub.s32 32, %v1592_v22  ;;  %v1984_v28 = vsel %vm1970_vm15, %v1981_v4, %v1983_v27  ;;  %v1985_v40 = vshll.u32 %v1945_v29, 8  ;;  %v1577_v60 = vadd.s32 %v4849_v25, %v4858_v32 }
 0x21e   : > { %v1598_v62 = vadd.s32 127, %v1597_v26  ;;  %v1795_v0 = vsub.s32 0, %v5137_v54  ;;  %v5153_v61 = vshrl.u32 %v1894_v39, 30  ;;  %v2053_v23 = vsel %vm2052_vm0, %v2051_v9, 0 }
 0x21f   : > { %v5155_v56 = vmul.u32.u64.low %v1985_v40, %v1980_v50  ;;  %v5156_v8 = vmul.u32.u64.high %v1985_v40, %v1980_v50, %v5155_v56  ;;  %v3764_v3 = vadd.s32 4294967294, %v1693_v24  ;;  %v2148_v38 = vand.u32 2139095040, %v5146_v31 }
 0x220   : > { %v5159_v48 = vmul.u32.u64.low %v1985_v40, %v1984_v28  ;;  %v5160_v43 = vmul.u32.u64.high %v1985_v40, %v1984_v28, %v5159_v48  ;;  %v1595_v29 = vshrl.u32 %v1577_v60, %v1593_v14  ;;  %v1599_v2 = vshll.u32 %v1598_v62, 23 }
 0x221   : > { %v1974_v25 = vsel %vm1972_vm12, %v1962_v12, 2102212464  ;;  %v2055_v32 = vand.u32 31, %v2053_v23  ;;  %v1594_v11 = vshll.u32 %v4990_v37, %v1592_v22  ;;  %v3767_v26 = vmin.u32 %v1795_v0, %v5137_v54 }
 0x222   : > { %v1896_v4 = vshll.u32 %v5153_v61, 30  ;;  %v1953_v9 = vshrl.u32 %v6871_v55, %v5076_v5  ;;  %vm3765_vm1 = vcmp.lt.s32.totalorder %v3764_v3, 0  ;;  %v2149_v27 = vshrl.u32 %v2148_v38, 23 }
 0x223   : > { %v1596_v39 = vor.u32 %v1595_v29, %v1594_v11  ;;  %v1975_v50 = vsel %vm1971_vm14, %v1959_v58, %v1974_v25  ;;  %v1600_v12 = vor.u32 4788187, %v1599_v2  ;;  %v5174_v14 = vsub.s32 32, %v2055_v32 }
 0x224   : > { %v1973_v24 = vsel %vm1969_vm13, %v1953_v9, %v1956_v63  ;;  %v1696_v37 = vsel %vm3765_vm1, 0, %v3764_v3  ;;  %v1797_v22 = vclz %v3767_v26  ;;  %v5176_v28 = vsub.s32 %v1893_v13, %v1896_v4 }
 0x225   : > { %v1995_v60 = vadd.s32 1, %v5156_v8  ;;  %v1976_v5 = vsel %vm1970_vm15, %v1973_v24, %v1975_v50  ;;  %vm1994_vm2 = vc.u32 %v5160_v43, %v5155_v56  ;;  %v6854_v63 = vand.u32 2147483647, %v5078_v10 }
 0x226   : > { %v3782_v62 = vadd.s32 4294967169, %v2149_v27  ;;  %v1603_v0 = vcvt.s32.f32 %v1596_v39  ;;  %v1681_v58 = vadd.s32 %v4917_v19, %v4924_v36  ;;  %v1601_v48 = vand.u32 2147483647, %v1600_v12 }
 0x227   : > { %v1697_v3 = vsub.s32 32, %v1696_v37  ;;  %v1701_v38 = vsub.s32 4294967266, %v1696_v37  ;;  %v2068_v13 = vshrl.u32 %v6865_v42, %v5174_v14  ;;  %v3768_v29 = vadd.s32 4294967294, %v1797_v22 }
 0x228   : > { %v1899_v6 = vsub.s32 0, %v5176_v28  ;;  %v1992_v2 = vmul.u32 %v1985_v40, %v1976_v5  ;;  %v1996_v25 = vsel %vm1994_vm2, %v1995_v60, %v5156_v8  ;;  %v2048_v11 = vand.u32 8388607, %v6854_v63 }
 0x229   : > { %v2067_v26 = vshll.u32 %v6857_v47, %v2055_v32  ;;  %v2071_v19 = vshrl.u32 %v6861_v46, %v5174_v14  ;;  %v2155_v36 = vadd.s32 1, %v3782_v62  ;;  %v5195_v4 = vshrl.u32 %v2053_v23, 5 }
 0x22a   : > { %v2059_v9 = vshrl.u32 %v6859_v51, %v5174_v14  ;;  %v2062_v27 = vshrl.u32 %v6863_v33, %v5174_v14  ;;  %v2065_v40 = vshrl.u32 %v6857_v47, %v5174_v14  ;;  %v5203_v8 = vadd.s32 %v1996_v25, %v1992_v2 }
 0x22b   : > { %v2069_v39 = vor.u32 %v2068_v13, %v2067_v26  ;;  %v2070_v24 = vshll.u32 %v6865_v42, %v2055_v32  ;;  %vm2156_vm3 = vcmp.gt.s32.totalorder %v2155_v36, 0  ;;  %v2058_v50 = vshll.u32 %v6871_v55, %v2055_v32 }
 0x22c   : > { %v2061_v23 = vshll.u32 %v6859_v51, %v2055_v32  ;;  %v2064_v12 = vshll.u32 %v6863_v33, %v2055_v32  ;;  %v2157_v22 = vsel %vm2156_vm3, %v2155_v36, 0  ;;  %v1699_v60 = vshrl.u32 %v1681_v58, %v1697_v3 }
 0x22d   : > { %vm3769_vm4 = vcmp.lt.s32.totalorder %v3768_v29, 0  ;;  %v2072_v5 = vor.u32 %v2071_v19, %v2070_v24  ;;  %v2159_v62 = vand.u32 31, %v2157_v22  ;;  %v5209_v18 = vor.u32 %v2059_v9, %v2058_v50  ;;  %v1319_v9 = vld [vmem:[%s6843_s5 + $0x38] sm:$0xff] }
 0x22e   : > { %v5211_v63 = vor.u32 %v2062_v27, %v2061_v23  ;;  %v2066_v2 = vor.u32 %v2065_v40, %v2064_v12  ;;  %vm2076_vm5 = vcmp.lt.s32.totalorder %v5195_v4, 4  ;;  %v5214_v13 = vmul.f32 %v1603_v0, %v1601_v48  ;;  %v1478_v27 = vpop.f32.mrf.mxu0 }
 0x22f   : > { %v1702_v25 = vadd.s32 127, %v1701_v38  ;;  %v3771_v26 = vmin.u32 %v1899_v6, %v5176_v28  ;;  %v2082_v32 = vsel %vm2076_vm5, %v2069_v39, 920167782  ;;  %v1698_v58 = vshll.u32 %v5085_v59, %v1696_v37 }
 0x230   : > { %v5220_v3 = vsel %vm3769_vm4, 0, %v3768_v29  ;;  %v1998_v19 = vadd.s32 536870912, %v5203_v8  ;;  %v2049_v36 = vor.u32 8388608, %v2048_v11  ;;  %vm2073_vm6 = vcmp.lt.s32.totalorder %v5195_v4, 1 }
 0x231   : > { %vm2075_vm7 = vcmp.lt.s32.totalorder %v5195_v4, 3  ;;  %v2086_v0 = vsel %vm2076_vm5, %v2072_v5, 1326507024  ;;  %v5230_v48 = vsub.s32 32, %v2159_v62  ;;  %v5232_v59 = vor.u32 %v1699_v60, %v1698_v58 }
 0x232   : > { %v5236_v37 = vadd.s32 %v5011_v52, %v4998_v49  ;;  %v2081_v38 = vsel %vm2073_vm6, %v5209_v18, %v5211_v63  ;;  %v2083_v29 = vsel %vm2075_vm7, %v2066_v2, %v2082_v32  ;;  %v1703_v6 = vshll.u32 %v1702_v25, 23 }
 0x233   : > { %v1805_v11 = vsub.s32 4294967266, %v5220_v3  ;;  %v1901_v40 = vclz %v3771_v26  ;;  %v5245_v24 = vadd.f32 %v1478_v27, %v1319_v9  ;;  %vm2074_vm8 = vcmp.lt.s32.totalorder %v5195_v4, 2 }
 0x234   : > { %v2085_v49 = vsel %vm2073_vm6, %v5211_v63, %v2066_v2  ;;  %v2087_v52 = vsel %vm2075_vm7, %v2069_v39, %v2086_v0  ;;  %v6867_v50 = vand.u32 2147483647, %v5146_v31  ;;  %v5254_v23 = vshrl.u32 %v1998_v19, 30 }
 0x235   : > { %6896 = vst [vmem:[#allocation2_spill] sm:$0xff] %v5245_v24  ;;  %v2084_v12 = vsel %vm2074_vm8, %v2081_v38, %v2083_v29  ;;  %v5258_v60 = vshll.u32 %v2049_v36, 8  ;;  %v2172_v5 = vshrl.u32 %v6865_v42, %v5230_v48  ;;  %v2163_v25 = vshrl.u32 %v6859_v51, %v5230_v48 }
 0x236   : > { %v2166_v26 = vshrl.u32 %v6863_v33, %v5230_v48  ;;  %v2169_v39 = vshrl.u32 %v6857_v47, %v5230_v48  ;;  %v2171_v32 = vshll.u32 %v6857_v47, %v2159_v62  ;;  %v2088_v58 = vsel %vm2074_vm8, %v2085_v49, %v2087_v52 }
 0x237   : > { %v5271_v19 = vshrl.u32 %v2157_v22, 5  ;;  %v2162_v36 = vshll.u32 %v6871_v55, %v2159_v62  ;;  %v2175_v9 = vshrl.u32 %v6861_v46, %v5230_v48  ;;  %v2165_v27 = vshll.u32 %v6859_v51, %v2159_v62 }
 0x238   : > { %v2168_v0 = vshll.u32 %v6863_v33, %v2159_v62  ;;  %v2173_v38 = vor.u32 %v2172_v5, %v2171_v32  ;;  %v2174_v29 = vshll.u32 %v6865_v42, %v2159_v62  ;;  %v2000_v16 = vshll.u32 %v5254_v23, 30 }
 0x239   : > { %v5281_v35 = vmul.u32.u64.low %v5258_v60, %v2084_v12  ;;  %v5282_v47 = vmul.u32.u64.high %v5258_v60, %v2084_v12, %v5281_v35  ;;  %v2152_v22 = vand.u32 8388607, %v6867_v50  ;;  %v5287_v49 = vor.u32 %v2163_v25, %v2162_v36 }
 0x23a   : > { %v5289_v52 = vor.u32 %v2166_v26, %v2165_v27  ;;  %v2170_v51 = vor.u32 %v2169_v39, %v2168_v0  ;;  %v2176_v46 = vor.u32 %v2175_v9, %v2174_v29  ;;  %v1806_v33 = vadd.s32 127, %v1805_v11 }
 0x23b   : > { %v5292_v5 = vmul.u32.u64.low %v5258_v60, %v2088_v58  ;;  %v5293_v62 = vmul.u32.u64.high %v5258_v60, %v2088_v58, %v5292_v5  ;;  %vm2180_vm9 = vcmp.lt.s32.totalorder %v5271_v19, 4  ;;  %v1704_v32 = vor.u32 4788187, %v1703_v6 }
 0x23c   : > { %v3772_v12 = vadd.s32 4294967294, %v1901_v40  ;;  %v2186_v42 = vsel %vm2180_vm9, %v2173_v38, 920167782  ;;  %v2252_v50 = vand.u32 2139095040, %v5245_v24  ;;  %v5300_v25 = vsub.s32 %v5203_v8, %v2000_v16 }
 0x23d   : > { %v2078_v26 = vsel %vm2076_vm5, %v2066_v2, 2102212464  ;;  %vm2177_vm10 = vcmp.lt.s32.totalorder %v5271_v19, 1  ;;  %vm2179_vm11 = vcmp.lt.s32.totalorder %v5271_v19, 3  ;;  %v2153_v11 = vor.u32 8388608, %v2152_v22 }
 0x23e   : > { %v2185_v6 = vsel %vm2177_vm10, %v5287_v49, %v5289_v52  ;;  %v2187_v40 = vsel %vm2179_vm11, %v2170_v51, %v2186_v42  ;;  %v2190_v16 = vsel %vm2180_vm9, %v2176_v46, 1326507024  ;;  %v1801_v8 = vsub.s32 32, %v5220_v3 }
 0x23f   : > { %v1807_v39 = vshll.u32 %v1806_v33, 23  ;;  %v2057_v2 = vshrl.u32 %v6871_v55, %v5174_v14  ;;  %v2189_v58 = vsel %vm2177_vm10, %v5289_v52, %v2170_v51  ;;  %vm3773_vm12 = vcmp.lt.s32.totalorder %v3772_v12, 0 }
 0x240   : > { %vm2178_vm13 = vcmp.lt.s32.totalorder %v5271_v19, 2  ;;  %v2191_v36 = vsel %vm2179_vm11, %v2173_v38, %v2190_v16  ;;  %v2253_v42 = vshrl.u32 %v2252_v50, 23  ;;  %v2003_v9 = vsub.s32 0, %v5300_v25 }
 0x241   : > { %v2077_v46 = vsel %vm2073_vm6, %v2057_v2, %v5209_v18  ;;  %v2079_v33 = vsel %vm2075_vm7, %v5211_v63, %v2078_v26  ;;  %v2188_v14 = vsel %vm2178_vm13, %v2185_v6, %v2187_v40  ;;  %v2099_v27 = vadd.s32 1, %v5282_v47 }
 0x242   : > { %v2192_v0 = vsel %vm2178_vm13, %v2189_v58, %v2191_v36  ;;  %v5335_v38 = vshll.u32 %v2153_v11, 8  ;;  %v3786_v50 = vadd.s32 4294967169, %v2253_v42  ;;  %v1705_v29 = vand.u32 2147483647, %v1704_v32 }
 0x243   : > { %v1802_v22 = vshll.u32 %v5137_v54, %v5220_v3  ;;  %v1803_v18 = vshrl.u32 %v5236_v37, %v1801_v8  ;;  %vm2098_vm14 = vc.u32 %v5293_v62, %v5281_v35  ;;  %v1808_v63 = vor.u32 4788187, %v1807_v39 }
 0x244   : > { %v2080_v5 = vsel %vm2074_vm8, %v2077_v46, %v2079_v33  ;;  %v5345_v26 = vmul.u32.u64.low %v5335_v38, %v2188_v14  ;;  %v5346_v6 = vmul.u32.u64.high %v5335_v38, %v2188_v14, %v5345_v26  ;;  %v5350_v11 = vsel %vm3773_vm12, 0, %v3772_v12 }
 0x245   : > { %v5353_v32 = vmul.u32.u64.low %v5335_v38, %v2192_v0  ;;  %v5354_v54 = vmul.u32.u64.high %v5335_v38, %v2192_v0, %v5353_v32  ;;  %v2259_v3 = vadd.s32 1, %v3786_v50  ;;  %v1607_v37 = vsub.s32 4, %v4950_v57 }
 0x246   : > { %v1707_v40 = vcvt.s32.f32 %v5232_v59  ;;  %v3775_v4 = vmin.u32 %v2003_v9, %v5300_v25  ;;  %v2100_v16 = vsel %vm2098_vm14, %v2099_v27, %v5282_v47  ;;  %v1605_v8 = vxor.u32 2147483648, %v5214_v13 }
 0x247   : > { %v1804_v39 = vor.u32 %v1803_v18, %v1802_v22  ;;  %v2096_v2 = vmul.u32 %v5258_v60, %v2080_v5  ;;  %vm1523_vm15 = vcmp.lt.s32.totalorder %v4781_v21, 0  ;;  %v1909_v58 = vsub.s32 4294967266, %v5350_v11 }
 0x248   : > { %v1708_v12 = vmul.f32 %v1707_v40, %v1705_v29  ;;  %v2182_v36 = vsel %vm2180_vm9, %v2170_v51, 2102212464  ;;  %v1809_v42 = vand.u32 2147483647, %v1808_v63  ;;  %v2161_v59 = vshrl.u32 %v6871_v55, %v5230_v48 }
 0x249   : > { %v5366_v46 = vadd.s32 %v2100_v16, %v2096_v2  ;;  %vm2260_vm0 = vcmp.gt.s32.totalorder %v2259_v3, 0  ;;  %vm5372_vm1 = vcmp.le.f32.partialorder %v1521_v45, 0.7853982  ;;  %v1608_v60 = vsel %vm1523_vm15, %v1607_v37, %v4950_v57 }
 0x24a   : > { %v1711_v9 = vsub.s32 4, %v5053_v44  ;;  %v2005_v33 = vclz %v3775_v4  ;;  %v1606_v51 = vsel %vm1523_vm15, %v1605_v8, %v5214_v13  ;;  %v1811_v14 = vcvt.s32.f32 %v1804_v39 }
 0x24b   : > { %v2181_v27 = vsel %vm2177_vm10, %v2161_v59, %v5287_v49  ;;  %v2183_v48 = vsel %vm2179_vm11, %v5289_v52, %v2182_v36  ;;  %v1709_v45 = vxor.u32 2147483648, %v1708_v12  ;;  %v1910_v0 = vadd.s32 127, %v1909_v58 }
 0x24c   : > { %v2203_v50 = vadd.s32 1, %v5346_v6  ;;  %v2261_v29 = vsel %vm2260_vm0, %v2259_v3, 0  ;;  %v1610_v57 = vsel %vm5372_vm1, 0, %v1608_v60  ;;  %v1812_v22 = vmul.f32 %v1811_v14, %v1809_v42 }
 0x24d   : > { %v2102_v13 = vadd.s32 536870912, %v5366_v46  ;;  %vm2202_vm2 = vc.u32 %v5354_v54, %v5345_v26  ;;  %vm5393_vm3 = vcmp.le.f32.partialorder %v1625_v20, 0.7853982  ;;  %vm1627_vm4 = vcmp.lt.s32.totalorder %v4787_v30, 0 }
 0x24e   : > { %v3776_v52 = vadd.s32 4294967294, %v2005_v33  ;;  %v2184_v18 = vsel %vm2178_vm13, %v2181_v27, %v2183_v48  ;;  %v1609_v63 = vsel %vm5372_vm1, %v4781_v21, %v1606_v51  ;;  %v1712_v5 = vsel %vm1627_vm4, %v1711_v9, %v5053_v44 }
 0x24f   : > { %v1905_v32 = vsub.s32 32, %v5350_v11  ;;  %v2263_v3 = vand.u32 31, %v2261_v29  ;;  %v1614_v37 = vadd.s32 3, %v1610_v57  ;;  %v1710_v20 = vsel %vm1627_vm4, %v1709_v45, %v1708_v12 }
 0x250   : > { %v1911_v40 = vshll.u32 %v1910_v0, 23  ;;  %v2204_v4 = vsel %vm2202_vm2, %v2203_v50, %v5346_v6  ;;  %v1813_v16 = vxor.u32 2147483648, %v1812_v22  ;;  %v1889_v8 = vadd.s32 %v5067_v1, %v5065_v53  ;;  %v1482_v50 = vpop.f32.mrf.mxu0 }
 0x251   : > { %v5408_v19 = vshrl.u32 %v2102_v13, 30  ;;  %v2200_v39 = vmul.u32 %v5335_v38, %v2184_v18  ;;  %4073 = vcosq.f32 %v1609_v63  ;;  %v1714_v44 = vsel %vm5393_vm3, 0, %v1712_v5 }
 0x252   : > { %v1815_v2 = vsub.s32 4, %v5109_v17  ;;  %vm3777_vm5 = vcmp.lt.s32.totalorder %v3776_v52, 0  ;;  %v1713_v12 = vsel %vm5393_vm3, %v4787_v30, %v1710_v20  ;;  %v1907_v6 = vshrl.u32 %v1889_v8, %v1905_v32 }
 0x253   : > { %v5417_v58 = vadd.s32 %v2204_v4, %v2200_v39  ;;  %v5419_v36 = vsub.s32 32, %v2263_v3  ;;  %4075 = vsinq.f32 %v1609_v63  ;;  %vm5423_vm6 = vcmp.le.f32.partialorder %v1729_v7, 0.7853982 }
 0x254   : > { %vm1731_vm7 = vcmp.lt.s32.totalorder %v4795_v41, 0  ;;  %v1912_v1 = vor.u32 4788187, %v1911_v40  ;;  %v1906_v42 = vshll.u32 %v5176_v28, %v5350_v11  ;;  %v5430_v59 = vsel %vm3777_vm5, 0, %v3776_v52 }
 0x255   : > { %v1814_v38 = vsel %vm1731_vm7, %v1813_v16, %v1812_v22  ;;  %v2104_v47 = vshll.u32 %v5408_v19, 30  ;;  %v5433_v60 = vand.u32 3, %v1614_v37  ;;  %4077 = vcosq.f32 %v1713_v12 }
 0x256   : > { %v5435_v9 = vadd.s32 3, %v1714_v44  ;;  %v5438_v7 = vsel %vm1731_vm7, %v1815_v2, %v5109_v17  ;;  %4079 = vsinq.f32 %v1713_v12  ;;  %v1908_v33 = vor.u32 %v1907_v6, %v1906_v42  ;;  %v1320_v17 = vld [vmem:[%s6843_s5 + $0x40] sm:$0xff] }
 0x257   : > { %v2206_v51 = vadd.s32 536870912, %v5417_v58  ;;  %v6903_v14 = vmov 920167782   ;;  %v1817_v28 = vsel %vm5423_vm6, %v4795_v41, %v1814_v38  ;;  %v1913_v11 = vand.u32 2147483647, %v1912_v1 }
 0x258   : > { %v2276_v27 = vshrl.u32 %v6903_v14, %v5419_v36  ;;  %v2013_v48 = vsub.s32 4294967266, %v5430_v59  ;;  %v6904_v45 = vmov 1326507024   ;;  %v5453_v57 = vsub.s32 %v5366_v46, %v2104_v47 }
 0x259   : > { %v2279_v0 = vshrl.u32 %v6904_v45, %v5419_v36  ;;  %v6870_v22 = vand.u32 2147483647, %v5245_v24  ;;  %v5456_v13 = vshrl.u32 %v2261_v29, 5  ;;  %v6905_v49 = vmov 2102212464  }
 0x25a   : > { %v2275_v52 = vshll.u32 %v6905_v49, %v2263_v3  ;;  %v6906_v18 = vmov 2475754826   ;;  %v6907_v5 = vmov 2131351028   ;;  %v2273_v37 = vshrl.u32 %v6905_v49, %v5419_v36 }
 0x25b   : > { %v2267_v63 = vshrl.u32 %v6906_v18, %v5419_v36  ;;  %v2270_v32 = vshrl.u32 %v6907_v5, %v5419_v36  ;;  %v2278_v20 = vshll.u32 %v6903_v14, %v2263_v3  ;;  %v1915_v40 = vcvt.s32.f32 %v1908_v33 }
 0x25c   : > { %v5466_v46 = vshrl.u32 %v2206_v51, 30  ;;  %v2277_v4 = vor.u32 %v2276_v27, %v2275_v52  ;;  %v5468_v16 = vadd.f32 %v1482_v50, %v1320_v17  ;;  %vm1835_vm8 = vcmp.lt.s32.totalorder %v4838_v15, 0 }
 0x25d   : > { %v2266_v29 = vshll.u32 %v6871_v55, %v2263_v3  ;;  %v2269_v8 = vshll.u32 %v6906_v18, %v2263_v3  ;;  %v2272_v39 = vshll.u32 %v6907_v5, %v2263_v3  ;;  %v2280_v44 = vor.u32 %v2279_v0, %v2278_v20 }
 0x25e   : > { %v1916_v2 = vmul.f32 %v1915_v40, %v1913_v11  ;;  %v2014_v12 = vadd.s32 127, %v2013_v48  ;;  %v2107_v6 = vsub.s32 0, %v5453_v57  ;;  %v2256_v1 = vand.u32 8388607, %v6870_v22  ;;  %v5482_v33 = vpop.eup %4073 }
 0x25f   : > { %v5477_v38 = vor.u32 %v2267_v63, %v2266_v29  ;;  %v5479_v42 = vor.u32 %v2270_v32, %v2269_v8  ;;  %v2274_v47 = vor.u32 %v2273_v37, %v2272_v39  ;;  %vm2284_vm9 = vcmp.lt.s32.totalorder %v5456_v13, 4 }
 0x260   : > { %4081 = vcosq.f32 %v1817_v28  ;;  %v2208_v3 = vshll.u32 %v5466_v46, 30  ;;  %v2290_v51 = vsel %vm2284_vm9, %v2277_v4, 920167782  ;;  %v2356_v27 = vand.u32 2139095040, %v5468_v16  ;;  %v4076_v17 = vpop.eup %4075 }
 0x261   : > { %4083 = vsinq.f32 %v1817_v28  ;;  %v1993_v11 = vadd.s32 %v5155_v56, %v5160_v43  ;;  %v2009_v48 = vsub.s32 32, %v5430_v59  ;;  %v2294_v0 = vsel %vm2284_vm9, %v2280_v44, 1326507024 }
 0x262   : > { %v1917_v50 = vxor.u32 2147483648, %v1916_v2  ;;  %v2015_v52 = vshll.u32 %v2014_v12, 23  ;;  %vm2281_vm10 = vcmp.lt.s32.totalorder %v5456_v13, 1  ;;  %vm2283_vm11 = vcmp.lt.s32.totalorder %v5456_v13, 3  ;;  %v5502_v28 = vpop.eup %4077 }
 0x263   : > { %v3779_v63 = vmin.u32 %v2107_v6, %v5453_v57  ;;  %v2257_v32 = vor.u32 8388608, %v2256_v1  ;;  %v2289_v56 = vsel %vm2281_vm10, %v5477_v38, %v5479_v42  ;;  %v2291_v43 = vsel %vm2283_vm11, %v2274_v47, %v2290_v51  ;;  %v4080_v8 = vpop.eup %4079 }
 0x264   : > { %v5505_v37 = vsub.s32 %v5417_v58, %v2208_v3  ;;  %v2293_v20 = vsel %vm2281_vm10, %v5479_v42, %v2274_v47  ;;  %v2295_v40 = vsel %vm2283_vm11, %v2277_v4, %v2294_v0  ;;  %v2357_v29 = vshrl.u32 %v2356_v27, 23 }
 0x265   : > { %v1818_v39 = vsel %vm5423_vm6, 0, %v5438_v7  ;;  %v6908_v44 = vand.u32 2147483647, %v4838_v15  ;;  %v2011_v58 = vshrl.u32 %v1993_v11, %v2009_v48  ;;  %vm2282_vm13 = vcmp.lt.s32.totalorder %v5456_v13, 2 }
 0x266   : > { %v5523_v6 = vand.u32 3, %v5435_v9  ;;  %v1918_v4 = vsel %vm1835_vm8, %v1917_v50, %v1916_v2  ;;  %v2010_v1 = vshll.u32 %v5300_v25, %v5430_v59  ;;  %v2292_v53 = vsel %vm2282_vm13, %v2289_v56, %v2291_v43 }
 0x267   : > { %vm5517_vm12 = vcmp.le.f32.partialorder %v6908_v44, 0.7853982  ;;  %v2016_v7 = vor.u32 4788187, %v2015_v52  ;;  %v2109_v3 = vclz %v3779_v63  ;;  %v2296_v51 = vsel %vm2282_vm13, %v2293_v20, %v2295_v40 }
 0x268   : > { %v5533_v27 = vshll.u32 %v2257_v32, 8  ;;  %vm1617_vm14 = vcmp.eq.s32.totalorder %v5433_v60, 0  ;;  %v1822_v9 = vadd.s32 3, %v1818_v39  ;;  %v2211_v11 = vsub.s32 0, %v5505_v37 }
 0x269   : > { %v3790_v48 = vadd.s32 4294967169, %v2357_v29  ;;  %vm1620_vm15 = vcmp.eq.s32.totalorder %v5433_v60, 2  ;;  %v2012_v2 = vor.u32 %v2011_v58, %v2010_v1  ;;  %vm1721_vm0 = vcmp.eq.s32.totalorder %v5523_v6, 0 }
 0x26a   : > { %v5539_v25 = vmul.u32.u64.low %v5533_v27, %v2292_v53  ;;  %v5540_v59 = vmul.u32.u64.high %v5533_v27, %v2292_v53, %v5539_v25  ;;  %v5547_v0 = vsel %vm5517_vm12, %v4838_v15, %v1918_v4  ;;  %vm1616_vm1 = vcmp.lt.s32.totalorder %v5433_v60, 2  ;;  %v1484_v60 = vpop.f32.mrf.mxu0 }
 0x26b   : > { %v5550_v50 = vmul.u32.u64.low %v5533_v27, %v2296_v51  ;;  %v5551_v52 = vmul.u32.u64.high %v5533_v27, %v2296_v51, %v5550_v50  ;;  %v1618_v63 = vxor.u32 2147483648, %v4076_v17  ;;  %v1621_v32 = vxor.u32 2147483648, %v5482_v33 }
 0x26c   : > { %v2017_v56 = vand.u32 2147483647, %v2016_v7  ;;  %v3780_v43 = vadd.s32 4294967294, %v2109_v3  ;;  %vm1720_vm2 = vcmp.lt.s32.totalorder %v5523_v6, 2  ;;  %v1725_v20 = vxor.u32 2147483648, %v5502_v28 }
 0x26d   : > { %v5557_v40 = vand.u32 3, %v1822_v9  ;;  %v3783_v29 = vmin.u32 %v2211_v11, %v5505_v37  ;;  %v2363_v39 = vadd.s32 1, %v3790_v48  ;;  %v4082_v44 = vpop.eup %4081  ;;  %v1919_v58 = vsub.s32 4, %v5153_v61 }
 0x26e   : > { %4085 = vcosq.f32 %v5547_v0  ;;  %v2019_v4 = vcvt.s32.f32 %v2012_v2  ;;  %v2286_v1 = vsel %vm2284_vm9, %v2274_v47, 2102212464  ;;  %v4084_v53 = vpop.eup %4083  ;;  %vm1613_vm3 = vweird.f32 %v4781_v21 }
 0x26f   : > { %v1722_v7 = vxor.u32 2147483648, %v4080_v8  ;;  %vm1724_vm4 = vcmp.eq.s32.totalorder %v5523_v6, 2  ;;  %v2265_v3 = vshrl.u32 %v6871_v55, %v5419_v36  ;;  %v1619_v51 = vsel %vm1617_vm14, %v5482_v33, %v1618_v63 }
 0x270   : > { %v1622_v9 = vsel %vm1620_vm15, %v1621_v32, %v4076_v17  ;;  %vm1717_vm6 = vweird.f32 %v4787_v30  ;;  %v2020_v47 = vmul.f32 %v2019_v4, %v2017_v56  ;;  %vm3781_vm7 = vcmp.lt.s32.totalorder %v3780_v43, 0 }
 0x271   : > { %vm1824_vm9 = vcmp.lt.s32.totalorder %v5557_v40, 2  ;;  %v2213_v11 = vclz %v3783_v29  ;;  %v2285_v48 = vsel %vm2281_vm10, %v2265_v3, %v5477_v38  ;;  %v2287_v36 = vsel %vm2283_vm11, %v5479_v42, %v2286_v1 }
 0x272   : > { %vm2364_vm5 = vcmp.gt.s32.totalorder %v2363_v39, 0  ;;  %v1726_v33 = vsel %vm1724_vm4, %v1725_v20, %v4080_v8  ;;  %v1829_v2 = vxor.u32 2147483648, %v4082_v44  ;;  %v1920_v17 = vsel %vm1835_vm8, %v1919_v58, %v5153_v61  ;;  %v1209_v61 = vpop.f32.mrf.mxu1 }
 0x273   : > { %v2307_v50 = vadd.s32 1, %v5540_v59  ;;  %v1723_v63 = vsel %vm1721_vm0, %v5502_v28, %v1722_v7  ;;  %v1826_v32 = vxor.u32 2147483648, %v4084_v53  ;;  %v2023_v38 = vsub.s32 4, %v5254_v23 }
 0x274   : > { %vm2306_vm10 = vc.u32 %v5551_v52, %v5539_v25  ;;  %v2021_v42 = vxor.u32 2147483648, %v2020_v47  ;;  %v5592_v56 = vsel %vm3781_vm7, 0, %v3780_v43  ;;  %v2288_v8 = vsel %vm2282_vm13, %v2285_v48, %v2287_v36  ;;  %v1322_v48 = vld [vmem:[%s6843_s5 + $0x50] sm:$0xff] }
 0x275   : > { %v2365_v20 = vsel %vm2364_vm5, %v2363_v39, 0  ;;  %v1623_v29 = vsel %vm1616_vm1, %v1619_v51, %v1622_v9  ;;  %vm1828_vm8 = vcmp.eq.s32.totalorder %v5557_v40, 2  ;;  %v1922_v28 = vsel %vm5517_vm12, 0, %v1920_v17  ;;  %v1321_v39 = vld [vmem:[%s6843_s5 + $0x48] sm:$0xff]  ;;  %v1211_v9 = vpop.f32.mrf.mxu1 }
 0x276   : > { %v3784_v58 = vadd.s32 4294967294, %v2213_v11  ;;  %v1727_v4 = vsel %vm1720_vm2, %v1723_v63, %v1726_v33  ;;  %vm1825_vm11 = vcmp.eq.s32.totalorder %v5557_v40, 0  ;;  %v1830_v43 = vsel %vm1828_vm8, %v1829_v2, %v4084_v53 }
 0x277   : > { %v2308_v13 = vsel %vm2306_vm10, %v2307_v50, %v5540_v59  ;;  %v1827_v1 = vsel %vm1825_vm11, %v4082_v44, %v1826_v32  ;;  %v2117_v7 = vsub.s32 4294967266, %v5592_v56  ;;  %v2304_v12 = vmul.u32 %v5533_v27, %v2288_v8  ;;  %v5649_v63 = vpop.f32.mrf.mxu1 }
 0x278   : > { %v2367_v3 = vand.u32 31, %v2365_v20  ;;  %v1624_v6 = vsel %vm1613_vm3, nan, %v1623_v29  ;;  %v1926_v51 = vadd.s32 3, %v1922_v28  ;;  %vm6911_vm12 = vcmp.lt.s32.totalorder %v4921_v34, 0 }
 0x279   : > { %v2022_v53 = vsel %vm6911_vm12, %v2021_v42, %v2020_v47  ;;  %vm6912_vm13 = vmmov %vm6911_vm12  ;;  %v1728_v44 = vsel %vm1717_vm6, nan, %v1727_v4  ;;  %vm3785_vm14 = vcmp.lt.s32.totalorder %v3784_v58, 0  ;;  %v5619_v11 = vadd.s32 %v2308_v13, %v2304_v12 }
 0x27a   : > { %v2024_v59 = vsel %vm6912_vm13, %v2023_v38, %v5254_v23  ;;  %v5621_v27 = vadd.f32 %v1484_v60, %v1321_v39  ;;  %vm1821_vm15 = vweird.f32 %v4795_v41  ;;  %v1831_v21 = vsel %vm1824_vm9, %v1827_v1, %v1830_v43  ;;  %v5670_v60 = vpop.f32.mrf.mxu1 }
 0x27b   : > { %v6914_v47 = vand.u32 2147483647, %v4921_v34  ;;  %v5632_v23 = vpop.eup %4085  ;;  %v2118_v33 = vadd.s32 127, %v2117_v7  ;;  %v5639_v41 = vsub.s32 32, %v2367_v3  ;;  %v5641_v40 = vmul.f32 %v1624_v6, %v1209_v61 }
 0x27c   : > { %6913 = vst [vmem:[#allocation3_spill] sm:$0xff] %v5621_v27  ;;  %v5643_v2 = vmul.f32 %v1728_v44, %v1211_v9  ;;  %v5645_v17 = vand.u32 3, %v1926_v51  ;;  %v5647_v50 = vsel %vm3785_vm14, 0, %v3784_v58  ;;  %v5651_v32 = vsel %vm1821_vm15, nan, %v1831_v21 }
 0x27d   : > { %vm5628_vm0 = vcmp.le.f32.partialorder %v6914_v47, 0.7853982  ;;  %4087 = vsinq.f32 %v5547_v0  ;;  %v2310_v38 = vadd.s32 536870912, %v5619_v11  ;;  %v2460_v42 = vand.u32 2139095040, %v5621_v27 }
 0x27e   : > { %v2025_v30 = vsel %vm5628_vm0, %v4921_v34, %v2022_v53  ;;  %v2026_v36 = vsel %vm5628_vm0, 0, %v2024_v59  ;;  %6917 = vst [vmem:[#allocation4_spill] sm:$0xff] %v5643_v2  ;;  %v1933_v8 = vxor.u32 2147483648, %v5632_v23  ;;  %v2097_v29 = vadd.s32 %v5281_v35, %v5293_v62 }
 0x27f   : > { %4089 = vcosq.f32 %v2025_v30  ;;  %v5657_v61 = vadd.s32 3, %v2026_v36  ;;  %v2113_v28 = vsub.s32 32, %v5592_v56  ;;  %v2119_v58 = vshll.u32 %v2118_v33, 23  ;;  %v5690_v36 = vpop.f32.mrf.mxu1 }
 0x280   : > { %v2221_v4 = vsub.s32 4294967266, %v5647_v50  ;;  %v2380_v0 = vshrl.u32 %v6903_v14, %v5639_v41  ;;  %4091 = vsinq.f32 %v2025_v30  ;;  %v2114_v43 = vshll.u32 %v5453_v57, %v5592_v56  ;;  %v1488_v30 = vpop.f32.mrf.mxu0 }
 0x281   : > { %v6869_v13 = vand.u32 2147483647, %v5468_v16  ;;  %v2383_v39 = vshrl.u32 %v6904_v45, %v5639_v41  ;;  %v5672_v35 = vshrl.u32 %v2310_v38, 30  ;;  %v5674_v62 = vshrl.u32 %v2365_v20, 5 }
 0x282   : > { %v2379_v1 = vshll.u32 %v6905_v49, %v2367_v3  ;;  %v2461_v7 = vshrl.u32 %v2460_v42, 23  ;;  %v2371_v12 = vshrl.u32 %v6906_v18, %v5639_v41  ;;  %v2374_v57 = vshrl.u32 %v6907_v5, %v5639_v41 }
 0x283   : > { %v2377_v56 = vshrl.u32 %v6905_v49, %v5639_v41  ;;  %v2382_v6 = vshll.u32 %v6903_v14, %v2367_v3  ;;  %v2115_v51 = vshrl.u32 %v2097_v29, %v2113_v28  ;;  %v2120_v53 = vor.u32 4788187, %v2119_v58 }
 0x284   : > { %v2222_v59 = vadd.s32 127, %v2221_v4  ;;  %v2381_v9 = vor.u32 %v2380_v0, %v2379_v1  ;;  %v2370_v20 = vshll.u32 %v6871_v55, %v2367_v3  ;;  %v2373_v44 = vshll.u32 %v6906_v18, %v2367_v3 }
 0x285   : > { %v2376_v21 = vshll.u32 %v6907_v5, %v2367_v3  ;;  %v2384_v47 = vor.u32 %v2383_v39, %v2382_v6  ;;  %v2217_v33 = vsub.s32 32, %v5647_v50  ;;  %v2312_v38 = vshll.u32 %v5672_v35, 30 }
 0x286   : > { %v2360_v42 = vand.u32 8388607, %v6869_v13  ;;  %v3794_v29 = vadd.s32 4294967169, %v2461_v7  ;;  %vm1932_vm1 = vcmp.eq.s32.totalorder %v5645_v17, 2  ;;  %vm2043_vm2 = vcmp.lt.s32.totalorder %v5078_v10, 0 }
 0x287   : > { %v5698_v3 = vor.u32 %v2371_v12, %v2370_v20  ;;  %v5700_v28 = vor.u32 %v2374_v57, %v2373_v44  ;;  %v5702_v58 = vor.u32 %v2377_v56, %v2376_v21  ;;  %vm2388_vm3 = vcmp.lt.s32.totalorder %v5674_v62, 4  ;;  %v5714_v56 = vpop.f32.mrf.mxu1 }
 0x288   : > { %v2116_v4 = vor.u32 %v2115_v51, %v2114_v43  ;;  %v2201_v0 = vadd.s32 %v5345_v26, %v5354_v54  ;;  %v2394_v39 = vsel %vm2388_vm3, %v2381_v9, 920167782  ;;  %v5709_v1 = vadd.f32 %v1488_v30, %v1322_v48  ;;  %6919 = vst [vmem:[#allocation6_spill] sm:$0xff] %v5714_v56  ;;  %v1323_v26 = vld [vmem:[%s6843_s5 + $0x58] sm:$0xff] }
 0x289   : > { %v2121_v7 = vand.u32 2147483647, %v2120_v53  ;;  %v2127_v6 = vsub.s32 4, %v5408_v19  ;;  %v2223_v12 = vshll.u32 %v2222_v59, 23  ;;  %v2398_v57 = vsel %vm2388_vm3, %v2384_v47, 1326507024 }
 0x28a   : > { %6918 = vst [vmem:[#allocation5_spill] sm:$0xff] %v5709_v1  ;;  %vm1929_vm4 = vcmp.eq.s32.totalorder %v5645_v17, 0  ;;  %v6920_v43 = vand.u32 2147483647, %v5078_v10  ;;  %v2219_v54 = vshrl.u32 %v2201_v0, %v2217_v33  ;;  %vm2385_vm6 = vcmp.lt.s32.totalorder %v5674_v62, 1  ;;  %v4088_v53 = vpop.eup %4087  ;;  %v5752_v0 = vpop.f32.mrf.mxu1 }
 0x28b   : > { %vm2387_vm7 = vcmp.lt.s32.totalorder %v5674_v62, 3  ;;  %v2467_v51 = vadd.s32 1, %v3794_v29  ;;  %v5726_v59 = vsub.s32 %v5619_v11, %v2312_v38  ;;  %v2361_v20 = vor.u32 8388608, %v2360_v42 }
 0x28c   : > { %vm5719_vm5 = vcmp.le.f32.partialorder %v6920_v43, 0.7853982  ;;  %v2393_v44 = vsel %vm2385_vm6, %v5698_v3, %v5700_v28  ;;  %v2395_v21 = vsel %vm2387_vm7, %v5702_v58, %v2394_v39  ;;  %v5735_v47 = vpop.eup %4089  ;;  %v2123_v48 = vcvt.s32.f32 %v2116_v4 }
 0x28d   : > { %v2397_v30 = vsel %vm2385_vm6, %v5700_v28, %v5702_v58  ;;  %v2399_v11 = vsel %vm2387_vm7, %v2381_v9, %v2398_v57  ;;  %v2564_v33 = vand.u32 2139095040, %v5709_v1  ;;  %v3187_v38 = vmul.f32 %v5651_v32, %v5649_v63  ;;  %v5750_v4 = vpop.eup %4091 }
 0x28e   : > { %vm1928_vm9 = vcmp.lt.s32.totalorder %v5645_v17, 2  ;;  %v2218_v42 = vshll.u32 %v5505_v37, %v5647_v50  ;;  %v2224_v29 = vor.u32 4788187, %v2223_v12  ;;  %vm2386_vm10 = vcmp.lt.s32.totalorder %v5674_v62, 2 }
 0x28f   : > { %v1930_v39 = vxor.u32 2147483648, %v4088_v53  ;;  %v2124_v43 = vmul.f32 %v2123_v48, %v2121_v7  ;;  %v2396_v9 = vsel %vm2386_vm10, %v2393_v44, %v2395_v21  ;;  %vm2468_vm8 = vcmp.gt.s32.totalorder %v2467_v51, 0 }
 0x290   : > { %v2220_v57 = vor.u32 %v2219_v54, %v2218_v42  ;;  %v2315_v63 = vsub.s32 0, %v5726_v59  ;;  %v2400_v32 = vsel %vm2386_vm10, %v2397_v30, %v2399_v11  ;;  %v5759_v37 = vshll.u32 %v2361_v20, 8  ;;  %v5777_v30 = vpop.f32.mrf.mxu1 }
 0x291   : > { %v1934_v50 = vsel %vm1932_vm1, %v1933_v8, %v4088_v53  ;;  %v5766_v12 = vand.u32 3, %v5657_v61  ;;  %v2128_v7 = vsel %vm2043_vm2, %v2127_v6, %v5408_v19  ;;  %v2565_v54 = vshrl.u32 %v2564_v33, 23  ;;  %6923 = vst [vmem:[#allocation7_spill] sm:$0xff] %v5777_v30 }
 0x292   : > { %vm1925_vm11 = vweird.f32 %v4838_v15  ;;  %v2225_v44 = vand.u32 2147483647, %v2224_v29  ;;  %v5773_v21 = vmul.u32.u64.low %v5759_v37, %v2396_v9  ;;  %v5774_v20 = vmul.u32.u64.high %v5759_v37, %v2396_v9, %v5773_v21 }
 0x293   : > { %v2469_v48 = vsel %vm2468_vm8, %v2467_v51, 0  ;;  %v2125_v8 = vxor.u32 2147483648, %v2124_v43  ;;  %v5780_v61 = vmul.u32.u64.low %v5759_v37, %v2400_v32  ;;  %v5781_v53 = vmul.u32.u64.high %v5759_v37, %v2400_v32, %v5780_v61 }
 0x294   : > { %v3798_v11 = vadd.s32 4294967169, %v2565_v54  ;;  %v1931_v19 = vsel %vm1929_vm4, %v5632_v23, %v1930_v39  ;;  %v2130_v6 = vsel %vm5719_vm5, 0, %v2128_v7  ;;  %v2227_v33 = vcvt.s32.f32 %v2220_v57  ;;  %v5798_v39 = vpop.f32.mrf.mxu1 }
 0x295   : > { %v3787_v42 = vmin.u32 %v2315_v63, %v5726_v59  ;;  %vm2147_vm12 = vcmp.lt.s32.totalorder %v5146_v31, 0  ;;  %v6868_v51 = vand.u32 2147483647, %v5621_v27  ;;  %v2471_v29 = vand.u32 31, %v2469_v48  ;;  %6925 = vst [vmem:[#allocation9_spill] sm:$0xff] %v5798_v39 }
 0x296   : > { %v2571_v9 = vadd.s32 1, %v3798_v11  ;;  %v5792_v32 = vadd.f32 %v3187_v38, %v5641_v40  ;;  %vm2033_vm13 = vcmp.eq.s32.totalorder %v5766_v12, 0  ;;  %v2228_v54 = vmul.f32 %v2227_v33, %v2225_v44  ;;  %v5824_v11 = vpop.f32.mrf.mxu1  ;;  %v1490_v33 = vpop.f32.mrf.mxu0 }
 0x297   : > { %v2390_v23 = vsel %vm2388_vm3, %v5702_v58, 2102212464  ;;  %v1935_v57 = vsel %vm1928_vm9, %v1931_v19, %v1934_v50  ;;  %v2126_v63 = vsel %vm2043_vm2, %v2125_v8, %v2124_v43  ;;  %v2134_v7 = vadd.s32 3, %v2130_v6  ;;  %6926 = vst [vmem:[#allocation10_spill] sm:$0xff] %v5824_v11 }
 0x298   : > { %6924 = vst [vmem:[#allocation8_spill] sm:$0xff] %v5792_v32  ;;  %v2369_v40 = vshrl.u32 %v6871_v55, %v5639_v41  ;;  %v2034_v38 = vxor.u32 2147483648, %v5750_v4  ;;  %v2037_v44 = vxor.u32 2147483648, %v5735_v47  ;;  %v2317_v61 = vclz %v3787_v42 }
 0x299   : > { %vm2572_vm14 = vcmp.gt.s32.totalorder %v2571_v9, 0  ;;  %v2391_v17 = vsel %vm2387_vm7, %v5700_v28, %v2390_v23  ;;  %v2464_v43 = vand.u32 8388607, %v6868_v51  ;;  %v5816_v50 = vsub.s32 32, %v2471_v29 }
 0x29a   : > { %v2389_v58 = vsel %vm2385_vm6, %v2369_v40, %v5698_v3  ;;  %vm2032_vm15 = vcmp.lt.s32.totalorder %v5766_v12, 2  ;;  %vm2036_vm0 = vcmp.eq.s32.totalorder %v5766_v12, 2  ;;  %v2129_v41 = vsel %vm5719_vm5, %v5078_v10, %v2126_v63 }
 0x29b   : > { %v2229_v8 = vxor.u32 2147483648, %v2228_v54  ;;  %v2411_v3 = vadd.s32 1, %v5774_v20  ;;  %v5828_v28 = vsel %vm1925_vm11, nan, %v1935_v57  ;;  %v5830_v19 = vand.u32 3, %v2134_v7 }
 0x29c   : > { %vm2410_vm1 = vc.u32 %v5781_v53, %v5773_v21  ;;  %v2573_v6 = vsel %vm2572_vm14, %v2571_v9, 0  ;;  %v2035_v42 = vsel %vm2033_vm13, %v5735_v47, %v2034_v38  ;;  %v2038_v23 = vsel %vm2036_vm0, %v2037_v44, %v5750_v4 }
 0x29d   : > { %v6927_v15 = vand.u32 2147483647, %v5146_v31  ;;  %v3788_v63 = vadd.s32 4294967294, %v2317_v61  ;;  %v2392_v9 = vsel %vm2386_vm10, %v2389_v58, %v2391_v17  ;;  %4093 = vcosq.f32 %v2129_v41 }
 0x29e   : > { %v2231_v7 = vsub.s32 4, %v5466_v46  ;;  %v2465_v40 = vor.u32 8388608, %v2464_v43  ;;  %v2484_v51 = vshrl.u32 %v6903_v14, %v5816_v50  ;;  %v2230_v47 = vsel %vm2147_vm12, %v2229_v8, %v2228_v54 }
 0x29f   : > { %vm5843_vm2 = vcmp.le.f32.partialorder %v6927_v15, 0.7853982  ;;  %v2412_v4 = vsel %vm2410_vm1, %v2411_v3, %v5774_v20  ;;  %v2575_v38 = vand.u32 31, %v2573_v6  ;;  %v5855_v44 = vadd.f32 %v1490_v33, %v1323_v26  ;;  %v5857_v15 = vpop.f32.mrf.mxu1 }
 0x2a0   : > { %6931 = vst [vmem:[#allocation12_spill] sm:$0xff] %v5857_v15  ;;  %v2408_v62 = vmul.u32 %v5759_v37, %v2392_v9  ;;  %v2475_v61 = vshrl.u32 %v6906_v18, %v5816_v50  ;;  %v2478_v58 = vshrl.u32 %v6907_v5, %v5816_v50  ;;  %v2483_v17 = vshll.u32 %v6905_v49, %v2471_v29 }
 0x2a1   : > { %6930 = vst [vmem:[#allocation11_spill] sm:$0xff] %v5855_v44  ;;  %vm3789_vm3 = vcmp.lt.s32.totalorder %v3788_v63, 0  ;;  %v5865_v43 = vshrl.u32 %v2469_v48, 5  ;;  %v2481_v20 = vshrl.u32 %v6905_v49, %v5816_v50  ;;  %v2487_v54 = vshrl.u32 %v6904_v45, %v5816_v50  ;;  %v5880_v22 = vpop.f32.mrf.mxu1 }
 0x2a2   : > { %v5871_v8 = vadd.s32 %v2412_v4, %v2408_v62  ;;  %v2474_v37 = vshll.u32 %v6871_v55, %v2471_v29  ;;  %v2477_v3 = vshll.u32 %v6906_v18, %v2471_v29  ;;  %v2485_v26 = vor.u32 %v2484_v51, %v2483_v17  ;;  %6932 = vst [vmem:[#allocation13_spill] sm:$0xff] %v5880_v22 }
 0x2a3   : > { %v2480_v33 = vshll.u32 %v6907_v5, %v2471_v29  ;;  %v2486_v9 = vshll.u32 %v6903_v14, %v2471_v29  ;;  %v5877_v13 = vsub.s32 32, %v2575_v38  ;;  %v2668_v48 = vand.u32 2139095040, %v5855_v44 }
 0x2a4   : > { %v2039_v11 = vsel %vm2032_vm15, %v2035_v42, %v2038_v23  ;;  %v5887_v4 = vsel %vm2147_vm12, %v2231_v7, %v5466_v46  ;;  %v5889_v62 = vor.u32 %v2475_v61, %v2474_v37  ;;  %v5891_v51 = vor.u32 %v2478_v58, %v2477_v3  ;;  %v5913_v58 = vpop.f32.mrf.mxu1 }
 0x2a5   : > { %4095 = vsinq.f32 %v2129_v41  ;;  %v5893_v29 = vor.u32 %v2481_v20, %v2480_v33  ;;  %v2488_v17 = vor.u32 %v2487_v54, %v2486_v9  ;;  %vm2492_vm4 = vcmp.lt.s32.totalorder %v5865_v43, 4  ;;  %6933 = vst [vmem:[#allocation14_spill] sm:$0xff] %v5913_v58 }
 0x2a6   : > { %vm2029_vm5 = vweird.f32 %v4921_v34  ;;  %v5900_v12 = vsel %vm5843_vm2, %v5146_v31, %v2230_v47  ;;  %v5903_v46 = vsel %vm3789_vm3, 0, %v3788_v63  ;;  %v2498_v42 = vsel %vm2492_vm4, %v2485_v26, 920167782  ;;  %v5943_v22 = vpop.f32.mrf.mxu1 }
 0x2a7   : > { %v5907_v23 = vshll.u32 %v2465_v40, 8  ;;  %v2414_v41 = vadd.s32 536870912, %v5871_v8  ;;  %vm2489_vm6 = vcmp.lt.s32.totalorder %v5865_v43, 1  ;;  %v2588_v7 = vshrl.u32 %v6903_v14, %v5877_v13  ;;  %6934 = vst [vmem:[#allocation15_spill] sm:$0xff] %v5943_v22 }
 0x2a8   : > { %v2669_v61 = vshrl.u32 %v2668_v48, 23  ;;  %vm2491_vm7 = vcmp.lt.s32.totalorder %v5865_v43, 3  ;;  %v2497_v63 = vsel %vm2489_vm6, %v5889_v62, %v5891_v51  ;;  %v2591_v47 = vshrl.u32 %v6904_v45, %v5877_v13 }
 0x2a9   : > { %v2499_v20 = vsel %vm2491_vm7, %v5893_v29, %v2498_v42  ;;  %v2502_v54 = vsel %vm2492_vm4, %v2488_v17, 1326507024  ;;  %v5928_v37 = vshrl.u32 %v2573_v6, 5  ;;  %v2587_v3 = vshll.u32 %v6905_v49, %v2575_v38 }
 0x2aa   : > { %v2579_v33 = vshrl.u32 %v6906_v18, %v5877_v13  ;;  %v2582_v9 = vshrl.u32 %v6907_v5, %v5877_v13  ;;  %v2585_v48 = vshrl.u32 %v6905_v49, %v5877_v13  ;;  %v2590_v40 = vshll.u32 %v6903_v14, %v2575_v38  ;;  %v5938_v55 = vpop.eup %4093 }
 0x2ab   : > { %v5940_v42 = vshrl.u32 %v2414_v41, 30  ;;  %vm2490_vm9 = vcmp.lt.s32.totalorder %v5865_v43, 2  ;;  %v2589_v6 = vor.u32 %v2588_v7, %v2587_v3  ;;  %v3802_v17 = vadd.s32 4294967169, %v2669_v61  ;;  %v1494_v43 = vpop.f32.mrf.mxu0 }
 0x2ac   : > { %v6935_v30 = vmov 683565275   ;;  %v2581_v56 = vshll.u32 %v6906_v18, %v2575_v38  ;;  %v2584_v58 = vshll.u32 %v6907_v5, %v2575_v38  ;;  %v2592_v15 = vor.u32 %v2591_v47, %v2590_v40 }
 0x2ad   : > { %v2578_v2 = vshll.u32 %v6935_v30, %v2575_v38  ;;  %v2500_v39 = vsel %vm2490_vm9, %v2497_v63, %v2499_v20  ;;  %v2501_v41 = vsel %vm2489_vm6, %v5891_v51, %v5893_v29  ;;  %v2503_v7 = vsel %vm2491_vm7, %v2485_v26, %v2502_v54  ;;  %v5973_v54 = vpop.f32.mrf.mxu1 }
 0x2ae   : > { %v6936_v61 = vand.u32 2147483647, %v5709_v1  ;;  %vm2140_vm10 = vcmp.eq.s32.totalorder %v5830_v19, 2  ;;  %v5961_v38 = vor.u32 %v2582_v9, %v2581_v56  ;;  %v5963_v40 = vor.u32 %v2585_v48, %v2584_v58  ;;  %6937 = vst [vmem:[#allocation16_spill] sm:$0xff] %v5973_v54 }
 0x2af   : > { %v5959_v22 = vor.u32 %v2579_v33, %v2578_v2  ;;  %vm2596_vm8 = vcmp.lt.s32.totalorder %v5928_v37, 4  ;;  %v2040_v63 = vsel %vm2029_vm5, nan, %v2039_v11  ;;  %v2234_v26 = vsel %vm5843_vm2, 0, %v5887_v4 }
 0x2b0   : > { %v2568_v3 = vand.u32 8388607, %v6936_v61  ;;  %v2602_v47 = vsel %vm2596_vm8, %v2589_v6, 920167782  ;;  %v2675_v20 = vadd.s32 1, %v3802_v17  ;;  %vm2137_vm11 = vcmp.eq.s32.totalorder %v5830_v19, 0 }
 0x2b1   : > { %4097 = vcosq.f32 %v5900_v12  ;;  %v5978_v2 = vmul.u32.u64.low %v5907_v23, %v2500_v39  ;;  %v5979_v56 = vmul.u32.u64.high %v5907_v23, %v2500_v39, %v5978_v2  ;;  %v2606_v34 = vsel %vm2596_vm8, %v2592_v15, 1326507024 }
 0x2b2   : > { %v2325_v11 = vsub.s32 4294967266, %v5903_v46  ;;  %v2504_v57 = vsel %vm2490_vm9, %v2501_v41, %v2503_v7  ;;  %vm2593_vm12 = vcmp.lt.s32.totalorder %v5928_v37, 1  ;;  %vm2595_vm13 = vcmp.lt.s32.totalorder %v5928_v37, 3  ;;  %v4096_v4 = vpop.eup %4095  ;;  %v6005_v41 = vpop.f32.mrf.mxu1 }
 0x2b3   : > { %vm2251_vm14 = vcmp.lt.s32.totalorder %v5245_v24, 0  ;;  %v2416_v58 = vshll.u32 %v5940_v42, 30  ;;  %v2569_v39 = vor.u32 8388608, %v2568_v3  ;;  %v2601_v15 = vsel %vm2593_vm12, %v5959_v22, %v5961_v38  ;;  %6938 = vst [vmem:[#allocation17_spill] sm:$0xff] %v6005_v41 }
 0x2b4   : > { %v2603_v33 = vsel %vm2595_vm13, %v5963_v40, %v2602_v47  ;;  %v2141_v9 = vxor.u32 2147483648, %v5938_v55  ;;  %v2605_v48 = vsel %vm2593_vm12, %v5961_v38, %v5963_v40  ;;  %v2607_v17 = vsel %vm2595_vm13, %v2589_v6, %v2606_v34 }
 0x2b5   : > { %vm2676_vm15 = vcmp.gt.s32.totalorder %v2675_v20, 0  ;;  %v2238_v7 = vadd.s32 3, %v2234_v26  ;;  %v6008_v61 = vmul.u32.u64.low %v5907_v23, %v2504_v57  ;;  %v6009_v3 = vmul.u32.u64.high %v5907_v23, %v2504_v57, %v6008_v61 }
 0x2b6   : > { %vm2594_vm0 = vcmp.lt.s32.totalorder %v5928_v37, 2  ;;  %v2138_v47 = vxor.u32 2147483648, %v4096_v4  ;;  %v6939_v54 = vand.u32 2147483647, %v5245_v24  ;;  %v2305_v6 = vadd.s32 %v5539_v25, %v5551_v52 }
 0x2b7   : > { %v2326_v34 = vadd.s32 127, %v2325_v11  ;;  %v2604_v26 = vsel %vm2594_vm0, %v2601_v15, %v2603_v33  ;;  %v6023_v41 = vsub.s32 %v5871_v8, %v2416_v58  ;;  %v2608_v57 = vsel %vm2594_vm0, %v2605_v48, %v2607_v17 }
 0x2b8   : > { %vm6014_vm1 = vcmp.le.f32.partialorder %v6939_v54, 0.7853982  ;;  %v6027_v61 = vshll.u32 %v2569_v39, 8  ;;  %v2677_v27 = vsel %vm2676_vm15, %v2675_v20, 0  ;;  %v6029_v54 = vpop.f32.mrf.mxu1  ;;  %v2142_v32 = vsel %vm2140_vm10, %v2141_v9, %v4096_v4 }
 0x2b9   : > { %6942 = vst [vmem:[#allocation18_spill] sm:$0xff] %v6029_v54  ;;  %4099 = vsinq.f32 %v5900_v12  ;;  %v2335_v25 = vsub.s32 4, %v5672_v35  ;;  %v2494_v52 = vsel %vm2492_vm4, %v5893_v29, 2102212464  ;;  %v2321_v8 = vsub.s32 32, %v5903_v46 }
 0x2ba   : > { %v2473_v11 = vshrl.u32 %v6935_v30, %v5816_v50  ;;  %v6042_v20 = vmul.u32.u64.low %v6027_v61, %v2604_v26  ;;  %v6043_v58 = vmul.u32.u64.high %v6027_v61, %v2604_v26, %v6042_v20  ;;  %v3323_v39 = vpop.f32.mrf.mxu1  ;;  %v2139_v12 = vsel %vm2137_vm11, %v5938_v55, %v2138_v47 }
 0x2bb   : > { %v6050_v4 = vmul.u32.u64.low %v6027_v61, %v2608_v57  ;;  %v6051_v15 = vmul.u32.u64.high %v6027_v61, %v2608_v57, %v6050_v4  ;;  %v2679_v29 = vand.u32 31, %v2677_v27  ;;  %v2327_v33 = vshll.u32 %v2326_v34, 23 }
 0x2bc   : > { %6943 = vst [vmem:[#allocation19_spill] sm:$0xff] %v6042_v20  ;;  %v2419_v9 = vsub.s32 0, %v6023_v41  ;;  %v2493_v50 = vsel %vm2489_vm6, %v2473_v11, %v5889_v62  ;;  %v2495_v48 = vsel %vm2491_vm7, %v5891_v51, %v2494_v52  ;;  %v6061_v17 = vmul.f32 %v2040_v63, %v5690_v36 }
 0x2bd   : > { %6944 = vst [vmem:[#allocation20_spill] sm:$0xff] %v6051_v15  ;;  %vm2136_vm2 = vcmp.lt.s32.totalorder %v5830_v19, 2  ;;  %v6067_v55 = vsel %vm2251_vm14, %v2335_v25, %v5672_v35  ;;  %v2515_v47 = vadd.s32 1, %v5979_v56  ;;  %v6070_v34 = vand.u32 3, %v2238_v7 }
 0x2be   : > { %v2323_v26 = vshrl.u32 %v2305_v6, %v2321_v8  ;;  %vm2514_vm3 = vc.u32 %v6009_v3, %v5978_v2  ;;  %v2598_v36 = vsel %vm2596_vm8, %v5963_v40, 2102212464  ;;  %v6077_v62 = vpop.eup %4097  ;;  %v6079_v19 = vsel %vm2136_vm2, %v2139_v12, %v2142_v32  ;;  %v1324_v32 = vld [vmem:[%s6843_s5 + $0x60] sm:$0xff] }
 0x2bf   : > { %v2496_v35 = vsel %vm2490_vm9, %v2493_v50, %v2495_v48  ;;  %v2577_v51 = vshrl.u32 %v6935_v30, %v5877_v13  ;;  %v6085_v63 = vsub.s32 32, %v2679_v29  ;;  %v2322_v7 = vshll.u32 %v5726_v59, %v5903_v46 }
 0x2c0   : > { %v2328_v6 = vor.u32 4788187, %v2327_v33  ;;  %v3791_v57 = vmin.u32 %v2419_v9, %v6023_v41  ;;  %v2516_v25 = vsel %vm2514_vm3, %v2515_v47, %v5979_v56  ;;  %v2599_v59 = vsel %vm2595_vm13, %v5961_v38, %v2598_v36 }
 0x2c1   : > { %v2597_v13 = vsel %vm2593_vm12, %v2577_v51, %v5959_v22  ;;  %v6877_v46 = vand.u32 2147483647, %v5855_v44  ;;  %v2245_v52 = vxor.u32 2147483648, %v6077_v62  ;;  %v2324_v8 = vor.u32 %v2323_v26, %v2322_v7 }
 0x2c2   : > { %v2512_v11 = vmul.u32 %v5907_v23, %v2496_v35  ;;  %v2619_v39 = vadd.s32 1, %v6043_v58  ;;  %vm2618_vm4 = vc.u32 %v6051_v15, %v6042_v20  ;;  %v2692_v56 = vshrl.u32 %v6903_v14, %v6085_v63 }
 0x2c3   : > { %v2695_v22 = vshrl.u32 %v6904_v45, %v6085_v63  ;;  %v6113_v12 = vadd.f32 %v1494_v43, %v1324_v32  ;;  %v2329_v38 = vand.u32 2147483647, %v2328_v6  ;;  %v2421_v4 = vclz %v3791_v57 }
 0x2c4   : > { %v6115_v33 = vadd.s32 %v2516_v25, %v2512_v11  ;;  %v2600_v23 = vsel %vm2594_vm0, %v2597_v13, %v2599_v59  ;;  %v6121_v9 = vand.u32 8388607, %v6877_v46  ;;  %v6123_v50 = vshrl.u32 %v2677_v27, 5  ;;  %v6142_v13 = vpop.f32.mrf.mxu1 }
 0x2c5   : > { %6945 = vst [vmem:[#allocation21_spill] sm:$0xff] %v6113_v12  ;;  %v2691_v48 = vshll.u32 %v6905_v49, %v2679_v29  ;;  %v2694_v47 = vshll.u32 %v6903_v14, %v2679_v29  ;;  %vm2241_vm5 = vcmp.eq.s32.totalorder %v6070_v34, 0  ;;  %vm2244_vm6 = vcmp.eq.s32.totalorder %v6070_v34, 2  ;;  %6946 = vst [vmem:[#allocation22_spill] sm:$0xff] %v6142_v13 }
 0x2c6   : > { %v4100_v26 = vpop.eup %4099  ;;  %v2620_v36 = vsel %vm2618_vm4, %v2619_v39, %v6043_v58  ;;  %v2683_v37 = vshrl.u32 %v6906_v18, %v6085_v63  ;;  %v2686_v35 = vshrl.u32 %v6907_v5, %v6085_v63  ;;  %v2689_v27 = vshrl.u32 %v6905_v49, %v6085_v63 }
 0x2c7   : > { %v2616_v51 = vmul.u32 %v6027_v61, %v2600_v23  ;;  %v2693_v7 = vor.u32 %v2692_v56, %v2691_v48  ;;  %v2696_v6 = vor.u32 %v2695_v22, %v2694_v47  ;;  %v2772_v57 = vand.u32 2139095040, %v6113_v12  ;;  %v1325_v56 = vld [vmem:[%s6843_s5 + $0x68] sm:$0xff]  ;;  %v1496_v22 = vpop.f32.mrf.mxu0 }
 0x2c8   : > { %v2518_v32 = vadd.s32 536870912, %v6115_v33  ;;  %v2682_v43 = vshll.u32 %v6935_v30, %v2679_v29  ;;  %v2685_v58 = vshll.u32 %v6906_v18, %v2679_v29  ;;  %v2688_v25 = vshll.u32 %v6907_v5, %v2679_v29  ;;  %v3875_v29 = vpop.f32.mrf.mxu1 }
 0x2c9   : > { %vm2240_vm7 = vcmp.lt.s32.totalorder %v6070_v34, 2  ;;  %v2242_v59 = vxor.u32 2147483648, %v4100_v26  ;;  %v2331_v11 = vcvt.s32.f32 %v2324_v8  ;;  %v6145_v39 = vadd.s32 %v2620_v36, %v2616_v51 }
 0x2ca   : > { %v2773_v61 = vshrl.u32 %v2772_v57, 23  ;;  %v2684_v23 = vor.u32 %v2683_v37, %v2682_v43  ;;  %v2687_v48 = vor.u32 %v2686_v35, %v2685_v58  ;;  %v2690_v47 = vor.u32 %v2689_v27, %v2688_v25 }
 0x2cb   : > { %vm2700_vm9 = vcmp.lt.s32.totalorder %v6123_v50, 4  ;;  %v3792_v46 = vadd.s32 4294967294, %v2421_v4  ;;  %v2332_v51 = vmul.f32 %v2331_v11, %v2329_v38  ;;  %v6155_v57 = vshrl.u32 %v2518_v32, 30 }
 0x2cc   : > { %v2706_v40 = vsel %vm2700_vm9, %v2693_v7, 920167782  ;;  %v2710_v8 = vsel %vm2700_vm9, %v2696_v6, 1326507024  ;;  %v3806_v36 = vadd.s32 4294967169, %v2773_v61  ;;  %v2673_v13 = vor.u32 8388608, %v6121_v9 }
 0x2cd   : > { %6947 = vst [vmem:[#allocation23_spill] sm:$0xff] %v6155_v57  ;;  %v6158_v44 = vadd.f32 %v1496_v22, %v1325_v56  ;;  %v2622_v37 = vadd.s32 536870912, %v6145_v39  ;;  %vm2697_vm10 = vcmp.lt.s32.totalorder %v6123_v50, 1  ;;  %vm2699_vm8 = vcmp.lt.s32.totalorder %v6123_v50, 3 }
 0x2ce   : > { %v2779_v4 = vadd.s32 1, %v3806_v36  ;;  %v2705_v35 = vsel %vm2697_vm10, %v2684_v23, %v2687_v48  ;;  %v2707_v27 = vsel %vm2699_vm8, %v2690_v47, %v2706_v40  ;;  %v2709_v38 = vsel %vm2697_vm10, %v2687_v48, %v2690_v47 }
 0x2cf   : > { %v2711_v9 = vsel %vm2699_vm8, %v2693_v7, %v2710_v8  ;;  %v2243_v6 = vsel %vm2241_vm5, %v6077_v62, %v2242_v59  ;;  %v2246_v32 = vsel %vm2244_vm6, %v2245_v52, %v4100_v26  ;;  %vm3793_vm11 = vcmp.lt.s32.totalorder %v3792_v46, 0 }
 0x2d0   : > { %vm2780_vm12 = vcmp.gt.s32.totalorder %v2779_v4, 0  ;;  %v2333_v43 = vxor.u32 2147483648, %v2332_v51  ;;  %v2520_v58 = vshll.u32 %v6155_v57, 30  ;;  %vm2698_vm13 = vcmp.lt.s32.totalorder %v6123_v50, 2 }
 0x2d1   : > { %v2781_v40 = vsel %vm2780_vm12, %v2779_v4, 0  ;;  %v2708_v25 = vsel %vm2698_vm13, %v2705_v35, %v2707_v27  ;;  %v2712_v7 = vsel %vm2698_vm13, %v2709_v38, %v2711_v9  ;;  %v2876_v62 = vand.u32 2139095040, %v6158_v44 }
 0x2d2   : > { %v2783_v11 = vand.u32 31, %v2781_v40  ;;  %v6185_v52 = vsel %vm2240_vm7, %v2243_v6, %v2246_v32  ;;  %v6187_v26 = vsel %vm3793_vm11, 0, %v3792_v46  ;;  %v6189_v59 = vshrl.u32 %v2622_v37, 30 }
 0x2d3   : > { %v6191_v61 = vshll.u32 %v2673_v13, 8  ;;  %v2681_v56 = vshrl.u32 %v6935_v30, %v6085_v63  ;;  %v2702_v22 = vsel %vm2700_vm9, %v2690_v47, 2102212464  ;;  %v6886_v29 = vand.u32 2147483647, %v6113_v12 }
 0x2d4   : > { %6948 = vst [vmem:[#allocation24_spill] sm:$0xff] %v6189_v59  ;;  %v2784_v8 = vsub.s32 32, %v2783_v11  ;;  %v6209_v13 = vsel %vm2251_vm14, %v2333_v43, %v2332_v51  ;;  %v2429_v63 = vsub.s32 4294967266, %v6187_v26  ;;  %v6213_v47 = vsub.s32 %v6115_v33, %v2520_v58 }
 0x2d5   : > { %v6199_v36 = vmul.u32.u64.low %v6191_v61, %v2712_v7  ;;  %v6200_v34 = vmul.u32.u64.high %v6191_v61, %v2712_v7, %v6199_v36  ;;  %v6203_v46 = vmul.u32.u64.low %v6191_v61, %v2708_v25  ;;  %v6204_v4 = vmul.u32.u64.high %v6191_v61, %v2708_v25, %v6203_v46  ;;  %v6230_v7 = vpop.f32.mrf.mxu1 }
 0x2d6   : > { %v2877_v37 = vshrl.u32 %v2876_v62, 23  ;;  %v2624_v35 = vshll.u32 %v6189_v59, 30  ;;  %v2701_v27 = vsel %vm2697_vm10, %v2681_v56, %v2684_v23  ;;  %v2787_v38 = vshrl.u32 %v6906_v18, %v2784_v8 }
 0x2d7   : > { %v2790_v9 = vshrl.u32 %v6907_v5, %v2784_v8  ;;  %v2703_v6 = vsel %vm2699_vm8, %v2687_v48, %v2702_v22  ;;  %v2786_v51 = vshll.u32 %v6935_v30, %v2783_v11  ;;  %v2789_v32 = vshll.u32 %v6906_v18, %v2783_v11  ;;  %v3894_v12 = vpop.f32.mrf.mxu1 }
 0x2d8   : > { %v2793_v33 = vshrl.u32 %v6905_v49, %v2784_v8  ;;  %v2776_v43 = vand.u32 8388607, %v6886_v29  ;;  %v2792_v58 = vshll.u32 %v6907_v5, %v2783_v11  ;;  %v2795_v23 = vshll.u32 %v6905_v49, %v2783_v11 }
 0x2d9   : > { %v2796_v25 = vshrl.u32 %v6903_v14, %v2784_v8  ;;  %v2782_v62 = vshrl.u32 %v2781_v40, 5  ;;  %v2788_v56 = vor.u32 %v2787_v38, %v2786_v51  ;;  %v2791_v48 = vor.u32 %v2790_v9, %v2789_v32 }
 0x2da   : > { %v3810_v22 = vadd.s32 4294967169, %v2877_v37  ;;  %v2794_v36 = vor.u32 %v2793_v33, %v2792_v58  ;;  %v2798_v54 = vshll.u32 %v6903_v14, %v2783_v11  ;;  %v2799_v20 = vshrl.u32 %v6904_v45, %v2784_v8 }
 0x2db   : > { %v2797_v59 = vor.u32 %v2796_v25, %v2795_v23  ;;  %v6234_v29 = vadd.s32 127, %v2429_v63  ;;  %v2523_v15 = vsub.s32 0, %v6213_v47  ;;  %v6238_v57 = vsub.s32 %v6145_v39, %v2624_v35 }
 0x2dc   : > { %v2704_v40 = vsel %vm2698_vm13, %v2701_v27, %v2703_v6  ;;  %vm2237_vm14 = vweird.f32 %v5146_v31  ;;  %vm2722_vm15 = vc.u32 %v6200_v34, %v6203_v46  ;;  %v2723_v11 = vadd.s32 1, %v6204_v4 }
 0x2dd   : > { %v2777_v37 = vor.u32 8388608, %v2776_v43  ;;  %v2800_v38 = vor.u32 %v2799_v20, %v2798_v54  ;;  %vm2801_vm0 = vcmp.lt.s32.totalorder %v2782_v62, 1  ;;  %vm2803_vm2 = vcmp.lt.s32.totalorder %v2782_v62, 3 }
 0x2de   : > { %vm2804_vm3 = vcmp.lt.s32.totalorder %v2782_v62, 4  ;;  %v2883_v12 = vadd.s32 1, %v3810_v22  ;;  %vm2355_vm4 = vcmp.lt.s32.totalorder %v5468_v16, 0  ;;  %v2809_v63 = vsel %vm2801_vm0, %v2788_v56, %v2791_v48 }
 0x2df   : > { %v2806_v39 = vsel %vm2804_vm3, %v2794_v36, 2102212464  ;;  %v2810_v50 = vsel %vm2804_vm3, %v2797_v59, 920167782  ;;  %v2813_v35 = vsel %vm2801_vm0, %v2791_v48, %v2794_v36  ;;  %v2785_v27 = vshrl.u32 %v6935_v30, %v2784_v8 }
 0x2e0   : > { %vm2802_vm5 = vcmp.lt.s32.totalorder %v2782_v62, 2  ;;  %v2811_v9 = vsel %vm2803_vm2, %v2794_v36, %v2810_v50  ;;  %v2814_v6 = vsel %vm2804_vm3, %v2800_v38, 1326507024  ;;  %v2720_v54 = vmul.u32 %v6191_v61, %v2704_v40 }
 0x2e1   : > { %v2812_v20 = vsel %vm2802_vm5, %v2809_v63, %v2811_v9  ;;  %v2815_v51 = vsel %vm2803_vm2, %v2797_v59, %v2814_v6  ;;  %v2817_v32 = vshll.u32 %v2777_v37, 8  ;;  %v6949_v33 = vand.u32 2147483647, %v5468_v16 }
 0x2e2   : > { %v2724_v8 = vsel %vm2722_vm15, %v2723_v11, %v6204_v4  ;;  %v2805_v58 = vsel %vm2801_vm0, %v2785_v27, %v2788_v56  ;;  %v2807_v61 = vsel %vm2803_vm2, %v2791_v48, %v2806_v39  ;;  %v2816_v23 = vsel %vm2802_vm5, %v2813_v35, %v2815_v51 }
 0x2e3   : > { %vm6256_vm6 = vcmp.le.f32.partialorder %v6949_v33, 0.7853982  ;;  %v6267_v25 = vmul.u32.u64.low %v2817_v32, %v2816_v23  ;;  %v6268_v59 = vmul.u32.u64.high %v2817_v32, %v2816_v23, %v6267_v25  ;;  %v6952_v40 = vsel %vm6014_vm1, 0, %v6067_v55 }
 0x2e4   : > { %v6270_v22 = vmul.u32.u64.low %v2817_v32, %v2812_v20  ;;  %v6271_v36 = vmul.u32.u64.high %v2817_v32, %v2812_v20, %v6270_v22  ;;  %v2342_v37 = vadd.s32 3, %v6952_v40  ;;  %v2439_v4 = vsub.s32 4, %v5940_v42 }
 0x2e5   : > { %v3795_v56 = vmin.u32 %v2523_v15, %v6213_v47  ;;  %vm2884_vm7 = vcmp.gt.s32.totalorder %v2883_v12, 0  ;;  %v2627_v48 = vsub.s32 0, %v6238_v57  ;;  %v6281_v11 = vadd.s32 %v2724_v8, %v2720_v54 }
 0x2e6   : > { %v2808_v38 = vsel %vm2802_vm5, %v2805_v58, %v2807_v61  ;;  %v2885_v39 = vsel %vm2884_vm7, %v2883_v12, 0  ;;  %v2248_v63 = vsel %vm2237_vm14, nan, %v6185_v52  ;;  %v2337_v55 = vsel %vm6014_vm1, %v5245_v24, %v6209_v13 }
 0x2e7   : > { %v2409_v15 = vadd.s32 %v5773_v21, %v5781_v53  ;;  %v2887_v50 = vand.u32 31, %v2885_v39  ;;  %v2425_v35 = vsub.s32 32, %v6187_v26  ;;  %v2431_v27 = vshll.u32 %v6234_v29, 23 }
 0x2e8   : > { %vm2826_vm9 = vc.u32 %v6268_v59, %v6270_v22  ;;  %v2827_v62 = vadd.s32 1, %v6271_v36  ;;  %v2440_v31 = vsel %vm2355_vm4, %v2439_v4, %v5940_v42  ;;  %v2525_v52 = vclz %v3795_v56 }
 0x2e9   : > { %v2824_v1 = vmul.u32 %v2817_v32, %v2808_v38  ;;  %v2888_v13 = vsub.s32 32, %v2887_v50  ;;  %v3799_v12 = vmin.u32 %v2627_v48, %v6238_v57  ;;  %v2726_v21 = vadd.s32 536870912, %v6281_v11 }
 0x2ea   : > { %v2828_v53 = vsel %vm2826_vm9, %v2827_v62, %v6271_v36  ;;  %v6890_v29 = vand.u32 2147483647, %v6158_v44  ;;  %v6306_v9 = vmul.f32 %v2248_v63, %v5752_v0  ;;  %4101 = vcosq.f32 %v2337_v55 }
 0x2eb   : > { %v6308_v6 = vand.u32 3, %v2342_v37  ;;  %v2829_v54 = vadd.s32 %v2828_v53, %v2824_v1  ;;  %v2426_v42 = vshll.u32 %v6023_v41, %v6187_v26  ;;  %v2427_v20 = vshrl.u32 %v2409_v15, %v2425_v35  ;;  %v1500_v1 = vpop.f32.mrf.mxu0 }
 0x2ec   : > { %v2432_v51 = vor.u32 4788187, %v2431_v27  ;;  %v2442_v32 = vsel %vm6256_vm6, 0, %v2440_v31  ;;  %v3796_v33 = vadd.s32 4294967294, %v2525_v52  ;;  %v2891_v58 = vshrl.u32 %v6906_v18, %v2888_v13 }
 0x2ed   : > { %v2830_v8 = vadd.s32 536870912, %v2829_v54  ;;  %v2894_v61 = vshrl.u32 %v6907_v5, %v2888_v13  ;;  %v2629_v0 = vclz %v3799_v12  ;;  %v6316_v23 = vshrl.u32 %v2726_v21, 30 }
 0x2ee   : > { %v2880_v25 = vand.u32 8388607, %v6890_v29  ;;  %v2890_v36 = vshll.u32 %v6935_v30, %v2887_v50  ;;  %v2893_v26 = vshll.u32 %v6906_v18, %v2887_v50  ;;  %v2897_v40 = vshrl.u32 %v6905_v49, %v2888_v13 }
 0x2ef   : > { %v6321_v41 = vshrl.u32 %v2830_v8, 30  ;;  %v2900_v37 = vshrl.u32 %v6903_v14, %v2888_v13  ;;  %v2886_v4 = vshrl.u32 %v2885_v39, 5  ;;  %v2899_v56 = vshll.u32 %v6905_v49, %v2887_v50  ;;  %v1326_v39 = vld [vmem:[%s6843_s5 + $0x70] sm:$0xff] }
 0x2f0   : > { %v2902_v48 = vshll.u32 %v6903_v14, %v2887_v50  ;;  %v2903_v38 = vshrl.u32 %v6904_v45, %v2888_v13  ;;  %v2892_v15 = vor.u32 %v2891_v58, %v2890_v36  ;;  %v2895_v35 = vor.u32 %v2894_v61, %v2893_v26 }
 0x2f1   : > { %v2832_v63 = vshll.u32 %v6321_v41, 30  ;;  %v2896_v27 = vshll.u32 %v6907_v5, %v2887_v50  ;;  %4103 = vsinq.f32 %v2337_v55  ;;  %v2446_v62 = vadd.s32 3, %v2442_v32 }
 0x2f2   : > { %v2901_v31 = vor.u32 %v2900_v37, %v2899_v56  ;;  %v2904_v52 = vor.u32 %v2903_v38, %v2902_v48  ;;  %v2428_v12 = vor.u32 %v2427_v20, %v2426_v42  ;;  %v2433_v21 = vand.u32 2147483647, %v2432_v51 }
 0x2f3   : > { %vm3797_vm1 = vcmp.lt.s32.totalorder %v3796_v33, 0  ;;  %v2898_v53 = vor.u32 %v2897_v40, %v2896_v27  ;;  %vm2133_vm10 = vweird.f32 %v5078_v10  ;;  %v3800_v8 = vadd.s32 4294967294, %v2629_v0 }
 0x2f4   : > { %v6335_v58 = vsub.s32 %v2829_v54, %v2832_v63  ;;  %v2881_v61 = vor.u32 8388608, %v2880_v25  ;;  %vm2905_vm8 = vcmp.lt.s32.totalorder %v2886_v4, 1  ;;  %v2728_v55 = vshll.u32 %v6316_v23, 30 }
 0x2f5   : > { %vm2908_vm11 = vcmp.lt.s32.totalorder %v2886_v4, 4  ;;  %v2913_v50 = vsel %vm2905_vm8, %v2892_v15, %v2895_v35  ;;  %v6339_v32 = vadd.f32 %v1500_v1, %v1326_v39  ;;  %v2889_v36 = vshrl.u32 %v6935_v30, %v2888_v13 }
 0x2f6   : > { %vm2907_vm12 = vcmp.lt.s32.totalorder %v2886_v4, 3  ;;  %v2914_v42 = vsel %vm2908_vm11, %v2901_v31, 920167782  ;;  %v2918_v20 = vsel %vm2908_vm11, %v2904_v52, 1326507024  ;;  %vm2906_vm13 = vcmp.lt.s32.totalorder %v2886_v4, 2 }
 0x2f7   : > { %v2910_v51 = vsel %vm2908_vm11, %v2898_v53, 2102212464  ;;  %v2915_v0 = vsel %vm2907_vm12, %v2898_v53, %v2914_v42  ;;  %v2917_v54 = vsel %vm2905_vm8, %v2895_v35, %v2898_v53  ;;  %v6344_v25 = vpop.eup %4101  ;;  %v2835_v26 = vsub.s32 0, %v6335_v58 }
 0x2f8   : > { %v2916_v40 = vsel %vm2906_vm13, %v2913_v50, %v2915_v0  ;;  %v2919_v37 = vsel %vm2907_vm12, %v2901_v31, %v2918_v20  ;;  %v2921_v56 = vshll.u32 %v2881_v61, 8  ;;  %v2435_v48 = vcvt.s32.f32 %v2428_v12 }
 0x2f9   : > { %v6350_v13 = vsel %vm3797_vm1, 0, %v3796_v33  ;;  %v6353_v38 = vsub.s32 %v6281_v11, %v2728_v55  ;;  %v2909_v63 = vsel %vm2905_vm8, %v2889_v36, %v2892_v15  ;;  %v2911_v27 = vsel %vm2907_vm12, %v2895_v35, %v2910_v51  ;;  %v6954_v15 = vld [vmem:[#allocation8_spill] sm:$0xff]  ;;  %v1327_v55 = vld [vmem:[%s6843_s5 + $0x78] sm:$0xff] }
 0x2fa   : > { %v2920_v52 = vsel %vm2906_vm13, %v2917_v54, %v2919_v37  ;;  %v6358_v39 = vmul.u32.u64.low %v2921_v56, %v2916_v40  ;;  %v6359_v1 = vmul.u32.u64.high %v2921_v56, %v2916_v40, %v6358_v39  ;;  %v2436_v53 = vmul.f32 %v2435_v48, %v2433_v21  ;;  %v1502_v21 = vpop.f32.mrf.mxu0 }
 0x2fb   : > { %v6362_v31 = vmul.u32.u64.low %v2921_v56, %v2920_v52  ;;  %v6363_v61 = vmul.u32.u64.high %v2921_v56, %v2920_v52, %v6362_v31  ;;  %v2980_v33 = vand.u32 2139095040, %v6339_v32  ;;  %v6368_v11 = vmul.f32 %v5828_v28, %v5670_v60 }
 0x2fc   : > { %v3202_v12 = vadd.f32 %v6954_v15, %v6061_v17  ;;  %vm3801_vm14 = vcmp.lt.s32.totalorder %v3800_v8, 0  ;;  %v3807_v35 = vmin.u32 %v2835_v26, %v6335_v58  ;;  %v6379_v50 = vsel %vm2133_vm10, nan, %v6079_v19 }
 0x2fd   : > { %6953 = vst [vmem:[#allocation25_spill] sm:$0xff] %v6368_v11  ;;  %6955 = vst [vmem:[#allocation8_spill] sm:$0xff] %v6379_v50  ;;  %v2533_v36 = vsub.s32 4294967266, %v6350_v13  ;;  %v2912_v60 = vsel %vm2906_vm13, %v2909_v63, %v2911_v27  ;;  %v2981_v28 = vshrl.u32 %v2980_v33, 23  ;;  %vm2348_vm15 = vcmp.eq.s32.totalorder %v6308_v6, 2 }
 0x2fe   : > { %v6384_v17 = vadd.f32 %v3202_v12, %v6306_v9  ;;  %v2731_v42 = vsub.s32 0, %v6353_v38  ;;  %v2931_v20 = vadd.s32 1, %v6359_v1  ;;  %v6389_v51 = vpop.eup %4103  ;;  %v2437_v0 = vxor.u32 2147483648, %v2436_v53 }
 0x2ff   : > { %v6391_v10 = vand.u32 3, %v2446_v62  ;;  %v6394_v19 = vsel %vm3801_vm14, 0, %v3800_v8  ;;  %v6396_v4 = vadd.f32 %v1502_v21, %v1327_v55  ;;  %v2837_v54 = vclz %v3807_v35 }
 0x300   : > { %6956 = vst [vmem:[#allocation26_spill] sm:$0xff] %v6384_v17  ;;  %v2928_v26 = vmul.u32 %v2921_v56, %v2912_v60  ;;  %vm2930_vm0 = vc.u32 %v6363_v61, %v6358_v39  ;;  %v3814_v9 = vadd.s32 4294967169, %v2981_v28  ;;  %v2513_v40 = vadd.s32 %v5978_v2, %v6009_v3 }
 0x301   : > { %v2529_v37 = vsub.s32 32, %v6350_v13  ;;  %v2534_v48 = vadd.s32 127, %v2533_v36  ;;  %v2932_v62 = vsel %vm2930_vm0, %v2931_v20, %v6359_v1  ;;  %v2637_v63 = vsub.s32 4294967266, %v6394_v19 }
 0x302   : > { %v3803_v8 = vmin.u32 %v2731_v42, %v6353_v38  ;;  %v2933_v27 = vadd.s32 %v2932_v62, %v2928_v26  ;;  %v2987_v52 = vadd.s32 1, %v3814_v9  ;;  %v2349_v31 = vxor.u32 2147483648, %v6344_v25  ;;  %v6959_v9 = vld [vmem:[#allocation20_spill] sm:$0xff] }
 0x303   : > { %v2438_v33 = vsel %vm2355_vm4, %v2437_v0, %v2436_v53  ;;  %v6891_v2 = vand.u32 2147483647, %v6339_v32  ;;  %v3808_v3 = vadd.s32 4294967294, %v2837_v54  ;;  %v3084_v1 = vand.u32 2139095040, %v6396_v4  ;;  %v6958_v0 = vld [vmem:[#allocation23_spill] sm:$0xff] }
 0x304   : > { %v2934_v15 = vadd.s32 536870912, %v2933_v27  ;;  %vm2988_vm2 = vcmp.gt.s32.totalorder %v2987_v52, 0  ;;  %v2531_v12 = vshrl.u32 %v2513_v40, %v2529_v37  ;;  %v2535_v35 = vshll.u32 %v2534_v48, 23  ;;  %v6960_v40 = vld [vmem:[#allocation19_spill] sm:$0xff] }
 0x305   : > { %v2633_v55 = vsub.s32 32, %v6394_v19  ;;  %v2989_v21 = vsel %vm2988_vm2, %v2987_v52, 0  ;;  %v2638_v36 = vadd.s32 127, %v2637_v63  ;;  %v2733_v60 = vclz %v3803_v8 }
 0x306   : > { %v6413_v28 = vshrl.u32 %v2934_v15, 30  ;;  %v2991_v42 = vand.u32 31, %v2989_v21  ;;  %v6418_v53 = vsel %vm2348_vm15, %v2349_v31, %v6389_v51  ;;  %v2530_v20 = vshll.u32 %v6213_v47, %v6350_v13 }
 0x307   : > { %v2984_v26 = vand.u32 8388607, %v6891_v2  ;;  %v2617_v37 = vadd.s32 %v6960_v40, %v6959_v9  ;;  %vm3809_vm3 = vcmp.lt.s32.totalorder %v3808_v3, 0  ;;  %v3085_v62 = vshrl.u32 %v3084_v1, 23 }
 0x308   : > { %6957 = vst [vmem:[#allocation27_spill] sm:$0xff] %v6413_v28  ;;  %v2992_v48 = vsub.s32 32, %v2991_v42  ;;  %v6430_v63 = vsel %vm6256_vm6, %v5468_v16, %v2438_v33  ;;  %v6432_v8 = vor.u32 %v2531_v12, %v2530_v20  ;;  %v6434_v52 = vor.u32 4788187, %v2535_v35 }
 0x309   : > { %v2936_v47 = vshll.u32 %v6413_v28, 30  ;;  %v2635_v13 = vshrl.u32 %v2617_v37, %v2633_v55  ;;  %v2639_v31 = vshll.u32 %v2638_v36, 23  ;;  %v3804_v15 = vadd.s32 4294967294, %v2733_v60 }
 0x30a   : > { %v2995_v29 = vshrl.u32 %v6906_v18, %v2992_v48  ;;  %v6438_v9 = vsel %vm3809_vm3, 0, %v3808_v3  ;;  %v2985_v40 = vor.u32 8388608, %v2984_v26  ;;  %v2998_v1 = vshrl.u32 %v6907_v5, %v2992_v48 }
 0x30b   : > { %v3001_v43 = vshrl.u32 %v6905_v49, %v2992_v48  ;;  %v2990_v33 = vshrl.u32 %v2989_v21, 5  ;;  %v2994_v12 = vshll.u32 %v6935_v30, %v2991_v42  ;;  %v2997_v35 = vshll.u32 %v6906_v18, %v2991_v42 }
 0x30c   : > { %v3818_v20 = vadd.s32 4294967169, %v3085_v62  ;;  %v6444_v2 = vsub.s32 %v2933_v27, %v2936_v47  ;;  %v3000_v55 = vshll.u32 %v6907_v5, %v2991_v42  ;;  %v3003_v36 = vshll.u32 %v6905_v49, %v2991_v42 }
 0x30d   : > { %v3004_v3 = vshrl.u32 %v6903_v14, %v2992_v48  ;;  %v2634_v60 = vshll.u32 %v6238_v57, %v6394_v19  ;;  %v2845_v26 = vsub.s32 4294967266, %v6438_v9  ;;  %v2996_v37 = vor.u32 %v2995_v29, %v2994_v12 }
 0x30e   : > { %v2999_v21 = vor.u32 %v2998_v1, %v2997_v35  ;;  %v3002_v56 = vor.u32 %v3001_v43, %v3000_v55  ;;  %v3006_v11 = vshll.u32 %v6903_v14, %v2991_v42  ;;  %v3007_v27 = vshrl.u32 %v6904_v45, %v2992_v48 }
 0x30f   : > { %v3005_v54 = vor.u32 %v3004_v3, %v3003_v36  ;;  %v2636_v62 = vor.u32 %v2635_v13, %v2634_v60  ;;  %v2640_v47 = vor.u32 4788187, %v2639_v31  ;;  %vm3805_vm4 = vcmp.lt.s32.totalorder %v3804_v15, 0 }
 0x310   : > { %v3025_v50 = vshll.u32 %v2985_v40, 8  ;;  %v2939_v17 = vsub.s32 0, %v6444_v2  ;;  %v3008_v24 = vor.u32 %v3007_v27, %v3006_v11  ;;  %vm3009_vm5 = vcmp.lt.s32.totalorder %v2990_v33, 1  ;;  %v6961_v11 = vld [vmem:[#allocation3_spill] sm:$0xff] }
 0x311   : > { %v3091_v28 = vadd.s32 1, %v3818_v20  ;;  %v2846_v57 = vadd.s32 127, %v2845_v26  ;;  %vm3011_vm6 = vcmp.lt.s32.totalorder %v2990_v33, 3  ;;  %vm3012_vm7 = vcmp.lt.s32.totalorder %v2990_v33, 4 }
 0x312   : > { %v3017_v29 = vsel %vm3009_vm5, %v2996_v37, %v2999_v21  ;;  %v3014_v19 = vsel %vm3012_vm7, %v3002_v56, 2102212464  ;;  %v3018_v1 = vsel %vm3012_vm7, %v3005_v54, 920167782  ;;  %v3021_v42 = vsel %vm3009_vm5, %v2999_v21, %v3002_v56 }
 0x313   : > { %v3022_v43 = vsel %vm3012_vm7, %v3008_v24, 1326507024  ;;  %v2993_v13 = vshrl.u32 %v6935_v30, %v2992_v48  ;;  %vm3010_vm9 = vcmp.lt.s32.totalorder %v2990_v33, 2  ;;  %v3019_v31 = vsel %vm3011_vm6, %v3002_v56, %v3018_v1 }
 0x314   : > { %v3023_v40 = vsel %vm3011_vm6, %v3005_v54, %v3022_v43  ;;  %vm2459_vm1 = vcmp.lt.s32.totalorder %v6961_v11, 0  ;;  %v3811_v12 = vmin.u32 %v2939_v17, %v6444_v2  ;;  %v3020_v35 = vsel %vm3010_vm9, %v3017_v29, %v3019_v31  ;;  %v6962_v43 = vld [vmem:[#allocation18_spill] sm:$0xff] }
 0x315   : > { %v3024_v20 = vsel %vm3010_vm9, %v3021_v42, %v3023_v40  ;;  %vm3092_vm10 = vcmp.gt.s32.totalorder %v3091_v28, 0  ;;  %v2641_v55 = vand.u32 2147483647, %v2640_v47  ;;  %v2841_v36 = vsub.s32 32, %v6438_v9 }
 0x316   : > { %v3013_v24 = vsel %vm3009_vm5, %v2993_v13, %v2996_v37  ;;  %v3015_v48 = vsel %vm3011_vm6, %v2999_v21, %v3014_v19  ;;  %v6467_v3 = vmul.u32.u64.low %v3025_v50, %v3024_v20  ;;  %v6468_v56 = vmul.u32.u64.high %v3025_v50, %v3024_v20, %v6467_v3 }
 0x317   : > { %v6470_v54 = vmul.u32.u64.low %v3025_v50, %v3020_v35  ;;  %v6471_v60 = vmul.u32.u64.high %v3025_v50, %v3020_v35, %v6470_v54  ;;  %v2643_v17 = vcvt.s32.f32 %v2636_v62  ;;  %v6475_v26 = vsel %vm3805_vm4, 0, %v3804_v15 }
 0x318   : > { %v2825_v27 = vadd.s32 %v6270_v22, %v6268_v59  ;;  %v3093_v47 = vsel %vm3092_vm10, %v3091_v28, 0  ;;  %v2847_v29 = vshll.u32 %v2846_v57, 23  ;;  %v2941_v1 = vclz %v3811_v12 }
 0x319   : > { %v3016_v37 = vsel %vm3010_vm9, %v3013_v24, %v3015_v48  ;;  %v3095_v21 = vand.u32 31, %v3093_v47  ;;  %4105 = vcosq.f32 %v6430_v63  ;;  %v2537_v19 = vand.u32 2147483647, %v6434_v52 }
 0x31a   : > { %v6482_v42 = vmul.f32 %v2643_v17, %v2641_v55  ;;  %v3486_v62 = vmul.f32 %v6230_v7, %v6962_v43  ;;  %v2741_v15 = vsub.s32 4294967266, %v6475_v26  ;;  %v2843_v13 = vshrl.u32 %v2825_v27, %v2841_v36 }
 0x31b   : > { %vm3034_vm8 = vc.u32 %v6468_v56, %v6470_v54  ;;  %v3035_v59 = vadd.s32 1, %v6471_v60  ;;  %v2539_v22 = vcvt.s32.f32 %v6432_v8  ;;  %v3032_v28 = vmul.u32 %v3025_v50, %v3016_v37 }
 0x31c   : > { %v3081_v33 = vand.u32 2147483647, %v6396_v4  ;;  %v3096_v57 = vsub.s32 32, %v3095_v21  ;;  %3488 = vrot.lane.b32.xlu1 %v3486_v62, %s4154_s17  ;;  %v2842_v52 = vshll.u32 %v6335_v58, %v6438_v9  ;;  %v2848_v7 = vor.u32 4788187, %v2847_v29 }
 0x31d   : > { %v3812_v31 = vadd.s32 4294967294, %v2941_v1  ;;  %v3036_v40 = vsel %vm3034_vm8, %v3035_v59, %v6471_v60  ;;  %4107 = vsinq.f32 %v6430_v63  ;;  %v6496_v12 = vmul.f32 %v2539_v22, %v2537_v19  ;;  %v6964_v22 = vld [vmem:[#allocation5_spill] sm:$0xff] }
 0x31e   : > { %v6963_v8 = vsub.s32 4, %v6958_v0  ;;  %v3037_v35 = vadd.s32 %v3036_v40, %v3032_v28  ;;  %v2645_v20 = vxor.u32 2147483648, %v6482_v42  ;;  %v6508_v58 = vadd.s32 %v6203_v46, %v6200_v34 }
 0x31f   : > { %v6510_v9 = vadd.s32 127, %v2741_v15  ;;  %v2844_v55 = vor.u32 %v2843_v13, %v2842_v52  ;;  %v3088_v36 = vand.u32 8388607, %v3081_v33  ;;  %v3099_v24 = vshrl.u32 %v6906_v18, %v3096_v57 }
 0x320   : > { %v6503_v50 = vsel %vm2459_vm1, %v6963_v8, %v6958_v0  ;;  %v3038_v63 = vadd.s32 536870912, %v3037_v35  ;;  %v3102_v48 = vshrl.u32 %v6907_v5, %v3096_v57  ;;  %v2849_v0 = vand.u32 2147483647, %v2848_v7 }
 0x321   : > { %vm3813_vm11 = vcmp.lt.s32.totalorder %v3812_v31, 0  ;;  %v3105_v3 = vshrl.u32 %v6905_v49, %v3096_v57  ;;  %v3108_v60 = vshrl.u32 %v6903_v14, %v3096_v57  ;;  %v3094_v34 = vshrl.u32 %v3093_v47, 5 }
 0x322   : > { %v6518_v17 = vshrl.u32 %v3038_v63, 30  ;;  %v3098_v46 = vshll.u32 %v6935_v30, %v3095_v21  ;;  %v3101_v27 = vshll.u32 %v6906_v18, %v3095_v21  ;;  %v3104_v29 = vshll.u32 %v6907_v5, %v3095_v21 }
 0x323   : > { %v3107_v1 = vshll.u32 %v6905_v49, %v3095_v21  ;;  %v3110_v37 = vshll.u32 %v6903_v14, %v3095_v21  ;;  %v3111_v19 = vshrl.u32 %v6904_v45, %v3096_v57  ;;  %v6526_v62 = vsel %vm3813_vm11, 0, %v3812_v31 }
 0x324   : > { %v3040_v15 = vshll.u32 %v6518_v17, 30  ;;  %v3100_v13 = vor.u32 %v3099_v24, %v3098_v46  ;;  %v3103_v59 = vor.u32 %v3102_v48, %v3101_v27  ;;  %vm2563_vm12 = vcmp.lt.s32.totalorder %v6964_v22, 0 }
 0x325   : > { %v2851_v47 = vcvt.s32.f32 %v2844_v55  ;;  %v3106_v28 = vor.u32 %v3105_v3, %v3104_v29  ;;  %v3109_v52 = vor.u32 %v3108_v60, %v3107_v1  ;;  %v3112_v18 = vor.u32 %v3111_v19, %v3110_v37  ;;  %v3501_v19 = vld [vmem:[%s6849_s11 + $0x40] sm:$0x3] }
 0x326   : > { %v2737_v5 = vsub.s32 32, %v6475_v26  ;;  %v2743_v49 = vshll.u32 %v6510_v9, 23  ;;  %v6532_v7 = vsub.s32 %v3037_v35, %v3040_v15  ;;  %v3089_v14 = vor.u32 8388608, %v3088_v36  ;;  %v6534_v45 = vpop.eup %4105 }
 0x327   : > { %v6536_v21 = vmul.f32 %v2851_v47, %v2849_v0  ;;  %v2949_v31 = vsub.s32 4294967266, %v6526_v62  ;;  %v3097_v40 = vshrl.u32 %v6935_v30, %v3096_v57  ;;  %vm3113_vm13 = vcmp.lt.s32.totalorder %v3094_v34, 1 }
 0x328   : > { %v3043_v8 = vsub.s32 0, %v6532_v7  ;;  %vm3115_vm14 = vcmp.lt.s32.totalorder %v3094_v34, 3  ;;  %vm3116_vm15 = vcmp.lt.s32.totalorder %v3094_v34, 4  ;;  %v3121_v55 = vsel %vm3113_vm13, %v3100_v13, %v3103_v59 }
 0x329   : > { %v3118_v63 = vsel %vm3116_vm15, %v3106_v28, 2102212464  ;;  %v3122_v9 = vsel %vm3116_vm15, %v3109_v52, 920167782  ;;  %v3125_v35 = vsel %vm3113_vm13, %v3103_v59, %v3106_v28  ;;  %v3126_v36 = vsel %vm3116_vm15, %v3112_v18, 1326507024 }
 0x32a   : > { %v3815_v24 = vmin.u32 %v3043_v8, %v6532_v7  ;;  %vm3114_vm0 = vcmp.lt.s32.totalorder %v3094_v34, 2  ;;  %v3123_v48 = vsel %vm3115_vm14, %v3106_v28, %v3122_v9  ;;  %v3127_v0 = vsel %vm3115_vm14, %v3109_v52, %v3126_v36  ;;  %v6546_v30 = vpop.eup %4107 }
 0x32b   : > { %v2950_v57 = vadd.s32 127, %v2949_v31  ;;  %v3124_v3 = vsel %vm3114_vm0, %v3121_v55, %v3123_v48  ;;  %v3128_v60 = vsel %vm3114_vm0, %v3125_v35, %v3127_v0  ;;  %v3129_v46 = vshll.u32 %v3089_v14, 8  ;;  %v3498_v0 = vld [vmem:[%s6849_s11 + $0x28] sm:$0xff] }
 0x32c   : > { %v2945_v27 = vsub.s32 32, %v6526_v62  ;;  %v3045_v29 = vclz %v3815_v24  ;;  %v3117_v1 = vsel %vm3113_vm13, %v3097_v40, %v3100_v13  ;;  %v3119_v37 = vsel %vm3115_vm14, %v3103_v59, %v3118_v63  ;;  %v3500_v40 = vld [vmem:[%s6849_s11 + $0x38] sm:$0xff] }
 0x32d   : > { %v6556_v15 = vmul.u32.u64.low %v3129_v46, %v3128_v60  ;;  %v6557_v47 = vmul.u32.u64.high %v3129_v46, %v3128_v60, %v6556_v15  ;;  %v6559_v28 = vmul.u32.u64.low %v3129_v46, %v3124_v3  ;;  %v6560_v52 = vmul.u32.u64.high %v3129_v46, %v3124_v3, %v6559_v28 }
 0x32e   : > { %v2541_v18 = vxor.u32 2147483648, %v6496_v12  ;;  %v6965_v14 = vand.u32 2147483647, %v6964_v22  ;;  %v2646_v13 = vsel %vm2563_vm12, %v2645_v20, %v6482_v42  ;;  %v3816_v59 = vadd.s32 4294967294, %v3045_v29 }
 0x32f   : > { %vm3506_vm3 = vcmask 1041408   ;;  %v2739_v8 = vshrl.u32 %v6508_v58, %v2737_v5  ;;  %v2929_v55 = vadd.s32 %v6358_v39, %v6363_v61  ;;  %v2951_v63 = vshll.u32 %v2950_v57, 23  ;;  %v3499_v58 = vld [vmem:[%s6849_s11 + $0x30] sm:$0xff] }
 0x330   : > { %vm6566_vm2 = vcmp.le.f32.partialorder %v6965_v14, 0.7853982  ;;  %v3120_v9 = vsel %vm3114_vm0, %v3117_v1, %v3119_v37  ;;  %3896 = vmatpush3.msk.msra.mxu0 %vm3506_vm3, %v3501_v19  ;;  %v2738_v35 = vshll.u32 %v6353_v38, %v6475_v26  ;;  %v2744_v36 = vor.u32 4788187, %v2743_v49  ;;  %v6972_v37 = vld [vmem:[#allocation21_spill] sm:$0xff] }
 0x331   : > { %v2853_v42 = vxor.u32 2147483648, %v6536_v21  ;;  %vm3817_vm4 = vcmp.lt.s32.totalorder %v3816_v59, 0  ;;  %v6968_v20 = vmov 0.0   ;;  %v2947_v5 = vshrl.u32 %v2929_v55, %v2945_v27 }
 0x332   : > { %3897 = vmatprep.subr.mxu0 %v6968_v20  ;;  %v3048_v24 = vsel %vm3817_vm4, 0, %v3816_v59  ;;  %vm3138_vm5 = vc.u32 %v6557_v47, %v6559_v28  ;;  %v3139_v39 = vadd.s32 1, %v6560_v52  ;;  %vm2345_vm6 = vcmp.eq.s32.totalorder %v6308_v6, 0  ;;  %v3496_v59 = vld [vmem:[%s6849_s11 + $0x18] sm:$0xff] }
 0x333   : > { %3898 = vmatpush3.msra.mxu0 %v3500_v40  ;;  %v6969_v38 = vand.u32 2147483647, %v6961_v11  ;;  %v3033_v26 = vadd.s32 %v6470_v54, %v6468_v56  ;;  %v3049_v34 = vsub.s32 32, %v3048_v24  ;;  %v3053_v49 = vsub.s32 4294967266, %v3048_v24  ;;  %v6973_v40 = vld [vmem:[#allocation24_spill] sm:$0xff] }
 0x334   : > { %v3136_v48 = vmul.u32 %v3129_v46, %v3120_v9  ;;  %3899 = vmatprep.subr.mxu0 %v6968_v20  ;;  %v2740_v57 = vor.u32 %v2739_v8, %v2738_v35  ;;  %v2946_v3 = vshll.u32 %v6444_v2, %v6526_v62  ;;  %v2952_v60 = vor.u32 4788187, %v2951_v63  ;;  %v3497_v46 = vld [vmem:[%s6849_s11 + $0x20] sm:$0xff]  ;;  %v6974_v35 = vld [vmem:[#allocation11_spill] sm:$0xff] }
 0x335   : > { %vm6595_vm7 = vcmp.le.f32.partialorder %v6969_v38, 0.7853982  ;;  %v3140_v27 = vsel %vm3138_vm5, %v3139_v39, %v6560_v52  ;;  %3900 = vmatpush3.msra.mxu0 %v3499_v58  ;;  %v3050_v29 = vshll.u32 %v6532_v7, %v3048_v24  ;;  %v3051_v56 = vshrl.u32 %v3033_v26, %v3049_v34 }
 0x336   : > { %v3054_v54 = vadd.s32 127, %v3053_v49  ;;  %v3141_v1 = vadd.s32 %v3140_v27, %v3136_v48  ;;  %3901 = vmatprep.subr.mxu0 %v6968_v20  ;;  %vm2449_vm9 = vcmp.eq.s32.totalorder %v6391_v10, 0  ;;  %vm2452_vm10 = vcmp.eq.s32.totalorder %v6391_v10, 2  ;;  %v3494_v49 = vld [vmem:[%s6849_s11 + $0x8] sm:$0xff] }
 0x337   : > { %v2453_v2 = vxor.u32 2147483648, %v6534_v45  ;;  %v2745_v62 = vand.u32 2147483647, %v2744_v36  ;;  %vm2771_vm8 = vcmp.lt.s32.totalorder %v6972_v37, 0  ;;  %v2948_v19 = vor.u32 %v2947_v5, %v2946_v3  ;;  %3902 = vmatpush3.msra.mxu0 %v3498_v0 }
 0x338   : > { %v2854_v7 = vsel %vm2771_vm8, %v2853_v42, %v6536_v21  ;;  %v3052_v15 = vor.u32 %v3051_v56, %v3050_v29  ;;  %v3055_v52 = vshll.u32 %v3054_v54, 23  ;;  %v3142_v14 = vadd.s32 536870912, %v3141_v1  ;;  %3903 = vmatprep.subr.mxu0 %v6968_v20 }
 0x339   : > { %v2647_v8 = vsub.s32 4, %v6973_v40  ;;  %v2649_v55 = vsel %vm6566_vm2, %v6964_v22, %v2646_v13  ;;  %v2747_v63 = vcvt.s32.f32 %v2740_v57  ;;  %v2953_v9 = vand.u32 2147483647, %v2952_v60  ;;  %3904 = vmatpush3.msra.mxu0 %v3497_v46  ;;  %v3495_v13 = vld [vmem:[%s6849_s11 + $0x10] sm:$0xff] }
 0x33a   : > { %v2542_v21 = vsel %vm2459_vm1, %v2541_v18, %v6496_v12  ;;  %vm2667_vm11 = vcmp.lt.s32.totalorder %v6974_v35, 0  ;;  %v6975_v36 = vand.u32 2147483647, %v6972_v37  ;;  %v3056_v58 = vor.u32 4788187, %v3055_v52  ;;  %3905 = vmatprep.subr.mxu0 %v6968_v20 }
 0x33b   : > { %v6638_v5 = vshrl.u32 %v3142_v14, 30  ;;  %v2450_v24 = vxor.u32 2147483648, %v6546_v30  ;;  %v2748_v12 = vmul.f32 %v2747_v63, %v2745_v62  ;;  %v2955_v39 = vcvt.s32.f32 %v2948_v19  ;;  %3906 = vmatpush3.msra.mxu0 %v3496_v59 }
 0x33c   : > { %vm6634_vm13 = vcmp.le.f32.partialorder %v6975_v36, 0.7853982  ;;  %vm2448_vm1 = vcmp.lt.s32.totalorder %v6391_v10, 2  ;;  %4109 = vcosq.f32 %v2649_v55  ;;  %v3057_v38 = vand.u32 2147483647, %v3056_v58  ;;  %3907 = vmatprep.subr.mxu0 %v6968_v20 }
 0x33d   : > { %v2857_v18 = vsel %vm6634_vm13, %v6972_v37, %v2854_v7  ;;  %v3059_v26 = vcvt.s32.f32 %v3052_v15  ;;  %v3144_v34 = vshll.u32 %v6638_v5, 30  ;;  %v6978_v48 = vxor.u32 2147483648, %v6389_v51  ;;  %3908 = vmatpush3.msra.mxu0 %v3495_v13 }
 0x33e   : > { %v2545_v57 = vsel %vm6595_vm7, %v6961_v11, %v2542_v21  ;;  %4111 = vsinq.f32 %v2649_v55  ;;  %v2956_v3 = vmul.f32 %v2955_v39, %v2953_v9  ;;  %vm2344_vm14 = vcmp.lt.s32.totalorder %v6308_v6, 2  ;;  %3909 = vmatprep.subr.mxu0 %v6968_v20 }
 0x33f   : > { %v2347_v0 = vsel %vm2345_vm6, %v6344_v25, %v6978_v48  ;;  %v2648_v60 = vsel %vm2563_vm12, %v2647_v8, %v6973_v40  ;;  %4113 = vcosq.f32 %v2857_v18  ;;  %v3060_v27 = vmul.f32 %v3059_v26, %v3057_v38  ;;  %v3493_v25 = vld [vmem:[%s6849_s11] sm:$0xff]  ;;  %3910 = vmatpush3.msra.mxu0 %v3494_v49 }
 0x340   : > { %v6666_v51 = vsub.s32 %v3141_v1, %v3144_v34  ;;  %vm2445_vm15 = vweird.f32 %v5468_v16  ;;  %v2546_v29 = vsel %vm6595_vm7, 0, %v6503_v50  ;;  %v2749_v56 = vxor.u32 2147483648, %v2748_v12  ;;  %3911 = vmatprep.subr.mxu0 %v6968_v20 }
 0x341   : > { %v2855_v54 = vsub.s32 4, %v6321_v41  ;;  %4115 = vsinq.f32 %v2857_v18  ;;  %v2451_v1 = vsel %vm2449_vm9, %v6534_v45, %v2450_v24  ;;  %v2454_v46 = vsel %vm2452_vm10, %v2453_v2, %v6546_v30  ;;  %3912 = vmatpush3.msra.mxu0 %v3493_v25 }
 0x342   : > { %v3061_v62 = vxor.u32 2147483648, %v3060_v27  ;;  %v3147_v19 = vsub.s32 0, %v6666_v51  ;;  %4117 = vcosq.f32 %v2545_v57  ;;  %v2650_v50 = vsel %vm6566_vm2, 0, %v2648_v60 }
 0x343   : > { %v2957_v61 = vxor.u32 2147483648, %v2956_v3  ;;  %vm2979_vm12 = vcmp.lt.s32.totalorder %v6339_v32, 0  ;;  %v6979_v7 = vand.u32 2147483647, %v6339_v32  ;;  %v3063_v2 = vsub.s32 4, %v6518_v17 }
 0x344   : > { %v3062_v30 = vsel %vm2979_vm12, %v3061_v62, %v3060_v27  ;;  %v3819_v20 = vmin.u32 %v3147_v19, %v6666_v51  ;;  %4119 = vsinq.f32 %v2545_v57  ;;  %v2750_v31 = vsel %vm2667_vm11, %v2749_v56, %v2748_v12  ;;  %v6989_v62 = vld [vmem:[#allocation27_spill] sm:$0xff] }
 0x345   : > { %vm6690_vm0 = vcmp.le.f32.partialorder %v6979_v7, 0.7853982  ;;  %v2856_v15 = vsel %vm2771_vm8, %v2855_v54, %v6321_v41  ;;  %v2654_v14 = vadd.s32 3, %v2650_v50  ;;  %vm2875_vm2 = vcmp.lt.s32.totalorder %v6158_v44, 0 }
 0x346   : > { %v3065_v52 = vsel %vm6690_vm0, %v6339_v32, %v3062_v30  ;;  %v3149_v59 = vclz %v3819_v20  ;;  %v2455_v40 = vsel %vm2448_vm1, %v2451_v1, %v2454_v46  ;;  %v6982_v8 = vand.u32 2147483647, %v6974_v35 }
 0x347   : > { %4121 = vcosq.f32 %v3065_v52  ;;  %v2958_v41 = vsel %vm2875_vm2, %v2957_v61, %v2956_v3  ;;  %v2858_v9 = vsel %vm6634_vm13, 0, %v2856_v15  ;;  %v3064_v10 = vsel %vm2979_vm12, %v3063_v2, %v6518_v17 }
 0x348   : > { %vm6711_vm3 = vcmp.le.f32.partialorder %v6982_v8, 0.7853982  ;;  %4123 = vsinq.f32 %v3065_v52  ;;  %v3820_v21 = vadd.s32 4294967294, %v3149_v59  ;;  %v6728_v36 = vsel %vm2344_vm14, %v2347_v0, %v6418_v53  ;;  %v6988_v0 = vld [vmem:[#allocation9_spill] sm:$0xff] }
 0x349   : > { %v2753_v63 = vsel %vm6711_vm3, %v6974_v35, %v2750_v31  ;;  %v2550_v58 = vadd.s32 3, %v2546_v29  ;;  %v2751_v13 = vsub.s32 4, %v6316_v23  ;;  %v6985_v24 = vand.u32 2147483647, %v6158_v44  ;;  %v4110_v6 = vpop.eup %4109 }
 0x34a   : > { %v2456_v42 = vsel %vm2445_vm15, nan, %v2455_v40  ;;  %v2655_v18 = vand.u32 3, %v2654_v14  ;;  %vm3821_vm5 = vcmp.lt.s32.totalorder %v3820_v21, 0  ;;  %4125 = vcosq.f32 %v2753_v63 }
 0x34b   : > { %vm6733_vm4 = vcmp.le.f32.partialorder %v6985_v24, 0.7853982  ;;  %v2862_v53 = vadd.s32 3, %v2858_v9  ;;  %v3066_v39 = vsel %vm6690_vm0, 0, %v3064_v10  ;;  %v3152_v38 = vsel %vm3821_vm5, 0, %v3820_v21  ;;  %v4112_v26 = vpop.eup %4111 }
 0x34c   : > { %v2961_v17 = vsel %vm6733_vm4, %v6158_v44, %v2958_v41  ;;  %4127 = vsinq.f32 %v2753_v63  ;;  %v3137_v34 = vadd.s32 %v6559_v28, %v6557_v47  ;;  %v3153_v16 = vsub.s32 32, %v3152_v38  ;;  %v4114_v48 = vpop.eup %4113 }
 0x34d   : > { %v3157_v49 = vsub.s32 4294967266, %v3152_v38  ;;  %v6747_v57 = vmul.f32 %v2456_v42, %v6988_v0  ;;  %v6749_v3 = vand.u32 3, %v2550_v58  ;;  %v2752_v60 = vsel %vm2667_vm11, %v2751_v13, %v6316_v23 }
 0x34e   : > { %4129 = vcosq.f32 %v2961_v17  ;;  %v4116_v27 = vpop.eup %4115  ;;  %v3070_v25 = vadd.s32 3, %v3066_v39  ;;  %v3154_v29 = vshll.u32 %v6666_v51, %v3152_v38  ;;  %v3155_v56 = vshrl.u32 %v3137_v34, %v3153_v16 }
 0x34f   : > { %v3158_v54 = vadd.s32 127, %v3157_v49  ;;  %v2658_v47 = vxor.u32 2147483648, %v4112_v26  ;;  %v2661_v28 = vxor.u32 2147483648, %v4110_v6  ;;  %v2863_v1 = vand.u32 3, %v2862_v53  ;;  %v6755_v46 = vpop.eup %4117 }
 0x350   : > { %4131 = vsinq.f32 %v2961_v17  ;;  %vm2653_vm6 = vweird.f32 %v6964_v22  ;;  %vm2656_vm7 = vcmp.lt.s32.totalorder %v2655_v18, 2  ;;  %v2959_v19 = vsub.s32 4, %v6989_v62  ;;  %v6993_v22 = vld [vmem:[#allocation26_spill] sm:$0xff] }
 0x351   : > { %v3156_v50 = vor.u32 %v3155_v56, %v3154_v29  ;;  %v3159_v23 = vshll.u32 %v3158_v54, 23  ;;  %vm2657_vm9 = vcmp.eq.s32.totalorder %v2655_v18, 0  ;;  %vm2660_vm10 = vcmp.eq.s32.totalorder %v2655_v18, 2  ;;  %v4120_v51 = vpop.eup %4119  ;;  %v6994_v56 = vld [vmem:[#allocation12_spill] sm:$0xff] }
 0x352   : > { %v2866_v61 = vxor.u32 2147483648, %v4116_v27  ;;  %v2869_v7 = vxor.u32 2147483648, %v4114_v48  ;;  %v2754_v45 = vsel %vm6711_vm3, 0, %v2752_v60  ;;  %vm2861_vm8 = vweird.f32 %v6972_v37 }
 0x353   : > { %v3071_v30 = vand.u32 3, %v3070_v25  ;;  %v3160_v2 = vor.u32 4788187, %v3159_v23  ;;  %v2659_v31 = vsel %vm2657_vm9, %v4110_v6, %v2658_v47  ;;  %v2662_v15 = vsel %vm2660_vm10, %v2661_v28, %v4112_v26  ;;  %v6990_v26 = vld [vmem:[#allocation2_spill] sm:$0xff] }
 0x354   : > { %v4122_v20 = vpop.eup %4121  ;;  %vm2865_vm11 = vcmp.eq.s32.totalorder %v2863_v1, 0  ;;  %vm2868_vm13 = vcmp.eq.s32.totalorder %v2863_v1, 2  ;;  %v2960_v14 = vsel %vm2875_vm2, %v2959_v19, %v6989_v62  ;;  %v3163_v8 = vcvt.s32.f32 %v3156_v50  ;;  %v6995_v19 = vld [vmem:[#allocation14_spill] sm:$0xff] }
 0x355   : > { %v4124_v52 = vpop.eup %4123  ;;  %v3077_v59 = vxor.u32 2147483648, %v4122_v20  ;;  %v3161_v40 = vand.u32 2147483647, %v3160_v2  ;;  %vm2553_vm1 = vcmp.eq.s32.totalorder %v6749_v3, 0  ;;  %vm2556_vm14 = vcmp.eq.s32.totalorder %v6749_v3, 2  ;;  %v6997_v2 = vld [vmem:[#allocation6_spill] sm:$0xff] }
 0x356   : > { %v2758_v55 = vadd.s32 3, %v2754_v45  ;;  %v2867_v41 = vsel %vm2865_vm11, %v4114_v48, %v2866_v61  ;;  %v2870_v63 = vsel %vm2868_vm13, %v2869_v7, %v4116_v27  ;;  %v3074_v9 = vxor.u32 2147483648, %v4124_v52  ;;  %v6996_v45 = vld [vmem:[#allocation16_spill] sm:$0xff] }
 0x357   : > { %v2663_v10 = vsel %vm2656_vm7, %v2659_v31, %v2662_v15  ;;  %vm3073_vm15 = vcmp.eq.s32.totalorder %v3071_v30, 0  ;;  %vm3076_vm12 = vcmp.eq.s32.totalorder %v3071_v30, 2  ;;  %v3164_v21 = vmul.f32 %v3163_v8, %v3161_v40  ;;  %v4126_v42 = vpop.eup %4125 }
 0x358   : > { %vm2864_vm0 = vcmp.lt.s32.totalorder %v2863_v1, 2  ;;  %v2962_v58 = vsel %vm6733_vm4, 0, %v2960_v14  ;;  %v3075_v13 = vsel %vm3073_vm15, %v4122_v20, %v3074_v9  ;;  %v3078_v24 = vsel %vm3076_vm12, %v3077_v59, %v4124_v52  ;;  %v7000_v9 = vld [vmem:[#allocation25_spill] sm:$0xff] }
 0x359   : > { %v2554_v17 = vxor.u32 2147483648, %v4120_v51  ;;  %v2557_v6 = vxor.u32 2147483648, %v6755_v46  ;;  %v2871_v53 = vsel %vm2864_vm0, %v2867_v41, %v2870_v63  ;;  %v3165_v39 = vxor.u32 2147483648, %v3164_v21  ;;  %v4128_v38 = vpop.eup %4127  ;;  %v6999_v63 = vld [vmem:[#allocation4_spill] sm:$0xff] }
 0x35a   : > { %vm2341_vm2 = vweird.f32 %v6990_v26  ;;  %v2664_v18 = vsel %vm2653_vm6, nan, %v2663_v10  ;;  %vm3072_vm3 = vcmp.lt.s32.totalorder %v3071_v30, 2  ;;  %vm3083_vm5 = vcmp.lt.s32.totalorder %v6396_v4, 0 }
 0x35b   : > { %v3167_v12 = vsub.s32 4, %v6638_v5  ;;  %v4130_v34 = vpop.eup %4129  ;;  %v2966_v16 = vadd.s32 3, %v2962_v58  ;;  %v3079_v49 = vsel %vm3072_vm3, %v3075_v13, %v3078_v24  ;;  %vm6778_vm4 = vcmp.le.f32.partialorder %v3081_v33, 0.7853982  ;;  %v7002_v24 = vld [vmem:[#allocation10_spill] sm:$0xff] }
 0x35c   : > { %v3166_v0 = vsel %vm3083_vm5, %v3165_v39, %v3164_v21  ;;  %v3204_v60 = vadd.f32 %v6993_v22, %v6747_v57  ;;  %vm2549_vm6 = vweird.f32 %v6961_v11  ;;  %v2759_v27 = vand.u32 3, %v2758_v55  ;;  %v7001_v21 = vld [vmem:[#allocation7_spill] sm:$0xff] }
 0x35d   : > { %v2872_v25 = vsel %vm2861_vm8, nan, %v2871_v53  ;;  %v3169_v29 = vsel %vm6778_vm4, %v6396_v4, %v3166_v0  ;;  %v4132_v33 = vpop.eup %4131  ;;  %v3195_v54 = vmul.f32 %v2664_v18, %v6994_v56  ;;  %v2765_v47 = vxor.u32 2147483648, %v4126_v42  ;;  %v7003_v18 = vld [vmem:[#allocation13_spill] sm:$0xff] }
 0x35e   : > { %vm3069_vm7 = vweird.f32 %v6339_v32  ;;  %4133 = vcosq.f32 %v3169_v29  ;;  %v2762_v28 = vxor.u32 2147483648, %v4128_v38  ;;  %v3168_v57 = vsel %vm3083_vm5, %v3167_v12, %v6638_v5  ;;  %v7005_v56 = vld [vmem:[#allocation17_spill] sm:$0xff] }
 0x35f   : > { %v3080_v1 = vsel %vm3069_vm7, nan, %v3079_v49  ;;  %4135 = vsinq.f32 %v3169_v29  ;;  %v2555_v37 = vsel %vm2553_vm1, %v6755_v46, %v2554_v17  ;;  %v2558_v62 = vsel %vm2556_vm14, %v2557_v6, %v4120_v51  ;;  %v6998_v46 = vld [vmem:[#allocation8_spill] sm:$0xff] }
 0x360   : > { %v3197_v50 = vmul.f32 %v2872_v25, %v6995_v19  ;;  %v2967_v23 = vand.u32 3, %v2966_v16  ;;  %vm2552_vm9 = vcmp.lt.s32.totalorder %v6749_v3, 2  ;;  %vm2761_vm10 = vcmp.eq.s32.totalorder %v2759_v27, 0 }
 0x361   : > { %v2970_v32 = vxor.u32 2147483648, %v4132_v33  ;;  %v2973_v61 = vxor.u32 2147483648, %v4130_v34  ;;  %v3205_v7 = vadd.f32 %v3204_v60, %v3195_v54  ;;  %vm2764_vm8 = vcmp.eq.s32.totalorder %v2759_v27, 2 }
 0x362   : > { %v3199_v5 = vmul.f32 %v3080_v1, %v6996_v45  ;;  %v3170_v30 = vsel %vm6778_vm4, 0, %v3168_v57  ;;  %v3190_v20 = vmul.f32 %v6998_v46, %v6997_v2  ;;  %v2559_v31 = vsel %vm2552_vm9, %v2555_v37, %v2558_v62 }
 0x363   : > { %v2763_v51 = vsel %vm2761_vm10, %v4126_v42, %v2762_v28  ;;  %v2766_v15 = vsel %vm2764_vm8, %v2765_v47, %v4128_v38  ;;  %v2352_v3 = vsel %vm2341_vm2, nan, %v6728_v36  ;;  %v3206_v52 = vadd.f32 %v3205_v7, %v3197_v50 }
 0x364   : > { %vm2969_vm11 = vcmp.eq.s32.totalorder %v2967_v23, 0  ;;  %vm2972_vm13 = vcmp.eq.s32.totalorder %v2967_v23, 2  ;;  %vm2760_vm1 = vcmp.lt.s32.totalorder %v2759_v27, 2  ;;  %v3174_v40 = vadd.s32 3, %v3170_v30 }
 0x365   : > { %v2971_v14 = vsel %vm2969_vm11, %v4130_v34, %v2970_v32  ;;  %v2974_v59 = vsel %vm2972_vm13, %v2973_v61, %v4132_v33  ;;  %v2560_v8 = vsel %vm2549_vm6, nan, %v2559_v31  ;;  %v2767_v55 = vsel %vm2760_vm1, %v2763_v51, %v2766_v15  ;;  %v7006_v15 = vld [vmem:[#allocation22_spill] sm:$0xff] }
 0x366   : > { %v3207_v41 = vadd.f32 %v3206_v52, %v3199_v5  ;;  %v3214_v10 = vadd.f32 %v7000_v9, %v6999_v63  ;;  %v3192_v58 = vmul.f32 %v2352_v3, %v7001_v21  ;;  %vm2968_vm14 = vcmp.lt.s32.totalorder %v2967_v23, 2 }
 0x367   : > { %vm2757_vm15 = vweird.f32 %v6974_v35  ;;  %v2975_v36 = vsel %vm2968_vm14, %v2971_v14, %v2974_v59  ;;  %v3194_v42 = vmul.f32 %v2560_v8, %v7002_v24  ;;  %v3175_v6 = vand.u32 3, %v3174_v40  ;;  %v7004_v35 = vld [vmem:[#allocation15_spill] sm:$0xff] }
 0x368   : > { %v3215_v13 = vadd.f32 %v3214_v10, %v3190_v20  ;;  %v2768_v17 = vsel %vm2757_vm15, nan, %v2767_v55  ;;  %vm2965_vm12 = vweird.f32 %v6158_v44  ;;  %v3208_v11 = vrot.slane %v3207_v41, 4 }
 0x369   : > { %v2976_v38 = vsel %vm2965_vm12, nan, %v2975_v36  ;;  %v3196_v12 = vmul.f32 %v2768_v17, %v7003_v18  ;;  %vm3180_vm0 = vcmp.eq.s32.totalorder %v3175_v6, 2  ;;  %vm3177_vm2 = vcmp.eq.s32.totalorder %v3175_v6, 0 }
 0x36a   : > { %v3216_v39 = vadd.f32 %v3215_v13, %v3192_v58  ;;  %v3198_v48 = vmul.f32 %v2976_v38, %v7004_v35  ;;  %v3209_v0 = vadd.f32 %v3208_v11, %v3207_v41  ;;  %vm3176_vm3 = vcmp.lt.s32.totalorder %v3175_v6, 2 }
 0x36b   : > { %v4134_v53 = vpop.eup %4133  ;;  %vm3173_vm5 = vweird.f32 %v6396_v4  ;;  %v4155_v19 = vmov 1966171168   ;;  %v3236_v23 = vlaneseq  ;;  %vm3491_vm6 = vcmask 269312  }
 0x36c   : > { %v4136_v26 = vpop.eup %4135  ;;  %v3181_v34 = vxor.u32 2147483648, %v4134_v53  ;;  %v3217_v16 = vadd.f32 %v3216_v39, %v3194_v42  ;;  %v3210_v33 = vrot.slane %v3209_v0, 2  ;;  %v3234_v50 = vunpack.c.l.s4 %v4155_v19 }
 0x36d   : > { %v3178_v49 = vxor.u32 2147483648, %v4136_v26  ;;  %v3237_v45 = vshrl.u32 %v3236_v23, 7  ;;  %vm3250_vm4 = vcmp.lt.s32.totalorder %v3236_v23, 256  ;;  %v3485_v3 = vmul.f32 %v7006_v15, %v6962_v43 }
 0x36e   : > { %v3182_v22 = vsel %vm3180_vm0, %v3181_v34, %v4136_v26  ;;  %v3218_v27 = vadd.f32 %v3217_v16, %v3196_v12  ;;  %v3211_v28 = vadd.f32 %v3210_v33, %v3209_v0  ;;  %v3235_v4 = vunpack.c.0.s8 %v3234_v50 }
 0x36f   : > { %v3179_v60 = vsel %vm3177_vm2, %v4134_v53, %v3178_v49  ;;  %vm3502_vm7 = vcmask 539648   ;;  %vm3585_vm9 = vcmask 1040384   ;;  %vm3588_vm10 = vcmask 261120  }
 0x370   : > { %v3183_v44 = vsel %vm3176_vm3, %v3179_v60, %v3182_v22  ;;  %v3219_v29 = vadd.f32 %v3218_v27, %v3198_v48  ;;  %v3212_v37 = vrot.slane %v3211_v28, 1  ;;  %v3238_v46 = vsub.s32 %v3235_v4, %v3237_v45 }
 0x371   : > { %v3184_v25 = vsel %vm3173_vm5, nan, %v3183_v44 }
 0x372   : > { %v3200_v54 = vmul.f32 %v3184_v25, %v7005_v56  ;;  %v3213_v61 = vadd.f32 %v3212_v37, %v3211_v28 }
 0x374   : > { %v3220_v47 = vadd.f32 %v3219_v29, %v3200_v54  ;;  %v3228_v30 = vmul.f32 0.015625, %v3213_v61 }
 0x376   : > { %v3221_v1 = vrot.slane %v3220_v47, 4 }
 0x378   : > { %v3222_v57 = vadd.f32 %v3221_v1, %v3220_v47 }
 0x37a   : > { %v3223_v62 = vrot.slane %v3222_v57, 2 }
 0x37c   : > { %v3224_v32 = vadd.f32 %v3223_v62, %v3222_v57 }
 0x37e   : > { %v3225_v7 = vrot.slane %v3224_v32, 1 }
 0x380   : > { %v3226_v5 = vadd.f32 %v3225_v7, %v3224_v32 }
 0x382   : > { %v3229_v2 = vmul.f32 0.015625, %v3226_v5 }
 0x384   : > { %v3232_v20 = vcombine.low %v3228_v30, %v3229_v2 }
 0x386   : > { %v3239_v31 = vrot.slane %v3232_v20, %v3238_v46 }
 0x388   : > { %v3246_v51 = vrot.slane %v3239_v31, %v3238_v46 }
 0x38a   : > { %3252 = vst.msk [vmem:[%s462_s27] sm:$0x3] %vm3250_vm4, %v3246_v51 }
 0x38e   : > { %v3489_v52 = vpop.permute.xlu1 %3488 }
 0x38f   : > { %v3492_v14 = vsel %vm3491_vm6, %v3485_v3, %v3489_v52 }
 0x390   : > { %3914 = vmatmul.mubr.msk.f32.vlgmr.msra.gmra.mxu0 %vm3502_vm7, %v3492_v14 }
 0x450   : > { %v3576_v59 = vpop.f32.mrf.mxu0 }
 0x451   : > { %v3581_v40 = vrot.slane %v3576_v59, 7 }
 0x452   : > { %v3915_v8 = vpop.f32.mrf.mxu0 }
 0x453   : > { %3582 = vrot.lane.b32.xlu0 %v3581_v40, %s4156_s28 }
 0x4c5   : > { %v3583_v55 = vpop.permute.xlu0 %3582 }
 0x4c6   : > { %v3586_v41 = vsel %vm3585_vm9, 0.0, %v3583_v55 }
 0x4c7   : > { %v3587_v63 = vadd.f32 %v3586_v41, %v3576_v59 }
 0x4c9   : > { %3589 = vst.msk [vmem:[%s466_s14] sm:$0xff] %vm3588_vm10, %v3587_v63 }
 0x4ca PF: > { %s24_s25 = sadd.s32 1, %s4143_s25  }
 0x4cb   : > { %p21_p4 = scmp.ge.s32.totalorder %s24_s25, 4  }
 0x4cd   :  { %23 = sbr.rel (!%p21_p4) target bundleno = 1 (0x1), region = 113 }

</bundles_post_ra>
